<compile_context>
chip_gen: v6e
topology: v6e:2x2x1
jax: 0.10.0
libtpu: 0.0.40
codegen_flags: <defaults>
</compile_context>

<pallas_src>
import functools

import jax
import jax.numpy as jnp
from jax import lax
from jax.experimental import pallas as pl
from jax.experimental.pallas import tpu as pltpu


def _round_up(x, m):
    return ((x + m - 1) // m) * m


def _vmem_limit_bytes():
    """~96 MiB on 128-MiB-VMEM chips (v5e/v6e), ~48 MiB on v7x (64 MiB/TC)."""
    try:
        cap = pltpu.get_tpu_info().vmem_capacity_bytes
    except Exception:
        cap = 128 * 1024 * 1024
    return int(min(96 * 1024 * 1024, (cap * 3) // 4))


# ----------------------------------------------------------------------------
# In-kernel helpers
# ----------------------------------------------------------------------------
def _zero_halo(scr, pad, h, w):
    """Zero the perimeter of scr; its interior is [pad:pad+h, pad:pad+w, :].

    Done every grid step (cheap perimeter strips, not a full-scratch fill).
    We cannot do it only at program_id==0: with a 'parallel' batch axis each
    TensorCore owns its own scratch and may never execute step 0."""
    Hh, Wh, C = scr.shape
    scr[0:pad, :, :] = jnp.zeros((pad, Wh, C), scr.dtype)
    scr[pad + h:Hh, :, :] = jnp.zeros((Hh - pad - h, Wh, C), scr.dtype)
    scr[pad:pad + h, 0:pad, :] = jnp.zeros((h, pad, C), scr.dtype)
    scr[pad:pad + h, pad + w:Wh, :] = jnp.zeros((h, Wh - pad - w, C), scr.dtype)


def _conv2d(img, w, k, stride, Ho, Wo, a_scr=None):
    """k x k conv of a spatially padded image (zero halo already in place).

    img:   (Hi, Wi, C) f32 value.
    w:     (k*k, C, Cp) bf16 value, tap-major, BN scale folded in.
    a_scr: optional (Ho*Wo, k*k*C) bf16 VMEM scratch.  When given (C must be a
           multiple of 128 so tap blocks are lane-aligned) the taps are staged
           as an im2col operand and a SINGLE MXU matmul with K = k*k*C is
           issued, i.e. tap accumulation happens in the MXU, not on the VPU.
    Returns (Ho*Wo, Cp) f32.
    """
    C = img.shape[-1]
    Cp = w.shape[-1]
    kk = k * k

    def tap(ki, kj):
        sl = lax.slice(
            img, (ki, kj, 0),
            (ki + (Ho - 1) * stride + 1, kj + (Wo - 1) * stride + 1, C),
            (stride, stride, 1))
        return sl.reshape(Ho * Wo, C).astype(jnp.bfloat16)

    if a_scr is not None:
        for ki in range(k):
            for kj in range(k):
                t = ki * k + kj
                a_scr[:, t * C:(t + 1) * C] = tap(ki, kj)     # lane-aligned store
        return jnp.dot(a_scr[...], w.reshape(kk * C, Cp),
                       preferred_element_type=jnp.float32)

    # C not lane-aligned (tiny Cin): per-tap matmuls with f32 accumulation.
    acc = None
    for ki in range(k):
        for kj in range(k):
            d = jnp.dot(tap(ki, kj), w[ki * k + kj],
                        preferred_element_type=jnp.float32)
            acc = d if acc is None else acc + d
    return acc


def _basic_block_kernel(x_ref, w1_ref, b1_ref, w2_ref, b2_ref, ws_ref, bs_ref,
                        o_ref, xpad, mpad, a2_scr, *opt_scr,
                        k, pad, stride, Ho, Wo):
    """conv1+bn1+relu -> conv2+bn2 -> +shortcut -> relu, one batch element per
    grid step; all intermediates stay in VMEM (conv1 output never hits HBM)."""
    _, H, W, Cin = x_ref.shape
    Cp = o_ref.shape[-1]
    a1_scr = opt_scr[0] if opt_scr else None

    # --- stage conv1 input with its zero halo (padding never touches HBM) ---
    _zero_halo(xpad, pad, H, W)
    xpad[pad:pad + H, pad:pad + W, :] = x_ref[0].astype(xpad.dtype)
    ximg = xpad[...]

    # --- conv1 + folded bn1 + relu ---
    out1 = jnp.maximum(
        _conv2d(ximg, w1_ref[...], k, stride, Ho, Wo, a1_scr) + b1_ref[...],
        0.0)

    # --- stage conv1 output with a zero halo for conv2 (VMEM only) ---
    _zero_halo(mpad, pad, Ho, Wo)
    mpad[pad:pad + Ho, pad:pad + Wo, :] = out1.reshape(Ho, Wo, Cp)

    # --- conv2 + folded bn2: single tap-merged MXU matmul, K = k*k*Cp ---
    out2 = _conv2d(mpad[...], w2_ref[...], k, 1, Ho, Wo, a2_scr) + b2_ref[...]

    # --- shortcut: 1x1 conv (+bn) on the already-resident padded input.
    #     Identity shortcut == identity weights / zero bias (folded in the
    #     wrapper), which also zero-fills the padded output channels for free.
    xs = lax.slice(
        ximg, (pad, pad, 0),
        (pad + (Ho - 1) * stride + 1, pad + (Wo - 1) * stride + 1, Cin),
        (stride, stride, 1)).reshape(Ho * Wo, Cin).astype(jnp.bfloat16)
    sc = jnp.dot(xs, ws_ref[...], preferred_element_type=jnp.float32) + bs_ref[...]

    # --- residual add + relu, lane-dense bf16 store ---
    o_ref[0] = jnp.maximum(out2 + sc, 0.0).reshape(Ho, Wo, Cp).astype(o_ref.dtype)


# ----------------------------------------------------------------------------
# Trace-time glue: BN folding + channel padding + weight layout (plain JAX)
# ----------------------------------------------------------------------------
def _fold_conv_bn(w_t, gamma, beta, mean, var, cin_pad, cout_pad, eps=1e-5):
    """Fold inference-mode BN into a torch-layout conv weight.
    w_t: (cout, cin, kh, kw).  Returns:
      w:    (kh*kw, cin_pad, cout_pad) bf16, tap-major, BN scale folded in
      bias: (1, cout_pad) f32
    """
    cout, cin, kh, kw = w_t.shape
    scale = gamma / jnp.sqrt(var + eps)
    bias = beta - mean * scale
    w = jnp.transpose(w_t, (2, 3, 1, 0)) * scale[None, None, None, :]
    w = jnp.pad(w, ((0, 0), (0, 0), (0, cin_pad - cin), (0, cout_pad - cout)))
    w = w.reshape(kh * kw, cin_pad, cout_pad).astype(jnp.bfloat16)
    bias = jnp.pad(bias, (0, cout_pad - cout)).reshape(1, cout_pad)
    return w, bias.astype(jnp.float32)


def fold_block_params(params):
    """Fold BNs into conv weights/biases ONCE (outside the jitted forward) and
    pad output channels to a lane-dense multiple of 128."""
    planes, in_planes, _, _ = params["conv1_w"].shape
    Cp = _round_up(planes, 128)
    w1, b1 = _fold_conv_bn(params["conv1_w"], params["bn1_g"], params["bn1_b"],
                           params["bn1_m"], params["bn1_v"], in_planes, Cp)
    w2, b2 = _fold_conv_bn(params["conv2_w"], params["bn2_g"], params["bn2_b"],
                           params["bn2_m"], params["bn2_v"], Cp, Cp)
    if "sc_w" in params:                         # 1x1 conv + BN shortcut
        ws, bs = _fold_conv_bn(params["sc_w"], params["sc_bn_g"],
                               params["sc_bn_b"], params["sc_bn_m"],
                               params["sc_bn_v"], in_planes, Cp)
        ws = ws[0]                               # (1, Cin, Cp) -> (Cin, Cp)
    else:                                        # identity shortcut
        ws = jnp.eye(in_planes, Cp, dtype=jnp.bfloat16)
        bs = jnp.zeros((1, Cp), jnp.float32)
    return {"w1": w1, "b1": b1, "w2": w2, "b2": b2, "ws": ws, "bs": bs}


# ----------------------------------------------------------------------------
# BasicBlock forward (NCHW in / NCHW out, the torch module's contract)
# ----------------------------------------------------------------------------
def basic_block_forward(x_nchw, fp, fi, stride, planes):
    k, pad = fi, 1
    assert k == 2 * pad + 1, (
        "the torch module's residual add requires conv2 to preserve the "
        "spatial size, i.e. kernel_size == 3 with padding == 1")

    x = jnp.transpose(x_nchw, (0, 2, 3, 1)).astype(jnp.bfloat16)  # NCHW->NHWC bf16
    N, H, W, Cin = x.shape
    kk = k * k
    Cp = fp["w1"].shape[-1]
    assert fp["w1"].shape == (kk, Cin, Cp)
    assert planes <= Cp

    Ho = (H + 2 * pad - k) // stride + 1     # conv1 == conv2 == shortcut spatial
    Wo = (W + 2 * pad - k) // stride + 1

    merge1 = (Cin % 128 == 0)                # conv1 taps mergeable into MXU K?
    Wx = _round_up(W + 2 * pad, 8)           # sublane-friendly scratch widths
    Wm = _round_up(Wo + 2 * pad, 8)

    scratch = [
        pltpu.VMEM((H + 2 * pad, Wx, Cin), jnp.float32),    # conv1 input + halo
        pltpu.VMEM((Ho + 2 * pad, Wm, Cp), jnp.float32),    # conv1 output + halo
        pltpu.VMEM((Ho * Wo, kk * Cp), jnp.bfloat16),       # conv2 im2col operand
    ]
    if merge1:
        scratch.append(pltpu.VMEM((Ho * Wo, kk * Cin), jnp.bfloat16))

    out = pl.pallas_call(
        functools.partial(_basic_block_kernel,
                          k=k, pad=pad, stride=stride, Ho=Ho, Wo=Wo),
        out_shape=jax.ShapeDtypeStruct((N, Ho, Wo, Cp), jnp.bfloat16),
        grid_spec=pltpu.PrefetchScalarGridSpec(
            num_scalar_prefetch=0,
            grid=(N,),
            in_specs=[
                pl.BlockSpec((1, H, W, Cin), lambda n: (n, 0, 0, 0)),   # x
                # weight/bias index maps are constant across the grid, so they
                # are fetched once and stay resident.
                pl.BlockSpec((kk, Cin, Cp), lambda n: (0, 0, 0)),       # w1
                pl.BlockSpec((1, Cp), lambda n: (0, 0)),                # b1
                pl.BlockSpec((kk, Cp, Cp), lambda n: (0, 0, 0)),        # w2
                pl.BlockSpec((1, Cp), lambda n: (0, 0)),                # b2
                pl.BlockSpec((Cin, Cp), lambda n: (0, 0)),              # ws (1x1)
                pl.BlockSpec((1, Cp), lambda n: (0, 0)),                # bs
            ],
            out_specs=pl.BlockSpec((1, Ho, Wo, Cp), lambda n: (n, 0, 0, 0)),
            scratch_shapes=scratch),
        compiler_params=pltpu.CompilerParams(
            dimension_semantics=("parallel",),
            vmem_limit_bytes=_vmem_limit_bytes()),
    )(x, fp["w1"], fp["b1"], fp["w2"], fp["b2"], fp["ws"], fp["bs"])

    # Drop the lane padding and return NCHW f32 (torch module contract).  In a
    # full network the bf16 NHWC / Cp-padded `out` would instead be fed
    # straight into the next block.
    out = out[..., :planes].astype(jnp.float32)
    return jnp.transpose(out, (0, 3, 1, 2))


# ----------------------------------------------------------------------------
# Pure-JAX reference (correctness check)
# ----------------------------------------------------------------------------
def _ref_conv(x_nhwc, w_torch, stride, pad):
    w_hwio = jnp.transpose(w_torch, (2, 3, 1, 0))
    return lax.conv_general_dilated(
        x_nhwc, w_hwio, window_strides=(stride, stride),
        padding=((pad, pad), (pad, pad)),
        dimension_numbers=("NHWC", "HWIO", "NHWC"))


def reference_forward(x_nchw, params, fi, stride):
    x = jnp.transpose(x_nchw, (0, 2, 3, 1)).astype(jnp.float32)
    planes = params["conv1_w"].shape[0]
    Cin = x.shape[-1]

    def bn(y, g, b, m, v, eps=1e-5):
        return (y - m) / jnp.sqrt(v + eps) * g + b

    o = jax.nn.relu(bn(_ref_conv(x, params["conv1_w"], stride, 1),
                       params["bn1_g"], params["bn1_b"],
                       params["bn1_m"], params["bn1_v"]))
    o = bn(_ref_conv(o, params["conv2_w"], 1, 1),
           params["bn2_g"], params["bn2_b"], params["bn2_m"], params["bn2_v"])
    if stride != 1 or Cin != planes:
        sc = bn(_ref_conv(x, params["sc_w"], stride, 0),
                params["sc_bn_g"], params["sc_bn_b"],
                params["sc_bn_m"], params["sc_bn_v"])
    else:
        sc = x
    o = jax.nn.relu(o + sc)
    return jnp.transpose(o, (0, 3, 1, 2))


# ----------------------------------------------------------------------------
def make_params(key, in_planes, planes, fi, stride):
    ks = jax.random.split(key, 8)
    p = {
        "conv1_w": 0.1 * jax.random.normal(ks[0], (planes, in_planes, fi, fi),
                                           jnp.float32),
        "conv2_w": 0.1 * jax.random.normal(ks[1], (planes, planes, fi, fi),
                                           jnp.float32),
        "bn1_g": 1.0 + 0.1 * jax.random.normal(ks[2], (planes,), jnp.float32),
        "bn1_b": 0.1 * jax.random.normal(ks[3], (planes,), jnp.float32),
        "bn1_m": 0.05 * jnp.arange(planes, dtype=jnp.float32),
        "bn1_v": 1.0 + 0.02 * jnp.arange(planes, dtype=jnp.float32),
        "bn2_g": 1.0 + 0.1 * jax.random.normal(ks[4], (planes,), jnp.float32),
        "bn2_b": 0.1 * jax.random.normal(ks[5], (planes,), jnp.float32),
        "bn2_m": 0.03 * jnp.arange(planes, dtype=jnp.float32),
        "bn2_v": 1.0 + 0.01 * jnp.arange(planes, dtype=jnp.float32),
    }
    if stride != 1 or in_planes != planes:
        p.update({
            "sc_w": 0.1 * jax.random.normal(ks[6], (planes, in_planes, 1, 1),
                                            jnp.float32),
            "sc_bn_g": 1.0 + 0.1 * jax.random.normal(ks[7], (planes,),
                                                     jnp.float32),
            "sc_bn_b": jnp.zeros((planes,), jnp.float32),
            "sc_bn_m": 0.01 * jnp.arange(planes, dtype=jnp.float32),
            "sc_bn_v": jnp.ones((planes,), jnp.float32),
        })
    return p


if __name__ == "__main__":
    # BasicBlock(in_planes=4, planes=8, fi=3, stride=1) -> conv-shortcut path.
    in_planes, planes, fi, stride = 4, 8, 3, 1
    N, H, W = 2, 16, 16

    key = jax.random.PRNGKey(0)
    kx, kp = jax.random.split(key)
    x = jax.random.normal(kx, (N, in_planes, H, W), jnp.float32)   # NCHW
    params = make_params(kp, in_planes, planes, fi, stride)
    folded = fold_block_params(params)                  # BN folded once, outside jit

    fwd = jax.jit(basic_block_forward, static_argnums=(2, 3, 4))
    out = jax.block_until_ready(fwd(x, folded, fi, stride, planes))
    ref = jax.block_until_ready(reference_forward(x, params, fi, stride))
    assert out.shape == ref.shape, (out.shape, ref.shape)
    err = float(jnp.max(jnp.abs(out - ref)))
    assert err < 5e-2, f"conv-shortcut config mismatch vs reference: {err}"

    # Identity-shortcut configuration (stride=1, in_planes == planes).
    kx2, kp2 = jax.random.split(jax.random.PRNGKey(1))
    x2 = jax.random.normal(kx2, (2, 8, 16, 16), jnp.float32)
    params2 = make_params(kp2, 8, 8, 3, 1)
    folded2 = fold_block_params(params2)
    out2 = jax.block_until_ready(fwd(x2, folded2, 3, 1, 8))
    ref2 = jax.block_until_ready(reference_forward(x2, params2, 3, 1))
    err2 = float(jnp.max(jnp.abs(out2 - ref2)))
    assert err2 < 5e-2, f"identity-shortcut config mismatch vs reference: {err2}"

    print("KERNEL_OK")
</pallas_src>

<mosaic_0001>
module attributes {stable_mosaic.version = 11 : i64} {
  func.func @_basic_block_kernel(%arg0: i32, %arg1: memref<1x16x16x4xbf16, #tpu.memory_space<vmem>>, %arg2: memref<9x4x128xbf16, #tpu.memory_space<vmem>>, %arg3: memref<1x128xf32, #tpu.memory_space<vmem>>, %arg4: memref<9x128x128xbf16, #tpu.memory_space<vmem>>, %arg5: memref<1x128xf32, #tpu.memory_space<vmem>>, %arg6: memref<4x128xbf16, #tpu.memory_space<vmem>>, %arg7: memref<1x128xf32, #tpu.memory_space<vmem>>, %arg8: memref<1x16x16x128xbf16, #tpu.memory_space<vmem>>, %arg9: memref<18x24x4xf32, #tpu.memory_space<vmem>>, %arg10: memref<18x24x128xf32, #tpu.memory_space<vmem>>, %arg11: memref<256x1152xbf16, #tpu.memory_space<vmem>>) attributes {dimension_semantics = [#tpu.dimension_semantics<parallel>], iteration_bounds = array<i64: 2>, scalar_prefetch = 0 : i64, scratch_operands = 3 : i64, tpu.core_type = #tpu.core_type<tc>, window_params = [{transform_indices = @transform_0, window_bounds = array<i64: 1, 16, 16, 4>}, {pipeline_mode = #tpu.pipeline_mode<synchronous>, transform_indices = @transform_1, window_bounds = array<i64: 9, 4, 128>}, {pipeline_mode = #tpu.pipeline_mode<synchronous>, transform_indices = @transform_2, window_bounds = array<i64: 1, 128>}, {pipeline_mode = #tpu.pipeline_mode<synchronous>, transform_indices = @transform_3, window_bounds = array<i64: 9, 128, 128>}, {pipeline_mode = #tpu.pipeline_mode<synchronous>, transform_indices = @transform_4, window_bounds = array<i64: 1, 128>}, {pipeline_mode = #tpu.pipeline_mode<synchronous>, transform_indices = @transform_5, window_bounds = array<i64: 4, 128>}, {pipeline_mode = #tpu.pipeline_mode<synchronous>, transform_indices = @transform_6, window_bounds = array<i64: 1, 128>}, {transform_indices = @transform_7, window_bounds = array<i64: 1, 16, 16, 128>}]} {
    %cst = arith.constant 0.000000e+00 : f32
    %0 = vector.broadcast %cst : f32 to vector<1x24x4xf32>
    %c0 = arith.constant 0 : index
    %c0_0 = arith.constant 0 : index
    %c0_1 = arith.constant 0 : index
    %1 = vector.load %arg9[%c0, %c0_0, %c0_1] : memref<18x24x4xf32, #tpu.memory_space<vmem>>, vector<1x24x4xf32>
    tpu.vector_store %arg9[%c0, %c0_0, %c0_1], %0 {strides = array<i32>} : memref<18x24x4xf32, #tpu.memory_space<vmem>>, vector<1x24x4xf32>,
    %cst_2 = arith.constant 0.000000e+00 : f32
    %2 = vector.broadcast %cst_2 : f32 to vector<1x24x4xf32>
    %c17 = arith.constant 17 : index
    %c0_3 = arith.constant 0 : index
    %c0_4 = arith.constant 0 : index
    %3 = vector.load %arg9[%c17, %c0_3, %c0_4] : memref<18x24x4xf32, #tpu.memory_space<vmem>>, vector<1x24x4xf32>
    tpu.vector_store %arg9[%c17, %c0_3, %c0_4], %2 {strides = array<i32>} : memref<18x24x4xf32, #tpu.memory_space<vmem>>, vector<1x24x4xf32>,
    %cst_5 = arith.constant 0.000000e+00 : f32
    %4 = vector.broadcast %cst_5 : f32 to vector<16x1x4xf32>
    %c1 = arith.constant 1 : index
    %c0_6 = arith.constant 0 : index
    %c0_7 = arith.constant 0 : index
    %5 = vector.load %arg9[%c1, %c0_6, %c0_7] : memref<18x24x4xf32, #tpu.memory_space<vmem>>, vector<16x1x4xf32>
    tpu.vector_store %arg9[%c1, %c0_6, %c0_7], %4 {strides = array<i32>} : memref<18x24x4xf32, #tpu.memory_space<vmem>>, vector<16x1x4xf32>,
    %cst_8 = arith.constant 0.000000e+00 : f32
    %6 = vector.broadcast %cst_8 : f32 to vector<16x7x4xf32>
    %c1_9 = arith.constant 1 : index
    %c17_10 = arith.constant 17 : index
    %c0_11 = arith.constant 0 : index
    %7 = vector.load %arg9[%c1_9, %c17_10, %c0_11] : memref<18x24x4xf32, #tpu.memory_space<vmem>>, vector<16x7x4xf32>
    tpu.vector_store %arg9[%c1_9, %c17_10, %c0_11], %6 {strides = array<i32>} : memref<18x24x4xf32, #tpu.memory_space<vmem>>, vector<16x7x4xf32>,
    %c0_12 = arith.constant 0 : index
    %c0_13 = arith.constant 0 : index
    %c0_14 = arith.constant 0 : index
    %c0_15 = arith.constant 0 : index
    %8 = vector.load %arg1[%c0_12, %c0_13, %c0_14, %c0_15] : memref<1x16x16x4xbf16, #tpu.memory_space<vmem>>, vector<1x16x16x4xbf16>
    %9 = vector.shape_cast %8 : vector<1x16x16x4xbf16> to vector<16x16x4xbf16>
    %10 = arith.extf %9 : vector<16x16x4xbf16> to vector<16x16x4xf32>
    %c1_16 = arith.constant 1 : index
    %c1_17 = arith.constant 1 : index
    %c0_18 = arith.constant 0 : index
    %11 = vector.load %arg9[%c1_16, %c1_17, %c0_18] : memref<18x24x4xf32, #tpu.memory_space<vmem>>, vector<16x16x4xf32>
    tpu.vector_store %arg9[%c1_16, %c1_17, %c0_18], %10 {strides = array<i32>} : memref<18x24x4xf32, #tpu.memory_space<vmem>>, vector<16x16x4xf32>,
    %c0_19 = arith.constant 0 : index
    %c0_20 = arith.constant 0 : index
    %c0_21 = arith.constant 0 : index
    %12 = vector.load %arg9[%c0_19, %c0_20, %c0_21] : memref<18x24x4xf32, #tpu.memory_space<vmem>>, vector<18x24x4xf32>
    %c0_22 = arith.constant 0 : index
    %c0_23 = arith.constant 0 : index
    %c0_24 = arith.constant 0 : index
    %13 = vector.load %arg2[%c0_22, %c0_23, %c0_24] : memref<9x4x128xbf16, #tpu.memory_space<vmem>>, vector<9x4x128xbf16>
    %14 = vector.extract_strided_slice %12 {offsets = [0, 0, 0], sizes = [16, 16, 4], strides = [1, 1, 1]} : vector<18x24x4xf32> to vector<16x16x4xf32>
    %15 = vector.shape_cast %14 : vector<16x16x4xf32> to vector<256x4xf32>
    %16 = arith.truncf %15 : vector<256x4xf32> to vector<256x4xbf16>
    %17 = vector.extract_strided_slice %13 {offsets = [0, 0, 0], sizes = [1, 4, 128], strides = [1, 1, 1]} : vector<9x4x128xbf16> to vector<1x4x128xbf16>
    %18 = vector.shape_cast %17 : vector<1x4x128xbf16> to vector<4x128xbf16>
    %cst_25 = arith.constant dense<0.000000e+00> : vector<256x128xf32>
    %19 = tpu.matmul %16, %18, %cst_25 {dimension_numbers = #tpu.dot_dimension_numbers<[1], [0], [0], [1], [0, 0, 1, 1], [], []>} : vector<256x4xbf16>, vector<4x128xbf16>, vector<256x128xf32> -> vector<256x128xf32>
    %20 = vector.extract_strided_slice %12 {offsets = [0, 1, 0], sizes = [16, 16, 4], strides = [1, 1, 1]} : vector<18x24x4xf32> to vector<16x16x4xf32>
    %21 = vector.shape_cast %20 : vector<16x16x4xf32> to vector<256x4xf32>
    %22 = arith.truncf %21 : vector<256x4xf32> to vector<256x4xbf16>
    %23 = vector.extract_strided_slice %13 {offsets = [1, 0, 0], sizes = [1, 4, 128], strides = [1, 1, 1]} : vector<9x4x128xbf16> to vector<1x4x128xbf16>
    %24 = vector.shape_cast %23 : vector<1x4x128xbf16> to vector<4x128xbf16>
    %cst_26 = arith.constant dense<0.000000e+00> : vector<256x128xf32>
    %25 = tpu.matmul %22, %24, %cst_26 {dimension_numbers = #tpu.dot_dimension_numbers<[1], [0], [0], [1], [0, 0, 1, 1], [], []>} : vector<256x4xbf16>, vector<4x128xbf16>, vector<256x128xf32> -> vector<256x128xf32>
    %26 = arith.addf %19, %25 : vector<256x128xf32>
    %27 = vector.extract_strided_slice %12 {offsets = [0, 2, 0], sizes = [16, 16, 4], strides = [1, 1, 1]} : vector<18x24x4xf32> to vector<16x16x4xf32>
    %28 = vector.shape_cast %27 : vector<16x16x4xf32> to vector<256x4xf32>
    %29 = arith.truncf %28 : vector<256x4xf32> to vector<256x4xbf16>
    %30 = vector.extract_strided_slice %13 {offsets = [2, 0, 0], sizes = [1, 4, 128], strides = [1, 1, 1]} : vector<9x4x128xbf16> to vector<1x4x128xbf16>
    %31 = vector.shape_cast %30 : vector<1x4x128xbf16> to vector<4x128xbf16>
    %cst_27 = arith.constant dense<0.000000e+00> : vector<256x128xf32>
    %32 = tpu.matmul %29, %31, %cst_27 {dimension_numbers = #tpu.dot_dimension_numbers<[1], [0], [0], [1], [0, 0, 1, 1], [], []>} : vector<256x4xbf16>, vector<4x128xbf16>, vector<256x128xf32> -> vector<256x128xf32>
    %33 = arith.addf %26, %32 : vector<256x128xf32>
    %34 = vector.extract_strided_slice %12 {offsets = [1, 0, 0], sizes = [16, 16, 4], strides = [1, 1, 1]} : vector<18x24x4xf32> to vector<16x16x4xf32>
    %35 = vector.shape_cast %34 : vector<16x16x4xf32> to vector<256x4xf32>
    %36 = arith.truncf %35 : vector<256x4xf32> to vector<256x4xbf16>
    %37 = vector.extract_strided_slice %13 {offsets = [3, 0, 0], sizes = [1, 4, 128], strides = [1, 1, 1]} : vector<9x4x128xbf16> to vector<1x4x128xbf16>
    %38 = vector.shape_cast %37 : vector<1x4x128xbf16> to vector<4x128xbf16>
    %cst_28 = arith.constant dense<0.000000e+00> : vector<256x128xf32>
    %39 = tpu.matmul %36, %38, %cst_28 {dimension_numbers = #tpu.dot_dimension_numbers<[1], [0], [0], [1], [0, 0, 1, 1], [], []>} : vector<256x4xbf16>, vector<4x128xbf16>, vector<256x128xf32> -> vector<256x128xf32>
    %40 = arith.addf %33, %39 : vector<256x128xf32>
    %41 = vector.extract_strided_slice %12 {offsets = [1, 1, 0], sizes = [16, 16, 4], strides = [1, 1, 1]} : vector<18x24x4xf32> to vector<16x16x4xf32>
    %42 = vector.shape_cast %41 : vector<16x16x4xf32> to vector<256x4xf32>
    %43 = arith.truncf %42 : vector<256x4xf32> to vector<256x4xbf16>
    %44 = vector.extract_strided_slice %13 {offsets = [4, 0, 0], sizes = [1, 4, 128], strides = [1, 1, 1]} : vector<9x4x128xbf16> to vector<1x4x128xbf16>
    %45 = vector.shape_cast %44 : vector<1x4x128xbf16> to vector<4x128xbf16>
    %cst_29 = arith.constant dense<0.000000e+00> : vector<256x128xf32>
    %46 = tpu.matmul %43, %45, %cst_29 {dimension_numbers = #tpu.dot_dimension_numbers<[1], [0], [0], [1], [0, 0, 1, 1], [], []>} : vector<256x4xbf16>, vector<4x128xbf16>, vector<256x128xf32> -> vector<256x128xf32>
    %47 = arith.addf %40, %46 : vector<256x128xf32>
    %48 = vector.extract_strided_slice %12 {offsets = [1, 2, 0], sizes = [16, 16, 4], strides = [1, 1, 1]} : vector<18x24x4xf32> to vector<16x16x4xf32>
    %49 = vector.shape_cast %48 : vector<16x16x4xf32> to vector<256x4xf32>
    %50 = arith.truncf %49 : vector<256x4xf32> to vector<256x4xbf16>
    %51 = vector.extract_strided_slice %13 {offsets = [5, 0, 0], sizes = [1, 4, 128], strides = [1, 1, 1]} : vector<9x4x128xbf16> to vector<1x4x128xbf16>
    %52 = vector.shape_cast %51 : vector<1x4x128xbf16> to vector<4x128xbf16>
    %cst_30 = arith.constant dense<0.000000e+00> : vector<256x128xf32>
    %53 = tpu.matmul %50, %52, %cst_30 {dimension_numbers = #tpu.dot_dimension_numbers<[1], [0], [0], [1], [0, 0, 1, 1], [], []>} : vector<256x4xbf16>, vector<4x128xbf16>, vector<256x128xf32> -> vector<256x128xf32>
    %54 = arith.addf %47, %53 : vector<256x128xf32>
    %55 = vector.extract_strided_slice %12 {offsets = [2, 0, 0], sizes = [16, 16, 4], strides = [1, 1, 1]} : vector<18x24x4xf32> to vector<16x16x4xf32>
    %56 = vector.shape_cast %55 : vector<16x16x4xf32> to vector<256x4xf32>
    %57 = arith.truncf %56 : vector<256x4xf32> to vector<256x4xbf16>
    %58 = vector.extract_strided_slice %13 {offsets = [6, 0, 0], sizes = [1, 4, 128], strides = [1, 1, 1]} : vector<9x4x128xbf16> to vector<1x4x128xbf16>
    %59 = vector.shape_cast %58 : vector<1x4x128xbf16> to vector<4x128xbf16>
    %cst_31 = arith.constant dense<0.000000e+00> : vector<256x128xf32>
    %60 = tpu.matmul %57, %59, %cst_31 {dimension_numbers = #tpu.dot_dimension_numbers<[1], [0], [0], [1], [0, 0, 1, 1], [], []>} : vector<256x4xbf16>, vector<4x128xbf16>, vector<256x128xf32> -> vector<256x128xf32>
    %61 = arith.addf %54, %60 : vector<256x128xf32>
    %62 = vector.extract_strided_slice %12 {offsets = [2, 1, 0], sizes = [16, 16, 4], strides = [1, 1, 1]} : vector<18x24x4xf32> to vector<16x16x4xf32>
    %63 = vector.shape_cast %62 : vector<16x16x4xf32> to vector<256x4xf32>
    %64 = arith.truncf %63 : vector<256x4xf32> to vector<256x4xbf16>
    %65 = vector.extract_strided_slice %13 {offsets = [7, 0, 0], sizes = [1, 4, 128], strides = [1, 1, 1]} : vector<9x4x128xbf16> to vector<1x4x128xbf16>
    %66 = vector.shape_cast %65 : vector<1x4x128xbf16> to vector<4x128xbf16>
    %cst_32 = arith.constant dense<0.000000e+00> : vector<256x128xf32>
    %67 = tpu.matmul %64, %66, %cst_32 {dimension_numbers = #tpu.dot_dimension_numbers<[1], [0], [0], [1], [0, 0, 1, 1], [], []>} : vector<256x4xbf16>, vector<4x128xbf16>, vector<256x128xf32> -> vector<256x128xf32>
    %68 = arith.addf %61, %67 : vector<256x128xf32>
    %69 = vector.extract_strided_slice %12 {offsets = [2, 2, 0], sizes = [16, 16, 4], strides = [1, 1, 1]} : vector<18x24x4xf32> to vector<16x16x4xf32>
    %70 = vector.shape_cast %69 : vector<16x16x4xf32> to vector<256x4xf32>
    %71 = arith.truncf %70 : vector<256x4xf32> to vector<256x4xbf16>
    %72 = vector.extract_strided_slice %13 {offsets = [8, 0, 0], sizes = [1, 4, 128], strides = [1, 1, 1]} : vector<9x4x128xbf16> to vector<1x4x128xbf16>
    %73 = vector.shape_cast %72 : vector<1x4x128xbf16> to vector<4x128xbf16>
    %cst_33 = arith.constant dense<0.000000e+00> : vector<256x128xf32>
    %74 = tpu.matmul %71, %73, %cst_33 {dimension_numbers = #tpu.dot_dimension_numbers<[1], [0], [0], [1], [0, 0, 1, 1], [], []>} : vector<256x4xbf16>, vector<4x128xbf16>, vector<256x128xf32> -> vector<256x128xf32>
    %75 = arith.addf %68, %74 : vector<256x128xf32>
    %c0_34 = arith.constant 0 : index
    %c0_35 = arith.constant 0 : index
    %76 = vector.load %arg3[%c0_34, %c0_35] : memref<1x128xf32, #tpu.memory_space<vmem>>, vector<1x128xf32>
    %77 = vector.broadcast %76 : vector<1x128xf32> to vector<256x128xf32>
    %78 = arith.addf %75, %77 : vector<256x128xf32>
    %cst_36 = arith.constant 0.000000e+00 : f32
    %79 = vector.broadcast %cst_36 : f32 to vector<256x128xf32>
    %80 = arith.maximumf %78, %79 : vector<256x128xf32>
    %cst_37 = arith.constant 0.000000e+00 : f32
    %81 = vector.broadcast %cst_37 : f32 to vector<1x24x128xf32>
    %c0_38 = arith.constant 0 : index
    %c0_39 = arith.constant 0 : index
    %c0_40 = arith.constant 0 : index
    %82 = vector.load %arg10[%c0_38, %c0_39, %c0_40] : memref<18x24x128xf32, #tpu.memory_space<vmem>>, vector<1x24x128xf32>
    tpu.vector_store %arg10[%c0_38, %c0_39, %c0_40], %81 {strides = array<i32>} : memref<18x24x128xf32, #tpu.memory_space<vmem>>, vector<1x24x128xf32>,
    %cst_41 = arith.constant 0.000000e+00 : f32
    %83 = vector.broadcast %cst_41 : f32 to vector<1x24x128xf32>
    %c17_42 = arith.constant 17 : index
    %c0_43 = arith.constant 0 : index
    %c0_44 = arith.constant 0 : index
    %84 = vector.load %arg10[%c17_42, %c0_43, %c0_44] : memref<18x24x128xf32, #tpu.memory_space<vmem>>, vector<1x24x128xf32>
    tpu.vector_store %arg10[%c17_42, %c0_43, %c0_44], %83 {strides = array<i32>} : memref<18x24x128xf32, #tpu.memory_space<vmem>>, vector<1x24x128xf32>,
    %cst_45 = arith.constant 0.000000e+00 : f32
    %85 = vector.broadcast %cst_45 : f32 to vector<16x1x128xf32>
    %c1_46 = arith.constant 1 : index
    %c0_47 = arith.constant 0 : index
    %c0_48 = arith.constant 0 : index
    %86 = vector.load %arg10[%c1_46, %c0_47, %c0_48] : memref<18x24x128xf32, #tpu.memory_space<vmem>>, vector<16x1x128xf32>
    tpu.vector_store %arg10[%c1_46, %c0_47, %c0_48], %85 {strides = array<i32>} : memref<18x24x128xf32, #tpu.memory_space<vmem>>, vector<16x1x128xf32>,
    %cst_49 = arith.constant 0.000000e+00 : f32
    %87 = vector.broadcast %cst_49 : f32 to vector<16x7x128xf32>
    %c1_50 = arith.constant 1 : index
    %c17_51 = arith.constant 17 : index
    %c0_52 = arith.constant 0 : index
    %88 = vector.load %arg10[%c1_50, %c17_51, %c0_52] : memref<18x24x128xf32, #tpu.memory_space<vmem>>, vector<16x7x128xf32>
    tpu.vector_store %arg10[%c1_50, %c17_51, %c0_52], %87 {strides = array<i32>} : memref<18x24x128xf32, #tpu.memory_space<vmem>>, vector<16x7x128xf32>,
    %89 = vector.shape_cast %80 : vector<256x128xf32> to vector<16x16x128xf32>
    %c1_53 = arith.constant 1 : index
    %c1_54 = arith.constant 1 : index
    %c0_55 = arith.constant 0 : index
    %90 = vector.load %arg10[%c1_53, %c1_54, %c0_55] : memref<18x24x128xf32, #tpu.memory_space<vmem>>, vector<16x16x128xf32>
    tpu.vector_store %arg10[%c1_53, %c1_54, %c0_55], %89 {strides = array<i32>} : memref<18x24x128xf32, #tpu.memory_space<vmem>>, vector<16x16x128xf32>,
    %c0_56 = arith.constant 0 : index
    %c0_57 = arith.constant 0 : index
    %c0_58 = arith.constant 0 : index
    %91 = vector.load %arg10[%c0_56, %c0_57, %c0_58] : memref<18x24x128xf32, #tpu.memory_space<vmem>>, vector<18x24x128xf32>
    %c0_59 = arith.constant 0 : index
    %c0_60 = arith.constant 0 : index
    %c0_61 = arith.constant 0 : index
    %92 = vector.load %arg4[%c0_59, %c0_60, %c0_61] : memref<9x128x128xbf16, #tpu.memory_space<vmem>>, vector<9x128x128xbf16>
    %93 = vector.extract_strided_slice %91 {offsets = [0, 0, 0], sizes = [16, 16, 128], strides = [1, 1, 1]} : vector<18x24x128xf32> to vector<16x16x128xf32>
    %94 = vector.shape_cast %93 : vector<16x16x128xf32> to vector<256x128xf32>
    %95 = arith.truncf %94 : vector<256x128xf32> to vector<256x128xbf16>
    %c0_62 = arith.constant 0 : index
    %c0_63 = arith.constant 0 : index
    %96 = vector.load %arg11[%c0_62, %c0_63] : memref<256x1152xbf16, #tpu.memory_space<vmem>>, vector<256x128xbf16>
    tpu.vector_store %arg11[%c0_62, %c0_63], %95 {strides = array<i32>} : memref<256x1152xbf16, #tpu.memory_space<vmem>>, vector<256x128xbf16>,
    %97 = vector.extract_strided_slice %91 {offsets = [0, 1, 0], sizes = [16, 16, 128], strides = [1, 1, 1]} : vector<18x24x128xf32> to vector<16x16x128xf32>
    %98 = vector.shape_cast %97 : vector<16x16x128xf32> to vector<256x128xf32>
    %99 = arith.truncf %98 : vector<256x128xf32> to vector<256x128xbf16>
    %c0_64 = arith.constant 0 : index
    %c128 = arith.constant 128 : index
    %100 = vector.load %arg11[%c0_64, %c128] : memref<256x1152xbf16, #tpu.memory_space<vmem>>, vector<256x128xbf16>
    tpu.vector_store %arg11[%c0_64, %c128], %99 {strides = array<i32>} : memref<256x1152xbf16, #tpu.memory_space<vmem>>, vector<256x128xbf16>,
    %101 = vector.extract_strided_slice %91 {offsets = [0, 2, 0], sizes = [16, 16, 128], strides = [1, 1, 1]} : vector<18x24x128xf32> to vector<16x16x128xf32>
    %102 = vector.shape_cast %101 : vector<16x16x128xf32> to vector<256x128xf32>
    %103 = arith.truncf %102 : vector<256x128xf32> to vector<256x128xbf16>
    %c0_65 = arith.constant 0 : index
    %c256 = arith.constant 256 : index
    %104 = vector.load %arg11[%c0_65, %c256] : memref<256x1152xbf16, #tpu.memory_space<vmem>>, vector<256x128xbf16>
    tpu.vector_store %arg11[%c0_65, %c256], %103 {strides = array<i32>} : memref<256x1152xbf16, #tpu.memory_space<vmem>>, vector<256x128xbf16>,
    %105 = vector.extract_strided_slice %91 {offsets = [1, 0, 0], sizes = [16, 16, 128], strides = [1, 1, 1]} : vector<18x24x128xf32> to vector<16x16x128xf32>
    %106 = vector.shape_cast %105 : vector<16x16x128xf32> to vector<256x128xf32>
    %107 = arith.truncf %106 : vector<256x128xf32> to vector<256x128xbf16>
    %c0_66 = arith.constant 0 : index
    %c384 = arith.constant 384 : index
    %108 = vector.load %arg11[%c0_66, %c384] : memref<256x1152xbf16, #tpu.memory_space<vmem>>, vector<256x128xbf16>
    tpu.vector_store %arg11[%c0_66, %c384], %107 {strides = array<i32>} : memref<256x1152xbf16, #tpu.memory_space<vmem>>, vector<256x128xbf16>,
    %109 = vector.extract_strided_slice %91 {offsets = [1, 1, 0], sizes = [16, 16, 128], strides = [1, 1, 1]} : vector<18x24x128xf32> to vector<16x16x128xf32>
    %110 = vector.shape_cast %109 : vector<16x16x128xf32> to vector<256x128xf32>
    %111 = arith.truncf %110 : vector<256x128xf32> to vector<256x128xbf16>
    %c0_67 = arith.constant 0 : index
    %c512 = arith.constant 512 : index
    %112 = vector.load %arg11[%c0_67, %c512] : memref<256x1152xbf16, #tpu.memory_space<vmem>>, vector<256x128xbf16>
    tpu.vector_store %arg11[%c0_67, %c512], %111 {strides = array<i32>} : memref<256x1152xbf16, #tpu.memory_space<vmem>>, vector<256x128xbf16>,
    %113 = vector.extract_strided_slice %91 {offsets = [1, 2, 0], sizes = [16, 16, 128], strides = [1, 1, 1]} : vector<18x24x128xf32> to vector<16x16x128xf32>
    %114 = vector.shape_cast %113 : vector<16x16x128xf32> to vector<256x128xf32>
    %115 = arith.truncf %114 : vector<256x128xf32> to vector<256x128xbf16>
    %c0_68 = arith.constant 0 : index
    %c640 = arith.constant 640 : index
    %116 = vector.load %arg11[%c0_68, %c640] : memref<256x1152xbf16, #tpu.memory_space<vmem>>, vector<256x128xbf16>
    tpu.vector_store %arg11[%c0_68, %c640], %115 {strides = array<i32>} : memref<256x1152xbf16, #tpu.memory_space<vmem>>, vector<256x128xbf16>,
    %117 = vector.extract_strided_slice %91 {offsets = [2, 0, 0], sizes = [16, 16, 128], strides = [1, 1, 1]} : vector<18x24x128xf32> to vector<16x16x128xf32>
    %118 = vector.shape_cast %117 : vector<16x16x128xf32> to vector<256x128xf32>
    %119 = arith.truncf %118 : vector<256x128xf32> to vector<256x128xbf16>
    %c0_69 = arith.constant 0 : index
    %c768 = arith.constant 768 : index
    %120 = vector.load %arg11[%c0_69, %c768] : memref<256x1152xbf16, #tpu.memory_space<vmem>>, vector<256x128xbf16>
    tpu.vector_store %arg11[%c0_69, %c768], %119 {strides = array<i32>} : memref<256x1152xbf16, #tpu.memory_space<vmem>>, vector<256x128xbf16>,
    %121 = vector.extract_strided_slice %91 {offsets = [2, 1, 0], sizes = [16, 16, 128], strides = [1, 1, 1]} : vector<18x24x128xf32> to vector<16x16x128xf32>
    %122 = vector.shape_cast %121 : vector<16x16x128xf32> to vector<256x128xf32>
    %123 = arith.truncf %122 : vector<256x128xf32> to vector<256x128xbf16>
    %c0_70 = arith.constant 0 : index
    %c896 = arith.constant 896 : index
    %124 = vector.load %arg11[%c0_70, %c896] : memref<256x1152xbf16, #tpu.memory_space<vmem>>, vector<256x128xbf16>
    tpu.vector_store %arg11[%c0_70, %c896], %123 {strides = array<i32>} : memref<256x1152xbf16, #tpu.memory_space<vmem>>, vector<256x128xbf16>,
    %125 = vector.extract_strided_slice %91 {offsets = [2, 2, 0], sizes = [16, 16, 128], strides = [1, 1, 1]} : vector<18x24x128xf32> to vector<16x16x128xf32>
    %126 = vector.shape_cast %125 : vector<16x16x128xf32> to vector<256x128xf32>
    %127 = arith.truncf %126 : vector<256x128xf32> to vector<256x128xbf16>
    %c0_71 = arith.constant 0 : index
    %c1024 = arith.constant 1024 : index
    %128 = vector.load %arg11[%c0_71, %c1024] : memref<256x1152xbf16, #tpu.memory_space<vmem>>, vector<256x128xbf16>
    tpu.vector_store %arg11[%c0_71, %c1024], %127 {strides = array<i32>} : memref<256x1152xbf16, #tpu.memory_space<vmem>>, vector<256x128xbf16>,
    %c0_72 = arith.constant 0 : index
    %c0_73 = arith.constant 0 : index
    %129 = vector.load %arg11[%c0_72, %c0_73] : memref<256x1152xbf16, #tpu.memory_space<vmem>>, vector<256x1152xbf16>
    %130 = vector.shape_cast %92 : vector<9x128x128xbf16> to vector<1152x128xbf16>
    %cst_74 = arith.constant dense<0.000000e+00> : vector<256x128xf32>
    %131 = tpu.matmul %129, %130, %cst_74 {dimension_numbers = #tpu.dot_dimension_numbers<[1], [0], [0], [1], [0, 0, 1, 1], [], []>} : vector<256x1152xbf16>, vector<1152x128xbf16>, vector<256x128xf32> -> vector<256x128xf32>
    %c0_75 = arith.constant 0 : index
    %c0_76 = arith.constant 0 : index
    %132 = vector.load %arg5[%c0_75, %c0_76] : memref<1x128xf32, #tpu.memory_space<vmem>>, vector<1x128xf32>
    %133 = vector.broadcast %132 : vector<1x128xf32> to vector<256x128xf32>
    %134 = arith.addf %131, %133 : vector<256x128xf32>
    %135 = vector.extract_strided_slice %12 {offsets = [1, 1, 0], sizes = [16, 16, 4], strides = [1, 1, 1]} : vector<18x24x4xf32> to vector<16x16x4xf32>
    %136 = vector.shape_cast %135 : vector<16x16x4xf32> to vector<256x4xf32>
    %137 = arith.truncf %136 : vector<256x4xf32> to vector<256x4xbf16>
    %c0_77 = arith.constant 0 : index
    %c0_78 = arith.constant 0 : index
    %138 = vector.load %arg6[%c0_77, %c0_78] : memref<4x128xbf16, #tpu.memory_space<vmem>>, vector<4x128xbf16>
    %cst_79 = arith.constant dense<0.000000e+00> : vector<256x128xf32>
    %139 = tpu.matmul %137, %138, %cst_79 {dimension_numbers = #tpu.dot_dimension_numbers<[1], [0], [0], [1], [0, 0, 1, 1], [], []>} : vector<256x4xbf16>, vector<4x128xbf16>, vector<256x128xf32> -> vector<256x128xf32>
    %c0_80 = arith.constant 0 : index
    %c0_81 = arith.constant 0 : index
    %140 = vector.load %arg7[%c0_80, %c0_81] : memref<1x128xf32, #tpu.memory_space<vmem>>, vector<1x128xf32>
    %141 = vector.broadcast %140 : vector<1x128xf32> to vector<256x128xf32>
    %142 = arith.addf %139, %141 : vector<256x128xf32>
    %143 = arith.addf %134, %142 : vector<256x128xf32>
    %cst_82 = arith.constant 0.000000e+00 : f32
    %144 = vector.broadcast %cst_82 : f32 to vector<256x128xf32>
    %145 = arith.maximumf %143, %144 : vector<256x128xf32>
    %146 = vector.shape_cast %145 : vector<256x128xf32> to vector<16x16x128xf32>
    %147 = arith.truncf %146 : vector<16x16x128xf32> to vector<16x16x128xbf16>
    %c0_83 = arith.constant 0 : index
    %c0_84 = arith.constant 0 : index
    %c0_85 = arith.constant 0 : index
    %c0_86 = arith.constant 0 : index
    %148 = vector.load %arg8[%c0_83, %c0_84, %c0_85, %c0_86] : memref<1x16x16x128xbf16, #tpu.memory_space<vmem>>, vector<1x16x16x128xbf16>
    %149 = vector.shape_cast %148 : vector<1x16x16x128xbf16> to vector<16x16x128xbf16>
    %150 = vector.shape_cast %147 : vector<16x16x128xbf16> to vector<1x16x16x128xbf16>
    tpu.vector_store %arg8[%c0_83, %c0_84, %c0_85, %c0_86], %150 {strides = array<i32>} : memref<1x16x16x128xbf16, #tpu.memory_space<vmem>>, vector<1x16x16x128xbf16>,
    return
  }
  func.func @transform_0(%arg0: i32) -> (i32, i32, i32, i32) {
    %c0_i32 = arith.constant 0 : i32
    %c0_i32_0 = arith.constant 0 : i32
    %c0_i32_1 = arith.constant 0 : i32
    %c0_i32_2 = arith.constant 0 : i32
    return %arg0, %c0_i32, %c0_i32_0, %c0_i32_1 : i32, i32, i32, i32
  }
  func.func @transform_1(%arg0: i32) -> (i32, i32, i32) {
    %c0_i32 = arith.constant 0 : i32
    %c0_i32_0 = arith.constant 0 : i32
    %c0_i32_1 = arith.constant 0 : i32
    %c0_i32_2 = arith.constant 0 : i32
    return %c0_i32, %c0_i32_0, %c0_i32_1 : i32, i32, i32
  }
  func.func @transform_2(%arg0: i32) -> (i32, i32) {
    %c0_i32 = arith.constant 0 : i32
    %c0_i32_0 = arith.constant 0 : i32
    %c0_i32_1 = arith.constant 0 : i32
    return %c0_i32, %c0_i32_0 : i32, i32
  }
  func.func @transform_3(%arg0: i32) -> (i32, i32, i32) {
    %c0_i32 = arith.constant 0 : i32
    %c0_i32_0 = arith.constant 0 : i32
    %c0_i32_1 = arith.constant 0 : i32
    %c0_i32_2 = arith.constant 0 : i32
    return %c0_i32, %c0_i32_0, %c0_i32_1 : i32, i32, i32
  }
  func.func @transform_4(%arg0: i32) -> (i32, i32) {
    %c0_i32 = arith.constant 0 : i32
    %c0_i32_0 = arith.constant 0 : i32
    %c0_i32_1 = arith.constant 0 : i32
    return %c0_i32, %c0_i32_0 : i32, i32
  }
  func.func @transform_5(%arg0: i32) -> (i32, i32) {
    %c0_i32 = arith.constant 0 : i32
    %c0_i32_0 = arith.constant 0 : i32
    %c0_i32_1 = arith.constant 0 : i32
    return %c0_i32, %c0_i32_0 : i32, i32
  }
  func.func @transform_6(%arg0: i32) -> (i32, i32) {
    %c0_i32 = arith.constant 0 : i32
    %c0_i32_0 = arith.constant 0 : i32
    %c0_i32_1 = arith.constant 0 : i32
    return %c0_i32, %c0_i32_0 : i32, i32
  }
  func.func @transform_7(%arg0: i32) -> (i32, i32, i32, i32) {
    %c0_i32 = arith.constant 0 : i32
    %c0_i32_0 = arith.constant 0 : i32
    %c0_i32_1 = arith.constant 0 : i32
    %c0_i32_2 = arith.constant 0 : i32
    return %arg0, %c0_i32, %c0_i32_0, %c0_i32_1 : i32, i32, i32, i32
  }
}

</mosaic_0001>

<bundles_post_ra>
// kernel: basic_block_forward.1
= control target key start
LH: loop header
LB: loop body
LE: loop exit
PB: predicated region body
PF: predicated region fallthrough
CT: control target
= control target key end

     0   :  { %12 = vsyncpa [#allocation6], 0  ;;  %s8972_s24 = smov 0   ;;  %s11499_s0 = inlined_call_operand.vmem [shape: bf16[2,16,16,4], index: 0, kind: input, shape index: {}]   ;;  %s11500_s1 = inlined_call_operand.vmem [shape: bf16[9,4,128], index: 1, kind: input, shape index: {}]   ;;  %s11501_s2 = inlined_call_operand.vmem [shape: f32[1,128], index: 2, kind: input, shape index: {}]   ;;  %s11502_s3 = inlined_call_operand.hbm [shape: bf16[9,128,128], index: 3, kind: input, shape index: {}]   ;;  %s11503_s4 = inlined_call_operand.vmem [shape: f32[1,128], index: 4, kind: input, shape index: {}]   ;;  %s11504_s5 = inlined_call_operand.vmem [shape: bf16[4,128], index: 5, kind: input, shape index: {}]   ;;  %s11505_s6 = inlined_call_operand.vmem [shape: f32[1,128], index: 6, kind: input, shape index: {}]   ;;  %s11506_s7 = inlined_call_operand.vmem [shape: bf16[2,16,16,128], index: 7, kind: output, shape index: {}]  }
   0x1 LB: > { %s8978_s25 = sadd.s32 4294967295, %s8926_s24   ;;  %p6694_p0 = scmp.ge.s32.totalorder %s8926_s24, 1  ;;  %s8926_s24 = sphi %s8972_s24, %s18_s24  }
   0x2   : > { %p201_p1 = scmp.lt.s32.totalorder %s8926_s24, 3  ;;  %s8928_s26 = smov [#allocation5]  }
   0x3   : > { %s219_s27 = sshll.u32 %s8928_s26, 4  ;;  %p8591_p3 = scmp.eq.s32.totalorder %s8978_s25, 0  ;;  %s220_s27 = int_to_ptr.vmem [resolvable:$true] %s219_s27 }
   0x4   : > { %p8982_p2 = pnand %p6694_p0, %p201_p1  ;;  %s8901_s29 = scalar_lea.vmem %s220_s27, 9216 }
   0x5   : > { %p8902_p7 = scmp.ne.s32.totalorder %s220_s27, %s8901_s29  ;;  %p8909_p10 = scmp.lt.s32.totalorder %s220_s27, %s220_s27 }
   0x6   : > { %p8587_p4 = pneg %p8982_p2  ;;  %p8910_p11 = scmp.lt.s32.totalorder %s8901_s29, %s8901_s29 }
   0x8   : > { %p8588_p5 = pnand %p8591_p3, %p8587_p4  ;;  %p8911_p12 = por %p8910_p11, %p8909_p10 }
   0xa   : > { %p8892_p6 = pneg %p8588_p5 }
   0xc   : > { %p8904_p8 = pnand %p8902_p7, %p8892_p6 }
   0xe   : > { %p8905_p9 = pneg %p8904_p8 }
  0x10   : > { %p8912_p13 = pnand %p8911_p12, %p8905_p9 }
  0x12   : > { %8915 = shalt.err (!%p8912_p13)
}
  0x13   : > { %s8929_s30 = smov 64   ;;  %s8930_s8 = smov 4  }
  0x14   : > { %8590 = dma.hbm_to_vmem [thread:$0]  (!%p8588_p5), %s11502_s3, 9216, %s220_s27, [#allocation6], %s8929_s30, %s8929_s30, %s8930_s8  }
  0x15   : > { %252 = sbr.rel (%p8982_p2) target bundleno = 1111 (0x457), region = 48 }
  0x1a   : > { %8921 = dma.done.wait (%p8591_p3), [#allocation6], 9216  }
  0x1b   : > { %8923 = vsyncadd (%p8591_p3), [#allocation6], 4294958080  ;;  %vm295_vm0 = vcmask 31744   ;;  %v8931_v0 = vmov 0.0   ;;  %p284_p0 = scmp.lt.s32.totalorder %s8978_s25, 1  ;;  %vm304_vm1 = vcmask 24576  }
  0x1c   : > { %296 = vst.msk [vmem:[#allocation2] sm:$0xff] %vm295_vm0, %v8931_v0  ;;  %297 = vst.msk [vmem:[#allocation2 + $0x8] sm:$0xff] %vm295_vm0, %v8931_v0  ;;  %vm321_vm2 = vcmask 30720   ;;  %vm738_vm3 = vcmask 1041408   ;;  %v489_v1 = vld [vmem:[%s11500_s1 + $0x2] sm:$0x3] }
  0x1d   : > { %298 = vst.msk [vmem:[#allocation2 + $0x10] sm:$0xff] %vm295_vm0, %v8931_v0  ;;  %300 = vst.msk [vmem:[#allocation2 + $0x198] sm:$0xff] %vm295_vm0, %v8931_v0  ;;  %s11794_s25 = smov (!%p284_p0, %s8978_s25), 1  ;;  %vm561_vm4 = vcmask 1046528   ;;  %8572 = vmatprep.subr.msk.bf16.mxu0 %vm738_vm3, %v489_v1  ;;  %8573 = vmatprep.subr.msk.bf16.mxu1 %vm738_vm3, %v489_v1  ;;  %v740_v4 = vsel %vm738_vm3, %v489_v1, 0  ;;  %vm1115_vm5 = vcmask 1045504  }
  0x1e   : > { %301 = vst.msk [vmem:[#allocation2 + $0x1a0] sm:$0xff] %vm295_vm0, %v8931_v0  ;;  %302 = vst.msk [vmem:[#allocation2 + $0x1a8] sm:$0xff] %vm295_vm0, %v8931_v0  ;;  %s7224_s11 = sshll.u32 %s11794_s25, 7  ;;  %8183 = vmatpush3.bf16.msra.mxu0 %v740_v4  ;;  %8571 = vmatpush3.bf16.msra.mxu1 %v740_v4  ;;  %v9143_v14 = vld [vmem:[%s11500_s1] sm:$0x3] }
  0x1f   : > { %2793 = vst [vmem:[#allocation3] sm:$0xff] %v8931_v0  ;;  %2801 = vst [vmem:[#allocation3 + $0x18] sm:$0x1] %v8931_v0  ;;  %s9121_s14 = scalar_lea.vmem %s11499_s0, %s7224_s11  ;;  %8574 = vmatprep.subr.msk.bf16.mxu1 %vm738_vm3, %v9143_v14  ;;  %v9154_v17 = vld [vmem:[%s11500_s1 + $0x4] sm:$0x3]  ;;  %s11420_s29 = scalar_lea.vmem %s11506_s7, %s7224_s11 }
  0x20   : > { %2802 = vst [vmem:[#allocation3 + $0x30] sm:$0x1] %v8931_v0  ;;  %2803 = vst [vmem:[#allocation3 + $0x48] sm:$0x1] %v8931_v0  ;;  %v7367_v2 = vld [vmem:[%s9121_s14] sm:$0xff]   ;;  %v7516_v3 = vld [vmem:[%s9121_s14 + $0x38] sm:$0xff]   ;;  %8575 = vmatprep.subr.msk.bf16.mxu0 %vm738_vm3, %v9154_v17 }
  0x21   : > { %2804 = vst [vmem:[#allocation3 + $0x60] sm:$0x1] %v8931_v0  ;;  %2805 = vst [vmem:[#allocation3 + $0x78] sm:$0x1] %v8931_v0  ;;  %v7368_v8 = vunpack.c.l.bf16 %v7367_v2  ;;  %v7369_v9 = vunpack.c.h.bf16 %v7367_v2  ;;  %v7396_v10 = vunpack.c.l.bf16 %v7516_v3  ;;  %v7397_v15 = vunpack.c.h.bf16 %v7516_v3  ;;  %v7517_v16 = vld [vmem:[%s9121_s14 + $0x40] sm:$0xff]   ;;  %v7510_v22 = vld [vmem:[%s9121_s14 + $0x8] sm:$0xff]  }
  0x22   : > { %2806 = vst [vmem:[#allocation3 + $0x90] sm:$0x1] %v8931_v0  ;;  %2807 = vst [vmem:[#allocation3 + $0xa8] sm:$0x1] %v8931_v0  ;;  %v7400_v20 = vunpack.c.l.bf16 %v7517_v16  ;;  %v7401_v21 = vunpack.c.h.bf16 %v7517_v16  ;;  %v7511_v23 = vld [vmem:[%s9121_s14 + $0x10] sm:$0xff]   ;;  %v7518_v24 = vld [vmem:[%s9121_s14 + $0x48] sm:$0xff]   ;;  %v7372_v27 = vunpack.c.l.bf16 %v7510_v22  ;;  %v7373_v28 = vunpack.c.h.bf16 %v7510_v22 }
  0x23   : > { %2808 = vst [vmem:[#allocation3 + $0xc0] sm:$0x1] %v8931_v0  ;;  %2809 = vst [vmem:[#allocation3 + $0xd8] sm:$0x1] %v8931_v0  ;;  %v9131_v5 = vld [vmem:[#allocation2] sm:$0xff]  ;;  %v9133_v6 = vld [vmem:[#allocation2 + $0x8] sm:$0xff]  ;;  %v7376_v32 = vunpack.c.l.bf16 %v7511_v23  ;;  %v7377_v33 = vunpack.c.h.bf16 %v7511_v23  ;;  %v7404_v34 = vunpack.c.l.bf16 %v7518_v24  ;;  %v7405_v35 = vunpack.c.h.bf16 %v7518_v24 }
  0x24   : > { %2810 = vst [vmem:[#allocation3 + $0xf0] sm:$0x1] %v8931_v0  ;;  %2811 = vst [vmem:[#allocation3 + $0x108] sm:$0x1] %v8931_v0  ;;  %v9135_v7 = vld [vmem:[#allocation2 + $0x10] sm:$0xff]  ;;  %v562_v11 = vrot.slane %v9131_v5, 1 }
  0x25   : > { %2812 = vst [vmem:[#allocation3 + $0x120] sm:$0x1] %v8931_v0  ;;  %2813 = vst [vmem:[#allocation3 + $0x138] sm:$0x1] %v8931_v0  ;;  %v563_v12 = vrot.slane %v9133_v6, 1  ;;  %v565_v13 = vrot.slane %v9135_v7, 1 }
  0x26   : > { %2814 = vst [vmem:[#allocation3 + $0x150] sm:$0x1] %v8931_v0  ;;  %2815 = vst [vmem:[#allocation3 + $0x168] sm:$0x1] %v8931_v0  ;;  %v7519_v29 = vld [vmem:[%s9121_s14 + $0x50] sm:$0xff]   ;;  %v7512_v30 = vld [vmem:[%s9121_s14 + $0x18] sm:$0xff]  }
  0x27   : > { %2816 = vst [vmem:[#allocation3 + $0x180] sm:$0x1] %v8931_v0  ;;  %2817 = vst [vmem:[#allocation3 + $0x29] sm:$0x7f] %v8931_v0  ;;  %v564_v18 = vsel %vm561_vm4, %v562_v11, %v563_v12  ;;  %v566_v19 = vsel %vm561_vm4, %v563_v12, %v565_v13  ;;  %v7513_v31 = vld [vmem:[%s9121_s14 + $0x20] sm:$0xff]   ;;  %v7520_v36 = vld [vmem:[%s9121_s14 + $0x58] sm:$0xff]   ;;  %v7408_v39 = vunpack.c.l.bf16 %v7519_v29  ;;  %v7409_v40 = vunpack.c.h.bf16 %v7519_v29 }
  0x28   : > { %2818 = vst [vmem:[#allocation3 + $0x41] sm:$0x7f] %v8931_v0  ;;  %2819 = vst [vmem:[#allocation3 + $0x59] sm:$0x7f] %v8931_v0  ;;  %v674_v25 = vpack.c.bf16 %v566_v19, %v564_v18  ;;  %v7521_v37 = vld [vmem:[%s9121_s14 + $0x60] sm:$0xff]   ;;  %v7514_v38 = vld [vmem:[%s9121_s14 + $0x28] sm:$0xff]   ;;  %v7380_v41 = vunpack.c.l.bf16 %v7512_v30  ;;  %v7381_v42 = vunpack.c.h.bf16 %v7512_v30  ;;  %v7384_v45 = vunpack.c.l.bf16 %v7513_v31 }
  0x29   : > { %2820 = vst [vmem:[#allocation3 + $0x71] sm:$0x7f] %v8931_v0  ;;  %2821 = vst [vmem:[#allocation3 + $0x89] sm:$0x7f] %v8931_v0  ;;  %v7515_v43 = vld [vmem:[%s9121_s14 + $0x30] sm:$0xff]   ;;  %v7522_v44 = vld [vmem:[%s9121_s14 + $0x68] sm:$0xff]   ;;  %v7385_v46 = vunpack.c.h.bf16 %v7513_v31  ;;  %v7412_v47 = vunpack.c.l.bf16 %v7520_v36  ;;  %v7413_v48 = vunpack.c.h.bf16 %v7520_v36  ;;  %v7416_v49 = vunpack.c.l.bf16 %v7521_v37 }
  0x2a   : > { %2822 = vst [vmem:[#allocation3 + $0xa1] sm:$0x7f] %v8931_v0  ;;  %2823 = vst [vmem:[#allocation3 + $0xb9] sm:$0x7f] %v8931_v0  ;;  %8184 = vmatprep.mubr.msk.bf16.mxu0 %vm295_vm0, %v674_v25  ;;  %v7417_v50 = vunpack.c.h.bf16 %v7521_v37  ;;  %v7388_v51 = vunpack.c.l.bf16 %v7514_v38  ;;  %v7389_v52 = vunpack.c.h.bf16 %v7514_v38  ;;  %v9187_v53 = vld [vmem:[%s9121_s14 + $0x70] sm:$0xff]   ;;  %v7392_v57 = vunpack.c.l.bf16 %v7515_v43 }
  0x2b   : > { %2824 = vst [vmem:[#allocation3 + $0xd1] sm:$0x7f] %v8931_v0  ;;  %2825 = vst [vmem:[#allocation3 + $0xe9] sm:$0x7f] %v8931_v0  ;;  %v7393_v58 = vunpack.c.h.bf16 %v7515_v43  ;;  %v7420_v59 = vunpack.c.l.bf16 %v7522_v44  ;;  %v7421_v60 = vunpack.c.h.bf16 %v7522_v44  ;;  %v9236_v18 = vld [vmem:[%s11500_s1 + $0x8] sm:$0x3] }
  0x2c   : > { %2826 = vst [vmem:[#allocation3 + $0x101] sm:$0x7f] %v8931_v0  ;;  %2827 = vst [vmem:[#allocation3 + $0x119] sm:$0x7f] %v8931_v0 }
  0x2d   : > { %2828 = vst [vmem:[#allocation3 + $0x131] sm:$0x7f] %v8931_v0  ;;  %2829 = vst [vmem:[#allocation3 + $0x149] sm:$0x7f] %v8931_v0 }
  0x2e   : > { %2830 = vst [vmem:[#allocation3 + $0x161] sm:$0x7f] %v8931_v0  ;;  %2831 = vst [vmem:[#allocation3 + $0x179] sm:$0x7f] %v8931_v0 }
  0x2f   : > { %2832 = vst [vmem:[#allocation3 + $0x191] sm:$0x7f] %v8931_v0  ;;  %305 = vst.msk [vmem:[#allocation2 + $0x18] sm:$0x1] %vm304_vm1, %v8931_v0 }
  0x30   : > { %322 = vst.msk [vmem:[#allocation2 + $0x29] sm:$0x7f] %vm321_vm2, %v8931_v0  ;;  %323 = vst.msk [vmem:[#allocation2 + $0x41] sm:$0x7f] %vm321_vm2, %v8931_v0 }
  0x31   : > { %306 = vst.msk [vmem:[#allocation2 + $0x30] sm:$0x1] %vm304_vm1, %v8931_v0  ;;  %307 = vst.msk [vmem:[#allocation2 + $0x48] sm:$0x1] %vm304_vm1, %v8931_v0 }
  0x32   : > { %308 = vst.msk [vmem:[#allocation2 + $0x60] sm:$0x1] %vm304_vm1, %v8931_v0  ;;  %309 = vst.msk [vmem:[#allocation2 + $0x78] sm:$0x1] %vm304_vm1, %v8931_v0 }
  0x33   : > { %310 = vst.msk [vmem:[#allocation2 + $0x90] sm:$0x1] %vm304_vm1, %v8931_v0  ;;  %311 = vst.msk [vmem:[#allocation2 + $0xa8] sm:$0x1] %vm304_vm1, %v8931_v0 }
  0x34   : > { %312 = vst.msk [vmem:[#allocation2 + $0xc0] sm:$0x1] %vm304_vm1, %v8931_v0  ;;  %313 = vst.msk [vmem:[#allocation2 + $0xd8] sm:$0x1] %vm304_vm1, %v8931_v0 }
  0x35   : > { %314 = vst.msk [vmem:[#allocation2 + $0xf0] sm:$0x1] %vm304_vm1, %v8931_v0  ;;  %315 = vst.msk [vmem:[#allocation2 + $0x108] sm:$0x1] %vm304_vm1, %v8931_v0 }
  0x36   : > { %316 = vst.msk [vmem:[#allocation2 + $0x120] sm:$0x1] %vm304_vm1, %v8931_v0  ;;  %317 = vst.msk [vmem:[#allocation2 + $0x138] sm:$0x1] %vm304_vm1, %v8931_v0 }
  0x37   : > { %318 = vst.msk [vmem:[#allocation2 + $0x150] sm:$0x1] %vm304_vm1, %v8931_v0  ;;  %319 = vst.msk [vmem:[#allocation2 + $0x168] sm:$0x1] %vm304_vm1, %v8931_v0 }
  0x38   : > { %320 = vst.msk [vmem:[#allocation2 + $0x180] sm:$0x1] %vm304_vm1, %v8931_v0 }
  0x39   : > { %324 = vst.msk [vmem:[#allocation2 + $0x59] sm:$0x7f] %vm321_vm2, %v8931_v0  ;;  %325 = vst.msk [vmem:[#allocation2 + $0x71] sm:$0x7f] %vm321_vm2, %v8931_v0 }
  0x3a   : > { %326 = vst.msk [vmem:[#allocation2 + $0x89] sm:$0x7f] %vm321_vm2, %v8931_v0  ;;  %327 = vst.msk [vmem:[#allocation2 + $0xa1] sm:$0x7f] %vm321_vm2, %v8931_v0 }
  0x3b   : > { %328 = vst.msk [vmem:[#allocation2 + $0xb9] sm:$0x7f] %vm321_vm2, %v8931_v0  ;;  %329 = vst.msk [vmem:[#allocation2 + $0xd1] sm:$0x7f] %vm321_vm2, %v8931_v0 }
  0x3c   : > { %330 = vst.msk [vmem:[#allocation2 + $0xe9] sm:$0x7f] %vm321_vm2, %v8931_v0  ;;  %331 = vst.msk [vmem:[#allocation2 + $0x101] sm:$0x7f] %vm321_vm2, %v8931_v0 }
  0x3d   : > { %332 = vst.msk [vmem:[#allocation2 + $0x119] sm:$0x7f] %vm321_vm2, %v8931_v0  ;;  %333 = vst.msk [vmem:[#allocation2 + $0x131] sm:$0x7f] %vm321_vm2, %v8931_v0 }
  0x3e   : > { %334 = vst.msk [vmem:[#allocation2 + $0x149] sm:$0x7f] %vm321_vm2, %v8931_v0  ;;  %335 = vst.msk [vmem:[#allocation2 + $0x161] sm:$0x7f] %vm321_vm2, %v8931_v0 }
  0x3f   : > { %336 = vst.msk [vmem:[#allocation2 + $0x179] sm:$0x7f] %vm321_vm2, %v8931_v0  ;;  %337 = vst.msk [vmem:[#allocation2 + $0x191] sm:$0x7f] %vm321_vm2, %v8931_v0 }
  0x40   : > { %402 = vst.msk [vmem:[#allocation2 + $0x19] sm:$0xff] %vm295_vm0, %v7368_v8  ;;  %403 = vst.msk [vmem:[#allocation2 + $0x21] sm:$0xff] %vm295_vm0, %v7369_v9  ;;  %v952_v8 = vsel %vm738_vm3, %v9143_v14, 0  ;;  %v1293_v9 = vsel %vm738_vm3, %v9154_v17, 0 }
  0x41   : > { %416 = vst.msk [vmem:[#allocation2 + $0xc1] sm:$0xff] %vm295_vm0, %v7396_v10  ;;  %417 = vst.msk [vmem:[#allocation2 + $0xc9] sm:$0xff] %vm295_vm0, %v7397_v15  ;;  %v7424_v10 = vunpack.c.l.bf16 %v9187_v53 }
  0x42   : > { %418 = vst.msk [vmem:[#allocation2 + $0xd9] sm:$0xff] %vm295_vm0, %v7400_v20  ;;  %419 = vst.msk [vmem:[#allocation2 + $0xe1] sm:$0xff] %vm295_vm0, %v7401_v21 }
  0x43   : > { %404 = vst.msk [vmem:[#allocation2 + $0x31] sm:$0xff] %vm295_vm0, %v7372_v27  ;;  %405 = vst.msk [vmem:[#allocation2 + $0x39] sm:$0xff] %vm295_vm0, %v7373_v28 }
  0x44   : > { %406 = vst.msk [vmem:[#allocation2 + $0x49] sm:$0xff] %vm295_vm0, %v7376_v32  ;;  %407 = vst.msk [vmem:[#allocation2 + $0x51] sm:$0xff] %vm295_vm0, %v7377_v33 }
  0x45   : > { %420 = vst.msk [vmem:[#allocation2 + $0xf1] sm:$0xff] %vm295_vm0, %v7404_v34  ;;  %421 = vst.msk [vmem:[#allocation2 + $0xf9] sm:$0xff] %vm295_vm0, %v7405_v35 }
  0x46   : > { %422 = vst.msk [vmem:[#allocation2 + $0x109] sm:$0xff] %vm295_vm0, %v7408_v39  ;;  %423 = vst.msk [vmem:[#allocation2 + $0x111] sm:$0xff] %vm295_vm0, %v7409_v40 }
  0x47   : > { %408 = vst.msk [vmem:[#allocation2 + $0x61] sm:$0xff] %vm295_vm0, %v7380_v41  ;;  %409 = vst.msk [vmem:[#allocation2 + $0x69] sm:$0xff] %vm295_vm0, %v7381_v42  ;;  %v9189_v54 = vld [vmem:[#allocation2 + $0x18] sm:$0xff]  ;;  %v9191_v55 = vld [vmem:[#allocation2 + $0x20] sm:$0xff] }
  0x48   : > { %v9193_v56 = vld [vmem:[#allocation2 + $0x28] sm:$0xff]  ;;  %410 = vst.msk [vmem:[#allocation2 + $0x79] sm:$0xff] %vm295_vm0, %v7384_v45  ;;  %411 = vst.msk [vmem:[#allocation2 + $0x81] sm:$0xff] %vm295_vm0, %v7385_v46  ;;  %v567_v62 = vrot.slane %v9189_v54, 1  ;;  %v568_v63 = vrot.slane %v9191_v55, 1  ;;  %v9203_v1 = vld [vmem:[#allocation2 + $0xc0] sm:$0xff] }
  0x49   : > { %424 = vst.msk [vmem:[#allocation2 + $0x121] sm:$0xff] %vm295_vm0, %v7412_v47  ;;  %425 = vst.msk [vmem:[#allocation2 + $0x129] sm:$0xff] %vm295_vm0, %v7413_v48  ;;  %v570_v0 = vrot.slane %v9193_v56, 1  ;;  %v9209_v2 = vld [vmem:[#allocation2 + $0xc8] sm:$0xff]  ;;  %v9211_v3 = vld [vmem:[#allocation2 + $0xd0] sm:$0xff]  ;;  %v602_v4 = vrot.slane %v9203_v1, 1 }
  0x4a   : > { %426 = vst.msk [vmem:[#allocation2 + $0x139] sm:$0xff] %vm295_vm0, %v7416_v49  ;;  %427 = vst.msk [vmem:[#allocation2 + $0x141] sm:$0xff] %vm295_vm0, %v7417_v50  ;;  %v569_v11 = vsel %vm561_vm4, %v567_v62, %v568_v63  ;;  %v603_v13 = vrot.slane %v9209_v2, 1  ;;  %v605_v14 = vrot.slane %v9211_v3, 1  ;;  %v9227_v15 = vld [vmem:[#allocation2 + $0xd8] sm:$0xff]  ;;  %v9229_v16 = vld [vmem:[#allocation2 + $0xe0] sm:$0xff] }
  0x4b   : > { %412 = vst.msk [vmem:[#allocation2 + $0x91] sm:$0xff] %vm295_vm0, %v7388_v51  ;;  %413 = vst.msk [vmem:[#allocation2 + $0x99] sm:$0xff] %vm295_vm0, %v7389_v52  ;;  %v571_v12 = vsel %vm561_vm4, %v568_v63, %v570_v0  ;;  %v9231_v17 = vld [vmem:[#allocation2 + $0xe8] sm:$0xff]  ;;  %v607_v20 = vrot.slane %v9227_v15, 1  ;;  %v608_v21 = vrot.slane %v9229_v16, 1  ;;  %v9243_v23 = vld [vmem:[#allocation2 + $0x30] sm:$0xff] }
  0x4c   : > { %414 = vst.msk [vmem:[#allocation2 + $0xa9] sm:$0xff] %vm295_vm0, %v7392_v57  ;;  %415 = vst.msk [vmem:[#allocation2 + $0xb1] sm:$0xff] %vm295_vm0, %v7393_v58  ;;  %v9238_v19 = vpack.c.bf16 %v571_v12, %v569_v11  ;;  %v610_v22 = vrot.slane %v9231_v17, 1  ;;  %v9245_v24 = vld [vmem:[#allocation2 + $0x38] sm:$0xff]  ;;  %v9247_v25 = vld [vmem:[#allocation2 + $0x40] sm:$0xff]  ;;  %v604_v27 = vsel %vm561_vm4, %v602_v4, %v603_v13  ;;  %v606_v28 = vsel %vm561_vm4, %v603_v13, %v605_v14 }
  0x4d   : > { %428 = vst.msk [vmem:[#allocation2 + $0x151] sm:$0xff] %vm295_vm0, %v7420_v59  ;;  %429 = vst.msk [vmem:[#allocation2 + $0x159] sm:$0xff] %vm295_vm0, %v7421_v60  ;;  %v572_v29 = vrot.slane %v9243_v23, 1  ;;  %v573_v30 = vrot.slane %v9245_v24, 1  ;;  %v9254_v31 = vld [vmem:[#allocation2 + $0x48] sm:$0xff]  ;;  %v9256_v32 = vld [vmem:[#allocation2 + $0x50] sm:$0xff]  ;;  %v9262_v34 = vpack.c.bf16 %v606_v28, %v604_v27  ;;  %v609_v35 = vsel %vm561_vm4, %v607_v20, %v608_v21 }
  0x4e   : > { %11557 = vst [vmem:[#allocation8_spill] sm:$0xff] %v9238_v19  ;;  %430 = vst.msk [vmem:[#allocation2 + $0x169] sm:$0xff] %vm295_vm0, %v7424_v10  ;;  %v9258_v33 = vld [vmem:[#allocation2 + $0x58] sm:$0xff]  ;;  %8185 = vmatmul.mubr.msk.bf16.vlgmr.msra.gmra.mxu0 %vm295_vm0, %v9238_v19  ;;  %v611_v36 = vsel %vm561_vm4, %v608_v21, %v610_v22  ;;  %v575_v37 = vrot.slane %v9247_v25, 1  ;;  %v9267_v38 = vld [vmem:[#allocation2 + $0xf0] sm:$0xff]  ;;  %v577_v44 = vrot.slane %v9254_v31, 1 }
  0x4f   : > { %11558 = vst [vmem:[#allocation9_spill] sm:$0xff] %v9262_v34  ;;  %v9269_v39 = vld [vmem:[#allocation2 + $0xf8] sm:$0xff]  ;;  %v9271_v40 = vld [vmem:[#allocation2 + $0x100] sm:$0xff]  ;;  %v9278_v42 = vpack.c.bf16 %v611_v36, %v609_v35  ;;  %8251 = vmatpush3.bf16.msra.mxu0 %v1293_v9  ;;  %v574_v43 = vsel %vm561_vm4, %v572_v29, %v573_v30  ;;  %v578_v45 = vrot.slane %v9256_v32, 1  ;;  %v9283_v46 = vld [vmem:[#allocation2 + $0x108] sm:$0xff]  ;;  %8200 = vmatprep.mubr.msk.bf16.mxu1 %vm295_vm0, %v9262_v34  ;;  %v580_v50 = vrot.slane %v9258_v33, 1 }
  0x50   : > { %v9276_v41 = vld [vmem:[%s11500_s1 + $0x6] sm:$0x3]  ;;  %v9285_v47 = vld [vmem:[#allocation2 + $0x110] sm:$0xff]  ;;  %v9287_v48 = vld [vmem:[#allocation2 + $0x118] sm:$0xff]  ;;  %v576_v49 = vsel %vm561_vm4, %v573_v30, %v575_v37  ;;  %v612_v51 = vrot.slane %v9267_v38, 1  ;;  %v613_v52 = vrot.slane %v9269_v39, 1  ;;  %8577 = vmatprep.subr.msk.bf16.mxu0 %vm738_vm3, %v9236_v18 }
  0x51   : > { %11559 = vst [vmem:[#allocation10_spill] sm:$0xff] %v9278_v42  ;;  %v9295_v57 = vld [vmem:[#allocation2 + $0x60] sm:$0xff]  ;;  %v9297_v58 = vld [vmem:[#allocation2 + $0x68] sm:$0xff]  ;;  %8201 = vmatmul.mubr.msk.bf16.vlgmr.msra.gmra.mxu1 %vm295_vm0, %v9278_v42  ;;  %v9303_v59 = vpack.c.bf16 %v576_v49, %v574_v43  ;;  %v579_v60 = vsel %vm561_vm4, %v577_v44, %v578_v45  ;;  %v615_v62 = vrot.slane %v9271_v40, 1  ;;  %v617_v63 = vrot.slane %v9283_v46, 1  ;;  %v9308_v0 = vld [vmem:[#allocation2 + $0x70] sm:$0xff] }
  0x52   : > { %8217 = vmatpush3.bf16.msra.mxu1 %v952_v8  ;;  %v581_v4 = vsel %vm561_vm4, %v578_v45, %v580_v50  ;;  %v614_v9 = vsel %vm561_vm4, %v612_v51, %v613_v52  ;;  %v618_v10 = vrot.slane %v9285_v47, 1  ;;  %v620_v11 = vrot.slane %v9287_v48, 1  ;;  %v9314_v12 = vld [vmem:[#allocation2 + $0x78] sm:$0xff]  ;;  %v9316_v13 = vld [vmem:[#allocation2 + $0x80] sm:$0xff]  ;;  %v9325_v22 = vld [vmem:[#allocation2 + $0x88] sm:$0xff] }
  0x53   : > { %11560 = vst [vmem:[#allocation11_spill] sm:$0xff] %v9303_v59  ;;  %8188 = vmatprep.mubr.msk.bf16.mxu0 %vm295_vm0, %v9303_v59  ;;  %v9320_v14 = vpack.c.bf16 %v581_v4, %v579_v60  ;;  %v616_v20 = vsel %vm561_vm4, %v613_v52, %v615_v62  ;;  %v582_v8 = vrot.slane %v9295_v57, 1  ;;  %v583_v21 = vrot.slane %v9297_v58, 1  ;;  %v9327_v27 = vld [vmem:[#allocation2 + $0x120] sm:$0xff]  ;;  %v9329_v28 = vld [vmem:[#allocation2 + $0x128] sm:$0xff]  ;;  %8576 = vmatprep.subr.msk.bf16.mxu1 %vm738_vm3, %v9276_v41  ;;  %v9338_v37 = vld [vmem:[#allocation2 + $0x130] sm:$0xff] }
  0x54   : > { %v9333_v29 = vpack.c.bf16 %v616_v20, %v614_v9  ;;  %v619_v30 = vsel %vm561_vm4, %v617_v63, %v618_v10  ;;  %v621_v35 = vsel %vm561_vm4, %v618_v10, %v620_v11  ;;  %v585_v36 = vrot.slane %v9308_v0, 1  ;;  %v9340_v43 = vld [vmem:[#allocation2 + $0x138] sm:$0xff]  ;;  %v9342_v44 = vld [vmem:[#allocation2 + $0x140] sm:$0xff]  ;;  %v9349_v52 = vld [vmem:[#allocation2 + $0x148] sm:$0xff] }
  0x55   : > { %11561 = vst [vmem:[#allocation12_spill] sm:$0xff] %v9320_v14  ;;  %v9344_v45 = vpack.c.bf16 %v621_v35, %v619_v30  ;;  %v584_v49 = vsel %vm561_vm4, %v582_v8, %v583_v21  ;;  %v587_v50 = vrot.slane %v9314_v12, 1  ;;  %v588_v51 = vrot.slane %v9316_v13, 1  ;;  %11564 = vst [vmem:[#allocation15_spill] sm:$0xff] %v9349_v52  ;;  %v9351_v60 = vld [vmem:[#allocation2 + $0x90] sm:$0xff]  ;;  %v9353_v62 = vld [vmem:[#allocation2 + $0x98] sm:$0xff] }
  0x56   : > { %11562 = vst [vmem:[#allocation13_spill] sm:$0xff] %v9333_v29  ;;  %8189 = vmatmul.mubr.msk.bf16.gmra.mxu0 %vm295_vm0, %v9320_v14  ;;  %8204 = vmatprep.mubr.msk.bf16.mxu1 %vm295_vm0, %v9333_v29  ;;  %v586_v63 = vsel %vm561_vm4, %v583_v21, %v585_v36  ;;  %v590_v4 = vrot.slane %v9325_v22, 1  ;;  %v622_v9 = vrot.slane %v9327_v27, 1  ;;  %v623_v10 = vrot.slane %v9329_v28, 1  ;;  %v9363_v11 = vld [vmem:[#allocation2 + $0xa0] sm:$0xff]  ;;  %v9365_v20 = vld [vmem:[#allocation2 + $0xa8] sm:$0xff] }
  0x57   : > { %11563 = vst [vmem:[#allocation14_spill] sm:$0xff] %v9344_v45  ;;  %v9367_v8 = vld [vmem:[#allocation2 + $0xb0] sm:$0xff]  ;;  %v9369_v30 = vpack.c.bf16 %v586_v63, %v584_v49  ;;  %v589_v35 = vsel %vm561_vm4, %v587_v50, %v588_v51  ;;  %v625_v26 = vrot.slane %v9338_v37, 1  ;;  %v627_v21 = vrot.slane %v9340_v43, 1  ;;  %v9374_v36 = vld [vmem:[#allocation2 + $0xb8] sm:$0xff] }
  0x58   : > { %v9376_v61 = vld [vmem:[#allocation2 + $0x150] sm:$0xff]  ;;  %v9378_v29 = vld [vmem:[#allocation2 + $0x158] sm:$0xff]  ;;  %v591_v42 = vsel %vm561_vm4, %v588_v51, %v590_v4  ;;  %v624_v34 = vsel %vm561_vm4, %v622_v9, %v623_v10  ;;  %v628_v14 = vrot.slane %v9342_v44, 1  ;;  %v630_v49 = vrot.slane %v9349_v52, 1 }
  0x59   : > { %11565 = vst [vmem:[#allocation16_spill] sm:$0xff] %v9369_v30  ;;  %8205 = vmatmul.mubr.msk.bf16.gmra.mxu1 %vm295_vm0, %v9344_v45  ;;  %8192 = vmatprep.mubr.msk.bf16.mxu0 %vm295_vm0, %v9369_v30  ;;  %v9388_v50 = vpack.c.bf16 %v591_v42, %v589_v35  ;;  %v626_v63 = vsel %vm561_vm4, %v623_v10, %v625_v26  ;;  %v592_v59 = vrot.slane %v9351_v60, 1  ;;  %v593_v51 = vrot.slane %v9353_v62, 1  ;;  %v9398_v45 = vld [vmem:[#allocation2 + $0x160] sm:$0xff] }
  0x5a   : > { %v9393_v4 = vpack.c.bf16 %v626_v63, %v624_v34  ;;  %v629_v9 = vsel %vm561_vm4, %v627_v21, %v628_v14  ;;  %v631_v19 = vsel %vm561_vm4, %v628_v14, %v630_v49  ;;  %v595_v52 = vrot.slane %v9363_v11, 1 }
  0x5b   : > { %11566 = vst [vmem:[#allocation17_spill] sm:$0xff] %v9388_v50  ;;  %v1119_v30 = vrot.slane %v9135_v7, 2  ;;  %v594_v42 = vsel %vm561_vm4, %v592_v59, %v593_v51  ;;  %v597_v26 = vrot.slane %v9365_v20, 1  ;;  %v598_v10 = vrot.slane %v9367_v8, 1 }
  0x5c   : > { %11567 = vst [vmem:[#allocation18_spill] sm:$0xff] %v9393_v4  ;;  %8208 = vmatprep.mubr.msk.bf16.mxu1 %vm295_vm0, %v9393_v4  ;;  %v596_v34 = vsel %vm561_vm4, %v593_v51, %v595_v52  ;;  %v600_v35 = vrot.slane %v9374_v36, 1  ;;  %v632_v14 = vrot.slane %v9376_v61, 1  ;;  %v633_v21 = vrot.slane %v9378_v29, 1 }
  0x5d   : > { %v9410_v49 = vpack.c.bf16 %v631_v19, %v629_v9  ;;  %v9412_v7 = vpack.c.bf16 %v596_v34, %v594_v42  ;;  %v635_v59 = vrot.slane %v9398_v45, 1  ;;  %v7425_v63 = vunpack.c.h.bf16 %v9187_v53 }
  0x5e   : > { %8193 = vmatmul.mubr.msk.bf16.gmra.mxu0 %vm295_vm0, %v9388_v50  ;;  %v634_v4 = vsel %vm561_vm4, %v632_v14, %v633_v21  ;;  %v599_v52 = vsel %vm561_vm4, %v597_v26, %v598_v10  ;;  %v601_v51 = vsel %vm561_vm4, %v598_v10, %v600_v35  ;;  %v11571_v53 = vrot.slane %v9133_v6, 2 }
  0x5f   : > { %11568 = vst [vmem:[#allocation19_spill] sm:$0xff] %v9410_v49  ;;  %11569 = vst [vmem:[#allocation20_spill] sm:$0xff] %v9412_v7  ;;  %8196 = vmatprep.mubr.msk.bf16.mxu0 %vm295_vm0, %v9412_v7  ;;  %v636_v19 = vsel %vm561_vm4, %v633_v21, %v635_v59  ;;  %v11572_v42 = vrot.slane %v9131_v5, 2  ;;  %v1121_v26 = vrot.slane %v9189_v54, 2  ;;  %v9438_v10 = vpack.c.bf16 %v601_v51, %v599_v52 }
  0x60   : > { %431 = vst.msk [vmem:[#allocation2 + $0x171] sm:$0xff] %vm295_vm0, %v7425_v63  ;;  %v9425_v9 = vpack.c.bf16 %v636_v19, %v634_v4  ;;  %v11573_v14 = vmov %v11571_v53  ;;  %v9442_v4 = vld [vmem:[#allocation2 + $0x168] sm:$0xff]  ;;  %v1122_v35 = vrot.slane %v9191_v55, 2  ;;  %v1124_v21 = vrot.slane %v9193_v56, 2 }
  0x61   : > { %v1118_v34 = vsel %vm1115_vm5, %v11572_v42, %v11571_v53  ;;  %v1120_v7 = vsel %vm1115_vm5, %v11573_v14, %v1119_v30  ;;  %8209 = vmatmul.mubr.msk.bf16.gmra.mxu1 %vm295_vm0, %v9410_v49  ;;  %11574 = vst [vmem:[#allocation22_spill] sm:$0xff] %v9438_v10  ;;  %v1126_v63 = vrot.slane %v9243_v23, 2  ;;  %v1127_v30 = vrot.slane %v9245_v24, 2 }
  0x62   : > { %11570 = vst [vmem:[#allocation21_spill] sm:$0xff] %v9425_v9  ;;  %8212 = vmatprep.mubr.msk.bf16.mxu1 %vm295_vm0, %v9425_v9  ;;  %v1228_v59 = vpack.c.bf16 %v1120_v7, %v1118_v34  ;;  %v1129_v19 = vrot.slane %v9247_v25, 2  ;;  %v637_v53 = vrot.slane %v9442_v4, 1  ;;  %v1123_v7 = vsel %vm1115_vm5, %v1121_v26, %v1122_v35 }
  0x63   : > { %v1125_v34 = vsel %vm1115_vm5, %v1122_v35, %v1124_v21  ;;  %v1128_v25 = vsel %vm1115_vm5, %v1126_v63, %v1127_v30  ;;  %v1131_v50 = vrot.slane %v9254_v31, 2  ;;  %v1132_v26 = vrot.slane %v9256_v32, 2 }
  0x64   : > { %v1130_v14 = vsel %vm1115_vm5, %v1127_v30, %v1129_v19  ;;  %v1134_v35 = vrot.slane %v9258_v33, 2  ;;  %v1136_v63 = vrot.slane %v9295_v57, 2  ;;  %v1137_v30 = vrot.slane %v9297_v58, 2  ;;  %v9487_v33 = vld [vmem:[%s11500_s1 + $0xc] sm:$0x3] }
  0x65   : > { %v9474_v21 = vpack.c.bf16 %v1130_v14, %v1128_v25  ;;  %v1141_v19 = vrot.slane %v9314_v12, 2  ;;  %v1149_v14 = vrot.slane %v9363_v11, 2 }
  0x66   : > { %8197 = vmatmul.mubr.msk.bf16.gmra.mxu0 %vm295_vm0, %v9438_v10  ;;  %v497_v10 = vpack.c.bf16 %v9133_v6, %v9131_v5  ;;  %v1703_v5 = vsel %vm738_vm3, %v9236_v18, 0  ;;  %v1139_v6 = vrot.slane %v9308_v0, 2  ;;  %v1133_v18 = vsel %vm1115_vm5, %v1131_v50, %v1132_v26 }
  0x67   : > { %v9452_v52 = vld [vmem:[#allocation2 + $0x170] sm:$0xff]  ;;  %v9454_v51 = vld [vmem:[#allocation2 + $0x178] sm:$0xff]  ;;  %8252 = vmatprep.mubr.msk.bf16.mxu0 %vm295_vm0, %v1228_v59  ;;  %v9470_v59 = vpack.c.bf16 %v1125_v34, %v1123_v7  ;;  %v1135_v0 = vsel %vm1115_vm5, %v1132_v26, %v1134_v35  ;;  %v9516_v50 = vpack.c.bf16 %v9245_v24, %v9243_v23  ;;  %v1147_v7 = vrot.slane %v9353_v62, 2  ;;  %v9538_v24 = vld [vmem:[%s11500_s1 + $0xa] sm:$0x3] }
  0x68   : > { %11575 = vst [vmem:[#allocation23_spill] sm:$0xff] %v9454_v51  ;;  %v638_v42 = vrot.slane %v9452_v52, 1  ;;  %v640_v56 = vrot.slane %v9454_v51, 1  ;;  %v9522_v34 = vpack.c.bf16 %v9269_v39, %v9267_v38  ;;  %v9526_v25 = vpack.c.bf16 %v1135_v0, %v1133_v18 }
  0x69   : > { %v9533_v23 = vpack.c.bf16 %v9285_v47, %v9283_v46  ;;  %v1154_v18 = vrot.slane %v9374_v36, 2  ;;  %v1156_v0 = vrot.slane %v9203_v1, 2  ;;  %v1162_v36 = vrot.slane %v9229_v16, 2 }
  0x6a   : > { %v639_v9 = vsel %vm561_vm4, %v637_v53, %v638_v42  ;;  %v641_v49 = vsel %vm561_vm4, %v638_v42, %v640_v56  ;;  %v1140_v53 = vsel %vm1115_vm5, %v1137_v30, %v1139_v6  ;;  %v9510_v42 = vpack.c.bf16 %v9229_v16, %v9227_v15 }
  0x6b   : > { %v9468_v51 = vpack.c.bf16 %v641_v49, %v639_v9  ;;  %v9493_v49 = vpack.c.bf16 %v9191_v55, %v9189_v54  ;;  %v9497_v9 = vpack.c.bf16 %v9209_v2, %v9203_v1  ;;  %v1142_v54 = vrot.slane %v9316_v13, 2 }
  0x6c   : > { %v1144_v55 = vrot.slane %v9325_v22, 2  ;;  %v1146_v56 = vrot.slane %v9351_v60, 2  ;;  %v1493_v22 = vsel %vm738_vm3, %v9276_v41, 0  ;;  %v1150_v6 = vsel %vm1115_vm5, %v1147_v7, %v1149_v14 }
  0x6d   : > { %11576 = vst [vmem:[#allocation24_spill] sm:$0xff] %v9468_v51  ;;  %8213 = vmatmul.mubr.msk.bf16.gmra.mxu1 %vm295_vm0, %v9468_v51  ;;  %v1143_v41 = vsel %vm1115_vm5, %v1141_v19, %v1142_v54  ;;  %v7524_v19 = vld [vmem:[%s9121_s14 + $0x78] sm:$0xff]   ;;  %v9573_v1 = vpack.c.bf16 %v9256_v32, %v9254_v31  ;;  %v1167_v16 = vrot.slane %v9269_v39, 2  ;;  %v1169_v31 = vrot.slane %v9271_v40, 2 }
  0x6e   : > { %8218 = vmatprep.mubr.msk.bf16.mxu1 %vm295_vm0, %v497_v10  ;;  %8253 = vmatmul.mubr.msk.bf16.vlgmr.msra.gmra.mxu0 %vm295_vm0, %v9470_v59  ;;  %v1138_v10 = vsel %vm1115_vm5, %v1136_v63, %v1137_v30  ;;  %v1145_v35 = vsel %vm1115_vm5, %v1142_v54, %v1144_v55  ;;  %v1148_v11 = vsel %vm1115_vm5, %v1146_v56, %v1147_v7  ;;  %v1151_v63 = vrot.slane %v9365_v20, 2 }
  0x6f   : > { %8319 = vmatpush3.bf16.msra.mxu0 %v1703_v5  ;;  %8256 = vmatprep.mubr.msk.bf16.mxu0 %vm295_vm0, %v9474_v21  ;;  %v9529_v26 = vpack.c.bf16 %v1140_v53, %v1138_v10  ;;  %v1152_v30 = vrot.slane %v9367_v8, 2  ;;  %v9551_v5 = vpack.c.bf16 %v9329_v28, %v9327_v27  ;;  %v9560_v10 = vpack.c.bf16 %v9342_v44, %v9340_v43 }
  0x70   : > { %8579 = vmatprep.subr.msk.bf16.mxu0 %vm738_vm3, %v9487_v33  ;;  %v1157_v53 = vrot.slane %v9209_v2, 2  ;;  %v1159_v54 = vrot.slane %v9211_v3, 2  ;;  %v1161_v55 = vrot.slane %v9227_v15, 2  ;;  %v9577_v56 = vpack.c.bf16 %v9378_v29, %v9376_v61 }
  0x71   : > { %v9581_v7 = vpack.c.bf16 %v9297_v58, %v9295_v57  ;;  %v1164_v2 = vrot.slane %v9231_v17, 2  ;;  %v1166_v3 = vrot.slane %v9267_v38, 2  ;;  %v9587_v15 = vpack.c.bf16 %v1150_v6, %v1148_v11 }
  0x72   : > { %v9593_v32 = vpack.c.bf16 %v9452_v52, %v9442_v4  ;;  %v1171_v14 = vrot.slane %v9283_v46, 2  ;;  %v1172_v57 = vrot.slane %v9285_v47, 2  ;;  %v7428_v58 = vunpack.c.l.bf16 %v7524_v19 }
  0x73   : > { %v1174_v17 = vrot.slane %v9287_v48, 2  ;;  %v1176_v38 = vrot.slane %v9327_v27, 2  ;;  %v1153_v39 = vsel %vm1115_vm5, %v1151_v63, %v1152_v30  ;;  %v1155_v40 = vsel %vm1115_vm5, %v1152_v30, %v1154_v18 }
  0x74   : > { %432 = vst.msk [vmem:[#allocation2 + $0x181] sm:$0xff] %vm295_vm0, %v7428_v58  ;;  %v9613_v46 = vpack.c.bf16 %v9316_v13, %v9314_v12  ;;  %v1158_v47 = vsel %vm1115_vm5, %v1156_v0, %v1157_v53  ;;  %v1160_v48 = vsel %vm1115_vm5, %v1157_v53, %v1159_v54  ;;  %v9619_v27 = vpack.c.bf16 %v9353_v62, %v9351_v60  ;;  %v11577_v60 = vld [vmem:[#allocation15_spill] sm:$0xff] }
  0x75   : > { %8219 = vmatmul.mubr.msk.bf16.vlgmr.msra.gmra.mxu1 %vm295_vm0, %v9493_v49  ;;  %v9623_v11 = vpack.c.bf16 %v1160_v48, %v1158_v47  ;;  %v1177_v63 = vrot.slane %v9329_v28, 2  ;;  %v1179_v12 = vrot.slane %v9338_v37, 2  ;;  %v1181_v13 = vrot.slane %v9340_v43, 2  ;;  %v11579_v48 = vld [vmem:[#allocation8_spill] sm:$0xff] }
  0x76   : > { %8285 = vmatpush3.bf16.msra.mxu1 %v1493_v22  ;;  %8222 = vmatprep.mubr.msk.bf16.mxu1 %vm295_vm0, %v9516_v50  ;;  %v9583_v22 = vpack.c.bf16 %v1145_v35, %v1143_v41  ;;  %v7429_v41 = vunpack.c.h.bf16 %v7524_v19  ;;  %v9621_v35 = vpack.c.bf16 %v1155_v40, %v1153_v39  ;;  %v1182_v30 = vrot.slane %v9342_v44, 2 }
  0x77   : > { %8257 = vmatmul.mubr.msk.bf16.gmra.mxu0 %vm295_vm0, %v9526_v25  ;;  %8578 = vmatprep.subr.msk.bf16.mxu1 %vm738_vm3, %v9538_v24  ;;  %v1184_v62 = vrot.slane %v11577_v60, 2  ;;  %v1186_v6 = vrot.slane %v9376_v61, 2  ;;  %v1187_v18 = vrot.slane %v9378_v29, 2  ;;  %v1189_v0 = vrot.slane %v9398_v45, 2 }
  0x78   : > { %8260 = vmatprep.mubr.msk.bf16.mxu0 %vm295_vm0, %v9529_v26  ;;  %433 = vst.msk [vmem:[#allocation2 + $0x189] sm:$0xff] %vm295_vm0, %v7429_v41  ;;  %v1163_v28 = vsel %vm1115_vm5, %v1161_v55, %v1162_v36  ;;  %v1165_v37 = vsel %vm1115_vm5, %v1162_v36, %v1164_v2  ;;  %v9645_v43 = vpack.c.bf16 %v9367_v8, %v9365_v20  ;;  %v1192_v58 = vrot.slane %v9452_v52, 2  ;;  %v11578_v41 = vld [vmem:[#allocation23_spill] sm:$0xff] }
  0x79   : > { %v1168_v61 = vsel %vm1115_vm5, %v1166_v3, %v1167_v16  ;;  %v1170_v29 = vsel %vm1115_vm5, %v1167_v16, %v1169_v31  ;;  %v9649_v44 = vpack.c.bf16 %v1165_v37, %v1163_v28  ;;  %v1173_v20 = vsel %vm1115_vm5, %v1171_v14, %v1172_v57  ;;  %v11581_v28 = vld [vmem:[#allocation12_spill] sm:$0xff] }
  0x7a   : > { %v9651_v45 = vpack.c.bf16 %v1170_v29, %v1168_v61  ;;  %v1175_v8 = vsel %vm1115_vm5, %v1172_v57, %v1174_v17  ;;  %v1178_v19 = vsel %vm1115_vm5, %v1176_v38, %v1177_v63  ;;  %v1180_v53 = vsel %vm1115_vm5, %v1177_v63, %v1179_v12  ;;  %v11583_v61 = vld [vmem:[#allocation17_spill] sm:$0xff]  ;;  %v11585_v29 = vld [vmem:[#allocation22_spill] sm:$0xff] }
  0x7b   : > { %v9665_v54 = vpack.c.bf16 %v1175_v8, %v1173_v20  ;;  %v9667_v55 = vpack.c.bf16 %v1180_v53, %v1178_v19  ;;  %v1183_v36 = vsel %vm1115_vm5, %v1181_v13, %v1182_v30  ;;  %v1185_v2 = vsel %vm1115_vm5, %v1182_v30, %v1184_v62  ;;  %v482_v52 = vld [vmem:[#allocation2 + $0x180] sm:$0xff]  ;;  %v11586_v20 = vld [vmem:[#allocation9_spill] sm:$0xff]  ;;  %v11587_v8 = vld [vmem:[#allocation10_spill] sm:$0xff] }
  0x7c   : > { %v1188_v3 = vsel %vm1115_vm5, %v1186_v6, %v1187_v18  ;;  %v1190_v16 = vsel %vm1115_vm5, %v1187_v18, %v1189_v0  ;;  %v9681_v31 = vpack.c.bf16 %v1185_v2, %v1183_v36  ;;  %v1191_v57 = vrot.slane %v9442_v4, 2  ;;  %v496_v18 = vld [vmem:[%s11500_s1 + $0x10] sm:$0x3]  ;;  %v11580_v0 = vld [vmem:[#allocation11_spill] sm:$0xff]  ;;  %v11588_v19 = vld [vmem:[#allocation13_spill] sm:$0xff] }
  0x7d   : > { %8223 = vmatmul.mubr.msk.bf16.gmra.mxu1 %vm295_vm0, %v9573_v1  ;;  %v9683_v14 = vpack.c.bf16 %v1190_v16, %v1188_v3  ;;  %v1194_v17 = vrot.slane %v11578_v41, 2  ;;  %v1898_v63 = vrot.slane %v482_v52, 2  ;;  %v2110_v6 = vsel %vm738_vm3, %v9487_v33, 0  ;;  %v495_v33 = vld [vmem:[%s11500_s1 + $0xe] sm:$0x3]  ;;  %v11589_v53 = vld [vmem:[#allocation14_spill] sm:$0xff] }
  0x7e   : > { %8226 = vmatprep.mubr.msk.bf16.mxu1 %vm295_vm0, %v9581_v7  ;;  %v1193_v38 = vsel %vm1115_vm5, %v1191_v57, %v1192_v58  ;;  %v1910_v37 = vsel %vm738_vm3, %v9538_v24, 0  ;;  %v11584_v24 = vld [vmem:[#allocation20_spill] sm:$0xff]  ;;  %v11590_v36 = vld [vmem:[#allocation18_spill] sm:$0xff]  ;;  %v11591_v2 = vld [vmem:[#allocation19_spill] sm:$0xff]  ;;  %v1691_v3 = vrot.slane %v482_v52, 1 }
  0x7f   : > { %8261 = vmatmul.mubr.msk.bf16.gmra.mxu0 %vm295_vm0, %v9583_v22  ;;  %v1195_v4 = vsel %vm1115_vm5, %v1192_v58, %v1194_v17  ;;  %v483_v40 = vld [vmem:[#allocation2 + $0x188] sm:$0xff]  ;;  %v484_v47 = vld [vmem:[#allocation2 + $0x190] sm:$0xff] }
  0x80   : > { %8264 = vmatprep.mubr.msk.bf16.mxu0 %vm295_vm0, %v9587_v15  ;;  %v9698_v39 = vpack.c.bf16 %v1195_v4, %v1193_v38  ;;  %v1899_v12 = vrot.slane %v483_v40, 2  ;;  %v1901_v13 = vrot.slane %v484_v47, 2  ;;  %v1692_v16 = vrot.slane %v483_v40, 1  ;;  %v11592_v58 = vld [vmem:[#allocation21_spill] sm:$0xff]  ;;  %v9786_v4 = vld [vmem:[#allocation2 + $0x198] sm:$0xff] }
  0x81   : > { %v1694_v57 = vrot.slane %v484_v47, 1  ;;  %v9788_v47 = vld [vmem:[#allocation2 + $0x1a0] sm:$0xff] }
  0x82   : > { %v1900_v30 = vsel %vm1115_vm5, %v1898_v63, %v1899_v12  ;;  %v1902_v60 = vsel %vm1115_vm5, %v1899_v12, %v1901_v13  ;;  %v1693_v41 = vsel %vm561_vm4, %v1691_v3, %v1692_v16  ;;  %v2308_v63 = vrot.slane %v9786_v4, 1  ;;  %v9796_v13 = vld [vmem:[#allocation2 + $0x1a8] sm:$0xff] }
  0x83   : > { %v9710_v62 = vpack.c.bf16 %v1902_v60, %v1900_v30  ;;  %v1695_v17 = vsel %vm561_vm4, %v1692_v16, %v1694_v57  ;;  %v2309_v12 = vrot.slane %v9788_v47, 1  ;;  %v2311_v30 = vrot.slane %v9796_v13, 1 }
  0x84   : > { %v9782_v38 = vpack.c.bf16 %v1695_v17, %v1693_v41  ;;  %v1488_v60 = vpack.c.bf16 %v483_v40, %v482_v52  ;;  %v2527_v16 = vsel %vm738_vm3, %v496_v18, 0 }
  0x85   : > { %8227 = vmatmul.mubr.msk.bf16.gmra.mxu1 %vm295_vm0, %v9613_v46 }
  0x86   : > { %8230 = vmatprep.mubr.msk.bf16.mxu1 %vm295_vm0, %v9619_v27  ;;  %11593 = vst [vmem:[#allocation15_spill] sm:$0xff] %v9782_v38 }
  0x87   : > { %8265 = vmatmul.mubr.msk.bf16.gmra.mxu0 %vm295_vm0, %v9621_v35 }
  0x88   : > { %8268 = vmatprep.mubr.msk.bf16.mxu0 %vm295_vm0, %v9623_v11 }
  0x8d   : > { %8231 = vmatmul.mubr.msk.bf16.gmra.mxu1 %vm295_vm0, %v9645_v43 }
  0x8e   : > { %8234 = vmatprep.mubr.msk.bf16.mxu1 %vm295_vm0, %v9497_v9 }
  0x8f   : > { %8269 = vmatmul.mubr.msk.bf16.gmra.mxu0 %vm295_vm0, %v9649_v44 }
  0x90   : > { %8272 = vmatprep.mubr.msk.bf16.mxu0 %vm295_vm0, %v9651_v45 }
  0x95   : > { %8235 = vmatmul.mubr.msk.bf16.gmra.mxu1 %vm295_vm0, %v9510_v42 }
  0x96   : > { %8238 = vmatprep.mubr.msk.bf16.mxu1 %vm295_vm0, %v9522_v34 }
  0x97   : > { %8273 = vmatmul.mubr.msk.bf16.gmra.mxu0 %vm295_vm0, %v9665_v54 }
  0x98   : > { %8276 = vmatprep.mubr.msk.bf16.mxu0 %vm295_vm0, %v9667_v55 }
  0x9d   : > { %8239 = vmatmul.mubr.msk.bf16.gmra.mxu1 %vm295_vm0, %v9533_v23 }
  0x9e   : > { %8242 = vmatprep.mubr.msk.bf16.mxu1 %vm295_vm0, %v9551_v5 }
  0x9f   : > { %8277 = vmatmul.mubr.msk.bf16.gmra.mxu0 %vm295_vm0, %v9681_v31 }
  0xa0   : > { %8280 = vmatprep.mubr.msk.bf16.mxu0 %vm295_vm0, %v9683_v14 }
  0xa5   : > { %8243 = vmatmul.mubr.msk.bf16.gmra.mxu1 %vm295_vm0, %v9560_v10 }
  0xa6   : > { %8246 = vmatprep.mubr.msk.bf16.mxu1 %vm295_vm0, %v9577_v56 }
  0xa7   : > { %8281 = vmatmul.mubr.msk.bf16.gmra.mxu0 %vm295_vm0, %v9698_v39 }
  0xa8   : > { %8320 = vmatprep.mubr.msk.bf16.mxu0 %vm295_vm0, %v11579_v48 }
  0xad   : > { %8247 = vmatmul.mubr.msk.bf16.gmra.mxu1 %vm295_vm0, %v9593_v32 }
  0xae   : > { %8286 = vmatprep.mubr.msk.bf16.mxu1 %vm295_vm0, %v9493_v49  ;;  %v11582_v49 = vld [vmem:[#allocation16_spill] sm:$0xff] }
  0xaf   : > { %8321 = vmatmul.mubr.msk.bf16.vlgmr.msra.gmra.mxu0 %vm295_vm0, %v11580_v0 }
  0xb0   : > { %8387 = vmatpush3.bf16.msra.mxu0 %v2110_v6  ;;  %8324 = vmatprep.mubr.msk.bf16.mxu0 %vm295_vm0, %v11581_v28  ;;  %v9802_v6 = vsel %vm561_vm4, %v2308_v63, %v2309_v12  ;;  %v2105_v63 = vpack.c.bf16 %v9788_v47, %v9786_v4 }
  0xb1   : > { %8581 = vmatprep.subr.msk.bf16.mxu0 %vm738_vm3, %v496_v18  ;;  %11594 = vst [vmem:[#allocation23_spill] sm:$0xff] %v9802_v6 }
  0xb5   : > { %8287 = vmatmul.mubr.msk.bf16.vlgmr.msra.gmra.mxu1 %vm295_vm0, %v9516_v50 }
  0xb6   : > { %8353 = vmatpush3.bf16.msra.mxu1 %v1910_v37  ;;  %8290 = vmatprep.mubr.msk.bf16.mxu1 %vm295_vm0, %v9573_v1  ;;  %v9805_v37 = vsel %vm561_vm4, %v2309_v12, %v2311_v30 }
  0xb7   : > { %8325 = vmatmul.mubr.msk.bf16.gmra.mxu0 %vm295_vm0, %v11582_v49  ;;  %8580 = vmatprep.subr.msk.bf16.mxu1 %vm738_vm3, %v495_v33  ;;  %11595 = vst [vmem:[#allocation25_spill] sm:$0xff] %v9805_v37 }
  0xb8   : > { %8328 = vmatprep.mubr.msk.bf16.mxu0 %vm295_vm0, %v11583_v61 }
  0xbd   : > { %8291 = vmatmul.mubr.msk.bf16.gmra.mxu1 %vm295_vm0, %v9581_v7 }
  0xbe   : > { %8294 = vmatprep.mubr.msk.bf16.mxu1 %vm295_vm0, %v9613_v46 }
  0xbf   : > { %8329 = vmatmul.mubr.msk.bf16.gmra.mxu0 %vm295_vm0, %v11584_v24 }
  0xc0   : > { %8332 = vmatprep.mubr.msk.bf16.mxu0 %vm295_vm0, %v11585_v29 }
  0xc5   : > { %8295 = vmatmul.mubr.msk.bf16.gmra.mxu1 %vm295_vm0, %v9619_v27 }
  0xc6   : > { %8298 = vmatprep.mubr.msk.bf16.mxu1 %vm295_vm0, %v9645_v43 }
  0xc7   : > { %8333 = vmatmul.mubr.msk.bf16.gmra.mxu0 %vm295_vm0, %v11586_v20 }
  0xc8   : > { %8336 = vmatprep.mubr.msk.bf16.mxu0 %vm295_vm0, %v11587_v8 }
  0xcd   : > { %8299 = vmatmul.mubr.msk.bf16.gmra.mxu1 %vm295_vm0, %v9497_v9 }
  0xce   : > { %8302 = vmatprep.mubr.msk.bf16.mxu1 %vm295_vm0, %v9510_v42 }
  0xcf   : > { %8337 = vmatmul.mubr.msk.bf16.gmra.mxu0 %vm295_vm0, %v11588_v19 }
  0xd0   : > { %8340 = vmatprep.mubr.msk.bf16.mxu0 %vm295_vm0, %v11589_v53 }
  0xd5   : > { %8303 = vmatmul.mubr.msk.bf16.gmra.mxu1 %vm295_vm0, %v9522_v34 }
  0xd6   : > { %8306 = vmatprep.mubr.msk.bf16.mxu1 %vm295_vm0, %v9533_v23 }
  0xd7   : > { %8341 = vmatmul.mubr.msk.bf16.gmra.mxu0 %vm295_vm0, %v11590_v36 }
  0xd8   : > { %8344 = vmatprep.mubr.msk.bf16.mxu0 %vm295_vm0, %v11591_v2 }
  0xdd   : > { %8307 = vmatmul.mubr.msk.bf16.gmra.mxu1 %vm295_vm0, %v9551_v5 }
  0xde   : > { %8310 = vmatprep.mubr.msk.bf16.mxu1 %vm295_vm0, %v9560_v10 }
  0xdf   : > { %8345 = vmatmul.mubr.msk.bf16.gmra.mxu0 %vm295_vm0, %v11592_v58 }
  0xe0   : > { %8348 = vmatprep.mubr.msk.bf16.mxu0 %vm295_vm0, %v9468_v51 }
  0xe5   : > { %8311 = vmatmul.mubr.msk.bf16.gmra.mxu1 %vm295_vm0, %v9577_v56 }
  0xe6   : > { %8314 = vmatprep.mubr.msk.bf16.mxu1 %vm295_vm0, %v9593_v32 }
  0xe7   : > { %8349 = vmatmul.mubr.msk.bf16.gmra.mxu0 %vm295_vm0, %v9782_v38 }
  0xe8   : > { %8388 = vmatprep.mubr.msk.bf16.mxu0 %vm295_vm0, %v9516_v50  ;;  %v2320_v50 = vsel %vm738_vm3, %v495_v33, 0 }
  0xed   : > { %8315 = vmatmul.mubr.msk.bf16.gmra.mxu1 %vm295_vm0, %v1488_v60 }
  0xee   : > { %8354 = vmatprep.mubr.msk.bf16.mxu1 %vm295_vm0, %v9470_v59 }
  0xef   : > { %8389 = vmatmul.mubr.msk.bf16.vlgmr.msra.gmra.mxu0 %vm295_vm0, %v9573_v1 }
  0xf0   : > { %8455 = vmatpush3.bf16.msra.mxu0 %v2527_v16  ;;  %8392 = vmatprep.mubr.msk.bf16.mxu0 %vm295_vm0, %v9581_v7 }
  0xf5   : > { %8355 = vmatmul.mubr.msk.bf16.vlgmr.msra.gmra.mxu1 %vm295_vm0, %v9474_v21 }
  0xf6   : > { %8421 = vmatpush3.bf16.msra.mxu1 %v2320_v50  ;;  %8358 = vmatprep.mubr.msk.bf16.mxu1 %vm295_vm0, %v9526_v25 }
  0xf7   : > { %8393 = vmatmul.mubr.msk.bf16.gmra.mxu0 %vm295_vm0, %v9613_v46 }
  0xf8   : > { %8396 = vmatprep.mubr.msk.bf16.mxu0 %vm295_vm0, %v9619_v27 }
  0xfd   : > { %8359 = vmatmul.mubr.msk.bf16.gmra.mxu1 %vm295_vm0, %v9529_v26 }
  0xfe   : > { %8362 = vmatprep.mubr.msk.bf16.mxu1 %vm295_vm0, %v9583_v22 }
  0xff   : > { %8397 = vmatmul.mubr.msk.bf16.gmra.mxu0 %vm295_vm0, %v9645_v43 }
 0x100   : > { %8400 = vmatprep.mubr.msk.bf16.mxu0 %vm295_vm0, %v9497_v9 }
 0x105   : > { %8363 = vmatmul.mubr.msk.bf16.gmra.mxu1 %vm295_vm0, %v9587_v15 }
 0x106   : > { %8366 = vmatprep.mubr.msk.bf16.mxu1 %vm295_vm0, %v9621_v35 }
 0x107   : > { %8401 = vmatmul.mubr.msk.bf16.gmra.mxu0 %vm295_vm0, %v9510_v42 }
 0x108   : > { %8404 = vmatprep.mubr.msk.bf16.mxu0 %vm295_vm0, %v9522_v34 }
 0x10d   : > { %8367 = vmatmul.mubr.msk.bf16.gmra.mxu1 %vm295_vm0, %v9623_v11 }
 0x10e   : > { %8370 = vmatprep.mubr.msk.bf16.mxu1 %vm295_vm0, %v9649_v44  ;;  %v8186_v59 = vpop.f32.mrf.mxu0 }
 0x10f   : > { %8405 = vmatmul.mubr.msk.bf16.gmra.mxu0 %vm295_vm0, %v9533_v23 }
 0x110   : > { %8408 = vmatprep.mubr.msk.bf16.mxu0 %vm295_vm0, %v9551_v5  ;;  %v776_v9 = vpop.f32.mrf.mxu0 }
 0x111   : > { %v9850_v1 = vpop.f32.mrf.mxu1 }
 0x112   : > { %v8187_v42 = vpop.f32.mrf.mxu0 }
 0x113   : > { %v9852_v7 = vpop.f32.mrf.mxu1 }
 0x114   : > { %v9856_v34 = vpop.f32.mrf.mxu0 }
 0x115   : > { %8371 = vmatmul.mubr.msk.bf16.gmra.mxu1 %vm295_vm0, %v9651_v45  ;;  %v9858_v46 = vpop.f32.mrf.mxu1 }
 0x116   : > { %8374 = vmatprep.mubr.msk.bf16.mxu1 %vm295_vm0, %v9665_v54  ;;  %v9862_v23 = vpop.f32.mrf.mxu0 }
 0x117   : > { %8409 = vmatmul.mubr.msk.bf16.gmra.mxu0 %vm295_vm0, %v9560_v10  ;;  %v9866_v5 = vpop.f32.mrf.mxu1 }
 0x118   : > { %11596 = vst [vmem:[#allocation26_spill] sm:$0xff] %v9866_v5  ;;  %8412 = vmatprep.mubr.msk.bf16.mxu0 %vm295_vm0, %v9577_v56  ;;  %v9870_v27 = vpop.f32.mrf.mxu0 }
 0x119   : > { %v9872_v43 = vpop.f32.mrf.mxu1 }
 0x11a   : > { %v9874_v52 = vpop.f32.mrf.mxu0 }
 0x11b   : > { %v9876_v40 = vpop.f32.mrf.mxu1 }
 0x11c   : > { %v9880_v18 = vpop.f32.mrf.mxu0 }
 0x11d   : > { %8375 = vmatmul.mubr.msk.bf16.gmra.mxu1 %vm295_vm0, %v9667_v55  ;;  %v9882_v33 = vpop.f32.mrf.mxu1 }
 0x11e   : > { %8378 = vmatprep.mubr.msk.bf16.mxu1 %vm295_vm0, %v9681_v31  ;;  %v9886_v10 = vpop.f32.mrf.mxu0 }
 0x11f   : > { %8413 = vmatmul.mubr.msk.bf16.gmra.mxu0 %vm295_vm0, %v9593_v32  ;;  %v9890_v56 = vpop.f32.mrf.mxu1 }
 0x120   : > { %11597 = vst [vmem:[#allocation27_spill] sm:$0xff] %v9890_v56  ;;  %8416 = vmatprep.mubr.msk.bf16.mxu0 %vm295_vm0, %v1488_v60  ;;  %v9893_v57 = vpop.f32.mrf.mxu0 }
 0x121   : > { %v9895_v41 = vpop.f32.mrf.mxu1 }
 0x122   : > { %11598 = vst [vmem:[#allocation28_spill] sm:$0xff] %v9895_v41  ;;  %v9897_v17 = vpop.f32.mrf.mxu0 }
 0x123   : > { %v9901_v12 = vpop.f32.mrf.mxu1 }
 0x124   : > { %11599 = vst [vmem:[#allocation29_spill] sm:$0xff] %v9901_v12  ;;  %v9905_v30 = vpop.f32.mrf.mxu0 }
 0x125   : > { %8379 = vmatmul.mubr.msk.bf16.gmra.mxu1 %vm295_vm0, %v9683_v14  ;;  %v9907_v32 = vpop.f32.mrf.mxu1 }
 0x126   : > { %11600 = vst [vmem:[#allocation30_spill] sm:$0xff] %v9907_v32  ;;  %8382 = vmatprep.mubr.msk.bf16.mxu1 %vm295_vm0, %v9698_v39  ;;  %v9911_v60 = vpop.f32.mrf.mxu0 }
 0x127   : > { %8417 = vmatmul.mubr.msk.bf16.gmra.mxu0 %vm295_vm0, %v2105_v63  ;;  %v9916_v16 = vpop.f32.mrf.mxu1 }
 0x128   : > { %8456 = vmatprep.mubr.msk.bf16.mxu0 %vm295_vm0, %v9474_v21  ;;  %11601 = vst [vmem:[#allocation31_spill] sm:$0xff] %v9916_v16  ;;  %v9918_v50 = vpop.f32.mrf.mxu0 }
 0x12a   : > { %v9920_v3 = vpop.f32.mrf.mxu0 }
 0x12c   : > { %v9926_v56 = vpop.f32.mrf.mxu0 }
 0x12d   : > { %v9922_v48 = vpop.f32.mrf.mxu1  ;;  %8383 = vmatmul.mubr.msk.bf16.gmra.mxu1 %vm295_vm0, %v9710_v62 }
 0x12e   : > { %11602 = vst [vmem:[#allocation32_spill] sm:$0xff] %v9922_v48  ;;  %8422 = vmatprep.mubr.msk.bf16.mxu1 %vm295_vm0, %v11580_v0  ;;  %v8254_v5 = vpop.f32.mrf.mxu0 }
 0x12f   : > { %v9930_v63 = vpop.f32.mrf.mxu1  ;;  %8457 = vmatmul.mubr.msk.bf16.vlgmr.msra.gmra.mxu0 %vm295_vm0, %v9526_v25 }
 0x130   : > { %11603 = vst [vmem:[#allocation33_spill] sm:$0xff] %v9930_v63  ;;  %8460 = vmatprep.mubr.msk.bf16.mxu0 %vm295_vm0, %v9529_v26  ;;  %v1329_v16 = vpop.f32.mrf.mxu0 }
 0x131   : > { %v9936_v21 = vpop.f32.mrf.mxu1 }
 0x132   : > { %11604 = vst [vmem:[#allocation34_spill] sm:$0xff] %v9936_v21  ;;  %v8255_v6 = vpop.f32.mrf.mxu0 }
 0x133   : > { %v9938_v48 = vpop.f32.mrf.mxu1 }
 0x134   : > { %11605 = vst [vmem:[#allocation35_spill] sm:$0xff] %v9938_v48  ;;  %v1332_v0 = vpop.f32.mrf.mxu0 }
 0x135   : > { %v8220_v37 = vpop.f32.mrf.mxu1  ;;  %8423 = vmatmul.mubr.msk.bf16.vlgmr.msra.gmra.mxu1 %vm295_vm0, %v11581_v28 }
 0x136   : > { %v997_v32 = vadd.f32 %v8220_v37, %v8186_v59  ;;  %8426 = vmatprep.mubr.msk.bf16.mxu1 %vm295_vm0, %v11582_v49 }
 0x137   : > { %v988_v63 = vpop.f32.mrf.mxu1  ;;  %v8258_v25 = vpop.f32.mrf.mxu0  ;;  %8461 = vmatmul.mubr.msk.bf16.gmra.mxu0 %vm295_vm0, %v9583_v22 }
 0x138   : > { %v989_v26 = vadd.f32 %v988_v63, %v776_v9  ;;  %8464 = vmatprep.mubr.msk.bf16.mxu0 %vm295_vm0, %v9587_v15  ;;  %v9948_v48 = vadd.f32 %v8254_v5, %v997_v32 }
 0x139   : > { %v8221_v21 = vpop.f32.mrf.mxu1  ;;  %v1345_v12 = vpop.f32.mrf.mxu0 }
 0x13a   : > { %v1000_v38 = vadd.f32 %v8221_v21, %v8187_v42  ;;  %v9950_v28 = vadd.f32 %v1329_v16, %v989_v26 }
 0x13b   : > { %v991_v37 = vpop.f32.mrf.mxu1  ;;  %v8259_v59 = vpop.f32.mrf.mxu0 }
 0x13c   : > { %v992_v49 = vadd.f32 %v991_v37, %v9856_v34  ;;  %v9953_v41 = vadd.f32 %v8255_v6, %v1000_v38 }
 0x13d   : > { %v8224_v51 = vpop.f32.mrf.mxu1  ;;  %8427 = vmatmul.mubr.msk.bf16.gmra.mxu1 %vm295_vm0, %v11583_v61  ;;  %v1348_v22 = vpop.f32.mrf.mxu0 }
 0x13e   : > { %v1013_v15 = vadd.f32 %v8224_v51, %v9862_v23  ;;  %8430 = vmatprep.mubr.msk.bf16.mxu1 %vm295_vm0, %v11584_v24  ;;  %v9960_v9 = vadd.f32 %v1332_v0, %v992_v49 }
 0x13f   : > { %v1004_v42 = vpop.f32.mrf.mxu1  ;;  %v8262_v5 = vpop.f32.mrf.mxu0  ;;  %8465 = vmatmul.mubr.msk.bf16.gmra.mxu0 %vm295_vm0, %v9621_v35 }
 0x140   : > { %v1005_v38 = vadd.f32 %v1004_v42, %v9870_v27  ;;  %8468 = vmatprep.mubr.msk.bf16.mxu0 %vm295_vm0, %v9623_v11  ;;  %v9967_v6 = vadd.f32 %v8258_v25, %v1013_v15 }
 0x141   : > { %v8225_v34 = vpop.f32.mrf.mxu1  ;;  %v1361_v32 = vpop.f32.mrf.mxu0 }
 0x142   : > { %v1016_v51 = vadd.f32 %v8225_v34, %v9874_v52  ;;  %v9970_v23 = vadd.f32 %v1345_v12, %v1005_v38 }
 0x143   : > { %v1007_v0 = vpop.f32.mrf.mxu1  ;;  %v8263_v49 = vpop.f32.mrf.mxu0 }
 0x144   : > { %v1008_v16 = vadd.f32 %v1007_v0, %v9880_v18  ;;  %v9973_v63 = vadd.f32 %v8259_v59, %v1016_v51 }
 0x145   : > { %v8228_v35 = vpop.f32.mrf.mxu1  ;;  %8431 = vmatmul.mubr.msk.bf16.gmra.mxu1 %vm295_vm0, %v11585_v29  ;;  %v1364_v27 = vpop.f32.mrf.mxu0  ;;  %v8629_v29 = vld [vmem:[#allocation5 + $0x48] sm:$0xff]  }
 0x146   : > { %v1029_v11 = vadd.f32 %v8228_v35, %v9886_v10  ;;  %8434 = vmatprep.mubr.msk.bf16.mxu1 %vm295_vm0, %v11586_v20  ;;  %v9980_v21 = vadd.f32 %v1348_v22, %v1008_v16 }
 0x147   : > { %v1020_v52 = vpop.f32.mrf.mxu1  ;;  %v8266_v12 = vpop.f32.mrf.mxu0  ;;  %8469 = vmatmul.mubr.msk.bf16.gmra.mxu0 %vm295_vm0, %v9649_v44 }
 0x148   : > { %v1021_v18 = vadd.f32 %v1020_v52, %v9893_v57  ;;  %8472 = vmatprep.mubr.msk.bf16.mxu0 %vm295_vm0, %v9651_v45  ;;  %v9987_v25 = vadd.f32 %v8262_v5, %v1029_v11 }
 0x149   : > { %v8229_v26 = vpop.f32.mrf.mxu1  ;;  %v1377_v37 = vpop.f32.mrf.mxu0 }
 0x14a   : > { %v1032_v10 = vadd.f32 %v8229_v26, %v9897_v17  ;;  %v9990_v59 = vadd.f32 %v1361_v32, %v1021_v18  ;;  %v8605_v26 = vld [vmem:[#allocation5 + $0x78] sm:$0xff]  }
 0x14b   : > { %v1023_v22 = vpop.f32.mrf.mxu1  ;;  %v8267_v15 = vpop.f32.mrf.mxu0  ;;  %7693 = vmatprep.subr.bf16.mxu1 %v8605_v26 }
 0x14c   : > { %v1024_v42 = vadd.f32 %v1023_v22, %v9905_v30  ;;  %v9993_v38 = vadd.f32 %v8263_v49, %v1032_v10 }
 0x14d   : > { %v8232_v44 = vpop.f32.mrf.mxu1  ;;  %8435 = vmatmul.mubr.msk.bf16.gmra.mxu1 %vm295_vm0, %v11587_v8  ;;  %v1380_v57 = vpop.f32.mrf.mxu0 }
 0x14e   : > { %v1045_v45 = vadd.f32 %v8232_v44, %v9911_v60  ;;  %8438 = vmatprep.mubr.msk.bf16.mxu1 %vm295_vm0, %v11588_v19  ;;  %v10000_v5 = vadd.f32 %v1364_v27, %v1024_v42  ;;  %v8607_v42 = vld [vmem:[#allocation5 + $0x38] sm:$0xff]  }
 0x14f   : > { %v1036_v17 = vpop.f32.mrf.mxu1  ;;  %v8270_v34 = vpop.f32.mrf.mxu0  ;;  %8473 = vmatmul.mubr.msk.bf16.gmra.mxu0 %vm295_vm0, %v9665_v54  ;;  %v8608_v44 = vld [vmem:[#allocation5 + $0xb8] sm:$0xff]   ;;  %7694 = vmatpush3.bf16.msra.mxu1 %v8607_v42 }
 0x150   : > { %v1037_v30 = vadd.f32 %v1036_v17, %v9918_v50  ;;  %8476 = vmatprep.mubr.msk.bf16.mxu0 %vm295_vm0, %v9667_v55  ;;  %v10007_v32 = vadd.f32 %v8266_v12, %v1045_v45  ;;  %v2518_v45 = vrot.slane %v9796_v13, 2 }
 0x151   : > { %v8233_v51 = vpop.f32.mrf.mxu1  ;;  %v1393_v0 = vpop.f32.mrf.mxu0 }
 0x152   : > { %v1048_v60 = vadd.f32 %v8233_v51, %v9920_v3  ;;  %v10010_v49 = vadd.f32 %v1377_v37, %v1037_v30  ;;  %v8606_v37 = vld [vmem:[#allocation5 + $0xf8] sm:$0xff]  }
 0x153   : > { %v1039_v16 = vpop.f32.mrf.mxu1  ;;  %v8271_v35 = vpop.f32.mrf.mxu0  ;;  %7805 = vmatprep.subr.bf16.mxu0 %v8606_v37  ;;  %v11606_v37 = vld [vmem:[#allocation24_spill] sm:$0xff] }
 0x154   : > { %v1040_v27 = vadd.f32 %v1039_v16, %v9926_v56  ;;  %v10013_v11 = vadd.f32 %v8267_v15, %v1048_v60  ;;  %7806 = vmatpush3.bf16.msra.mxu0 %v8608_v44  ;;  %v8610_v16 = vld [vmem:[#allocation5 + $0xf0] sm:$0xff]  }
 0x155   : > { %v8236_v54 = vpop.f32.mrf.mxu1  ;;  %8439 = vmatmul.mubr.msk.bf16.gmra.mxu1 %vm295_vm0, %v11589_v53  ;;  %v10017_v50 = vpop.f32.mrf.mxu0  ;;  %7807 = vmatprep.subr.bf16.mxu0 %v8610_v16  ;;  %v8616_v16 = vld [vmem:[#allocation5 + $0xa8] sm:$0xff]   ;;  %v8885_v53 = vld [vmem:[#allocation3] sm:$0xff] }
 0x156   : > { %v1061_v55 = vadd.f32 %v8236_v54, %v9850_v1  ;;  %8442 = vmatprep.mubr.msk.bf16.mxu1 %vm295_vm0, %v11590_v36  ;;  %v10022_v3 = vadd.f32 %v1380_v57, %v1040_v27  ;;  %v2515_v57 = vrot.slane %v9786_v4, 2  ;;  %v7226_v19 = vpack.c.bf16 %v8885_v53, %v8885_v53 }
 0x157   : > { %v1052_v52 = vpop.f32.mrf.mxu1  ;;  %v8274_v12 = vpop.f32.mrf.mxu0  ;;  %8477 = vmatmul.mubr.msk.bf16.gmra.mxu0 %vm295_vm0, %v9681_v31  ;;  %v3543_v20 = vrot.slane %v8885_v53, 2 }
 0x158   : > { %v1053_v56 = vadd.f32 %v1052_v52, %v9852_v7  ;;  %8480 = vmatprep.mubr.msk.bf16.mxu0 %vm295_vm0, %v9683_v14  ;;  %v10029_v18 = vadd.f32 %v8270_v34, %v1061_v55  ;;  %v2516_v14 = vrot.slane %v9788_v47, 2  ;;  %3191 = vst [vmem:[#allocation4] sm:$0xf] %v7226_v19  ;;  %3192 = vst [vmem:[#allocation4 + $0x24] sm:$0xf] %v7226_v19 }
 0x159   : > { %v8237_v1 = vpop.f32.mrf.mxu1  ;;  %v1409_v10 = vpop.f32.mrf.mxu0 }
 0x15a   : > { %v1064_v22 = vadd.f32 %v8237_v1, %v9858_v46  ;;  %v10032_v15 = vadd.f32 %v1393_v0, %v1053_v56  ;;  %v2517_v13 = vsel %vm1115_vm5, %v2515_v57, %v2516_v14  ;;  %v2519_v0 = vsel %vm1115_vm5, %v2516_v14, %v2518_v45  ;;  %v11609_v57 = vld [vmem:[#allocation29_spill] sm:$0xff] }
 0x15b   : > { %v10034_v31 = vpop.f32.mrf.mxu1  ;;  %v8275_v7 = vpop.f32.mrf.mxu0  ;;  %v2522_v56 = vpack.c.bf16 %v2519_v0, %v2517_v13  ;;  %v8613_v45 = vld [vmem:[#allocation5 + $0x68] sm:$0xff]  }
 0x15c   : > { %v10039_v17 = vadd.f32 %v8271_v35, %v1064_v22  ;;  %v11608_v22 = vld [vmem:[#allocation15_spill] sm:$0xff] }
 0x15d   : > { %v8240_v46 = vpop.f32.mrf.mxu1  ;;  %8443 = vmatmul.mubr.msk.bf16.gmra.mxu1 %vm295_vm0, %v11591_v2  ;;  %v10043_v34 = vpop.f32.mrf.mxu0 }
 0x15e   : > { %v1077_v30 = vadd.f32 %v8240_v46, %v9872_v43  ;;  %8446 = vmatprep.mubr.msk.bf16.mxu1 %vm295_vm0, %v11592_v58  ;;  %v8609_v43 = vld [vmem:[#allocation5 + $0x70] sm:$0xff]   ;;  %v8614_v46 = vld [vmem:[#allocation5 + $0xe8] sm:$0xff]  }
 0x15f   : > { %v1068_v4 = vpop.f32.mrf.mxu1  ;;  %v8278_v51 = vpop.f32.mrf.mxu0  ;;  %8481 = vmatmul.mubr.msk.bf16.gmra.mxu0 %vm295_vm0, %v9698_v39  ;;  %7695 = vmatprep.subr.bf16.mxu1 %v8609_v43  ;;  %v8611_v39 = vld [vmem:[#allocation5 + $0x30] sm:$0xff]   ;;  %v8615_v43 = vld [vmem:[#allocation5 + $0x28] sm:$0xff]  }
 0x160   : > { %v1069_v47 = vadd.f32 %v1068_v4, %v9876_v40  ;;  %8484 = vmatprep.mubr.msk.bf16.mxu0 %vm295_vm0, %v9710_v62  ;;  %v10055_v60 = vadd.f32 %v8274_v12, %v1077_v30  ;;  %v8612_v40 = vld [vmem:[#allocation5 + $0xb0] sm:$0xff]   ;;  %7696 = vmatpush3.bf16.msra.mxu1 %v8611_v39 }
 0x161   : > { %v8241_v35 = vpop.f32.mrf.mxu1  ;;  %v1425_v27 = vpop.f32.mrf.mxu0  ;;  %7808 = vmatpush3.bf16.msra.mxu0 %v8612_v40  ;;  %7697 = vmatprep.subr.bf16.mxu1 %v8613_v45  ;;  %v11611_v40 = vld [vmem:[#allocation25_spill] sm:$0xff] }
 0x162   : > { %v1080_v54 = vadd.f32 %v8241_v35, %v9882_v33  ;;  %v10058_v55 = vadd.f32 %v1409_v10, %v1069_v47  ;;  %v11607_v33 = vld [vmem:[#allocation28_spill] sm:$0xff]  ;;  %v11610_v47 = vld [vmem:[#allocation30_spill] sm:$0xff]  ;;  %7809 = vmatprep.subr.bf16.mxu0 %v8614_v46 }
 0x163   : > { %v10060_v52 = vpop.f32.mrf.mxu1  ;;  %v8279_v62 = vpop.f32.mrf.mxu0 }
 0x164   : > { %v10062_v26 = vadd.f32 %v8275_v7, %v1080_v54  ;;  %7698 = vmatpush3.bf16.msra.mxu1 %v8615_v43  ;;  %v11616_v43 = vld [vmem:[#allocation34_spill] sm:$0xff] }
 0x165   : > { %v8244_v12 = vpop.f32.mrf.mxu1  ;;  %8447 = vmatmul.mubr.msk.bf16.gmra.mxu1 %vm295_vm0, %v11606_v37  ;;  %v10066_v1 = vpop.f32.mrf.mxu0  ;;  %7810 = vmatpush3.bf16.msra.mxu0 %v8616_v16 }
 0x166   : > { %v1093_v10 = vadd.f32 %v8244_v12, %v11607_v33  ;;  %8450 = vmatprep.mubr.msk.bf16.mxu1 %vm295_vm0, %v11608_v22 }
 0x167   : > { %v1084_v42 = vpop.f32.mrf.mxu1  ;;  %v8282_v44 = vpop.f32.mrf.mxu0  ;;  %8485 = vmatmul.mubr.msk.bf16.gmra.mxu0 %vm295_vm0, %v2522_v56  ;;  %v11612_v56 = vld [vmem:[#allocation23_spill] sm:$0xff] }
 0x168   : > { %v1085_v7 = vadd.f32 %v1084_v42, %v11609_v57  ;;  %v10073_v14 = vadd.f32 %v8278_v51, %v1093_v10  ;;  %v11613_v12 = vpack.c.bf16 %v11611_v40, %v11612_v56  ;;  %v8619_v40 = vld [vmem:[#allocation5 + $0x20] sm:$0xff]  }
 0x169   : > { %v8245_v30 = vpop.f32.mrf.mxu1  ;;  %v1441_v4 = vpop.f32.mrf.mxu0  ;;  %v8620_v56 = vld [vmem:[#allocation5 + $0xa0] sm:$0xff]  }
 0x16a   : > { %v1096_v13 = vadd.f32 %v8245_v30, %v11610_v47  ;;  %v10076_v0 = vadd.f32 %v1425_v27, %v1085_v7  ;;  %v11614_v27 = vld [vmem:[#allocation32_spill] sm:$0xff]  ;;  %v11615_v7 = vld [vmem:[#allocation33_spill] sm:$0xff] }
 0x16b   : > { %v10078_v35 = vpop.f32.mrf.mxu1  ;;  %v8283_v54 = vpop.f32.mrf.mxu0  ;;  %v8618_v30 = vld [vmem:[#allocation5 + $0xe0] sm:$0xff]  }
 0x16c   : > { %v10080_v39 = vadd.f32 %v8279_v62, %v1096_v13  ;;  %v8617_v62 = vld [vmem:[#allocation5 + $0x60] sm:$0xff]   ;;  %7811 = vmatprep.subr.bf16.mxu0 %v8618_v30 }
 0x16d   : > { %v8248_v51 = vpop.f32.mrf.mxu1  ;;  %8451 = vmatmul.mubr.msk.bf16.gmra.mxu1 %vm295_vm0, %v11613_v12  ;;  %v10086_v33 = vpop.f32.mrf.mxu0  ;;  %7699 = vmatprep.subr.bf16.mxu1 %v8617_v62 }
 0x16e   : > { %v1109_v10 = vadd.f32 %v8248_v51, %v11614_v27  ;;  %7700 = vmatpush3.bf16.msra.mxu1 %v8619_v40  ;;  %7812 = vmatpush3.bf16.msra.mxu0 %v8620_v56 }
 0x16f   : > { %v1100_v42 = vpop.f32.mrf.mxu1  ;;  %v8322_v57 = vpop.f32.mrf.mxu0 }
 0x170   : > { %v1101_v45 = vadd.f32 %v1100_v42, %v11615_v7  ;;  %v10090_v46 = vadd.f32 %v8282_v44, %v1109_v10 }
 0x171   : > { %v8249_v47 = vpop.f32.mrf.mxu1  ;;  %v1739_v13 = vpop.f32.mrf.mxu0 }
 0x172   : > { %v1112_v16 = vadd.f32 %v8249_v47, %v11616_v43  ;;  %v10093_v22 = vadd.f32 %v1441_v4, %v1101_v45 }
 0x173   : > { %v10095_v12 = vpop.f32.mrf.mxu1  ;;  %v8323_v51 = vpop.f32.mrf.mxu0 }
 0x174   : > { %v10097_v27 = vadd.f32 %v8283_v54, %v1112_v16 }
 0x175   : > { %v8288_v44 = vpop.f32.mrf.mxu1  ;;  %v10099_v10 = vpop.f32.mrf.mxu0 }
 0x176   : > { %v1658_v42 = vadd.f32 %v8288_v44, %v9948_v48 }
 0x177   : > { %v1529_v7 = vpop.f32.mrf.mxu1  ;;  %v8326_v47 = vpop.f32.mrf.mxu0 }
 0x178   : > { %v1656_v4 = vadd.f32 %v1529_v7, %v9950_v28  ;;  %v10103_v45 = vadd.f32 %v8322_v57, %v1658_v42  ;;  %v8621_v7 = vld [vmem:[#allocation5 + $0x58] sm:$0xff]  }
 0x179   : > { %v8289_v62 = vpop.f32.mrf.mxu1  ;;  %v1755_v30 = vpop.f32.mrf.mxu0  ;;  %7701 = vmatprep.subr.bf16.mxu1 %v8621_v7 }
 0x17a   : > { %v1659_v43 = vadd.f32 %v8289_v62, %v9953_v41  ;;  %v10106_v37 = vadd.f32 %v1739_v13, %v1656_v4 }
 0x17b   : > { %v10108_v54 = vpop.f32.mrf.mxu1  ;;  %v8327_v16 = vpop.f32.mrf.mxu0 }
 0x17c   : > { %v10110_v40 = vadd.f32 %v8323_v51, %v1659_v43  ;;  %v8623_v51 = vld [vmem:[#allocation5 + $0x18] sm:$0xff]  }
 0x17d   : > { %v8292_v56 = vpop.f32.mrf.mxu1  ;;  %v10112_v58 = vpop.f32.mrf.mxu0  ;;  %7702 = vmatpush3.bf16.msra.mxu1 %v8623_v51 }
 0x17e   : > { %v1662_v48 = vadd.f32 %v8292_v56, %v9967_v6 }
 0x17f   : > { %v1545_v44 = vpop.f32.mrf.mxu1  ;;  %v8330_v28 = vpop.f32.mrf.mxu0 }
 0x180   : > { %v1660_v57 = vadd.f32 %v1545_v44, %v9970_v23  ;;  %v10116_v42 = vadd.f32 %v8326_v47, %v1662_v48  ;;  %v8625_v23 = vld [vmem:[#allocation5 + $0x50] sm:$0xff]   ;;  %v8622_v48 = vld [vmem:[#allocation5 + $0xd8] sm:$0xff]  }
 0x181   : > { %v8293_v41 = vpop.f32.mrf.mxu1  ;;  %v1771_v13 = vpop.f32.mrf.mxu0  ;;  %v8627_v44 = vld [vmem:[#allocation5 + $0x10] sm:$0xff]   ;;  %7703 = vmatprep.subr.bf16.mxu1 %v8625_v23  ;;  %7813 = vmatprep.subr.bf16.mxu0 %v8622_v48  ;;  %v8631_v48 = vld [vmem:[#allocation5 + $0x8] sm:$0xff]  }
 0x182   : > { %v1663_v4 = vadd.f32 %v8293_v41, %v9973_v63  ;;  %v10119_v62 = vadd.f32 %v1755_v30, %v1660_v57  ;;  %v3271_v63 = vrot.slane %v8885_v53, 1  ;;  %7704 = vmatpush3.bf16.msra.mxu1 %v8627_v44 }
 0x183   : > { %v10121_v43 = vpop.f32.mrf.mxu1  ;;  %v8331_v2 = vpop.f32.mrf.mxu0  ;;  %7705 = vmatprep.subr.bf16.mxu1 %v8629_v29 }
 0x184   : > { %11617 = vst [vmem:[#allocation28_spill] sm:$0xff] %v10119_v62  ;;  %v10123_v36 = vadd.f32 %v8327_v16, %v1663_v4  ;;  %v8624_v16 = vld [vmem:[#allocation5 + $0x98] sm:$0xff]   ;;  %v7258_v8 = vpack.c.bf16 %v3271_v63, %v3271_v63 }
 0x185   : > { %v8296_v6 = vpop.f32.mrf.mxu1  ;;  %v10125_v56 = vpop.f32.mrf.mxu0  ;;  %7814 = vmatpush3.bf16.msra.mxu0 %v8624_v16  ;;  %v8634_v16 = vld [vmem:[#allocation5] sm:$0xff]  }
 0x186   : > { %11618 = vst [vmem:[#allocation29_spill] sm:$0xff] %v10123_v36  ;;  %v1666_v47 = vadd.f32 %v8296_v6, %v9987_v25  ;;  %3511 = vst [vmem:[#allocation4 + $0x4] sm:$0xf] %v7258_v8  ;;  %7706 = vmatpush3.bf16.msra.mxu1 %v8631_v48 }
 0x187   : > { %v1561_v30 = vpop.f32.mrf.mxu1  ;;  %v8334_v57 = vpop.f32.mrf.mxu0  ;;  %3512 = vst [vmem:[#allocation4 + $0x28] sm:$0xf] %v7258_v8 }
 0x188   : > { %v1664_v7 = vadd.f32 %v1561_v30, %v9990_v59  ;;  %v10129_v41 = vadd.f32 %v8330_v28, %v1666_v47  ;;  %v8626_v59 = vld [vmem:[#allocation5 + $0xd0] sm:$0xff]  }
 0x189   : > { %v8297_v4 = vpop.f32.mrf.mxu1  ;;  %v1787_v51 = vpop.f32.mrf.mxu0  ;;  %v8628_v47 = vld [vmem:[#allocation5 + $0x90] sm:$0xff]   ;;  %7815 = vmatprep.subr.bf16.mxu0 %v8626_v59 }
 0x18a   : > { %11619 = vst [vmem:[#allocation30_spill] sm:$0xff] %v10129_v41  ;;  %v1667_v25 = vadd.f32 %v8297_v4, %v9993_v38  ;;  %v10132_v6 = vadd.f32 %v1771_v13, %v1664_v7  ;;  %7816 = vmatpush3.bf16.msra.mxu0 %v8628_v47  ;;  %v7290_v13 = vpack.c.bf16 %v3543_v20, %v3543_v20  ;;  %v8633_v7 = vld [vmem:[#allocation5 + $0x40] sm:$0xff]   ;;  %v8632_v20 = vld [vmem:[#allocation5 + $0x88] sm:$0xff]  }
 0x18b   : > { %v10134_v24 = vpop.f32.mrf.mxu1  ;;  %v8335_v23 = vpop.f32.mrf.mxu0  ;;  %7707 = vmatprep.subr.bf16.mxu1 %v8633_v7 }
 0x18c   : > { %11620 = vst [vmem:[#allocation25_spill] sm:$0xff] %v10132_v6  ;;  %v10136_v28 = vadd.f32 %v8331_v2, %v1667_v25  ;;  %v8630_v2 = vld [vmem:[#allocation5 + $0xc8] sm:$0xff]   ;;  %3783 = vst [vmem:[#allocation4 + $0x8] sm:$0xf] %v7290_v13  ;;  %7708 = vmatpush3.bf16.msra.mxu1 %v8634_v16 }
 0x18d   : > { %v8300_v53 = vpop.f32.mrf.mxu1  ;;  %v10138_v44 = vpop.f32.mrf.mxu0  ;;  %3784 = vst [vmem:[#allocation4 + $0x2c] sm:$0xf] %v7290_v13  ;;  %7817 = vmatprep.subr.bf16.mxu0 %v8630_v2  ;;  %v8635_v13 = vld [vmem:[#allocation5 + $0xc0] sm:$0xff]  }
 0x18e   : > { %11621 = vst [vmem:[#allocation23_spill] sm:$0xff] %v10136_v28  ;;  %v1670_v38 = vadd.f32 %v8300_v53, %v10007_v32  ;;  %7818 = vmatpush3.bf16.msra.mxu0 %v8632_v20 }
 0x18f   : > { %v1577_v63 = vpop.f32.mrf.mxu1  ;;  %v8338_v30 = vpop.f32.mrf.mxu0  ;;  %7819 = vmatprep.subr.bf16.mxu0 %v8635_v13 }
 0x190   : > { %v1668_v19 = vadd.f32 %v1577_v63, %v10010_v49  ;;  %v10142_v8 = vadd.f32 %v8334_v57, %v1670_v38  ;;  %v8637_v49 = vld [vmem:[#allocation4] ss:$36 sps:$4 sm:$0xff]  }
 0x191   : > { %v8301_v29 = vpop.f32.mrf.mxu1  ;;  %v1803_v4 = vpop.f32.mrf.mxu0  ;;  %v8639_v57 = vld [vmem:[#allocation4 + $0x4] ss:$36 sps:$4 sm:$0xff]  }
 0x192   : > { %11622 = vst [vmem:[#allocation32_spill] sm:$0xff] %v10142_v8  ;;  %v1671_v25 = vadd.f32 %v8301_v29, %v10013_v11  ;;  %v10145_v32 = vadd.f32 %v1787_v51, %v1668_v19  ;;  %5456 = vmatprep.mubr.bf16.mxu1 %v8639_v57  ;;  %v8636_v51 = vld [vmem:[#allocation5 + $0x80] sm:$0xff]  }
 0x193   : > { %v10147_v59 = vpop.f32.mrf.mxu1  ;;  %v8339_v47 = vpop.f32.mrf.mxu0  ;;  %5457 = vmatmul.mubr.bf16.vlgmr.msra.gmra.mxu1 %v8637_v49  ;;  %7820 = vmatpush3.bf16.msra.mxu0 %v8636_v51 }
 0x194   : > { %11623 = vst [vmem:[#allocation33_spill] sm:$0xff] %v10145_v32  ;;  %v10149_v48 = vadd.f32 %v8335_v23, %v1671_v25 }
 0x195   : > { %v8304_v53 = vpop.f32.mrf.mxu1  ;;  %v10151_v38 = vpop.f32.mrf.mxu0 }
 0x196   : > { %v1674_v11 = vadd.f32 %v8304_v53, %v10029_v18 }
 0x197   : > { %v1593_v63 = vpop.f32.mrf.mxu1  ;;  %v8342_v7 = vpop.f32.mrf.mxu0 }
 0x198   : > { %v1672_v19 = vadd.f32 %v1593_v63, %v10032_v15  ;;  %v10155_v2 = vadd.f32 %v8338_v30, %v1674_v11 }
 0x199   : > { %v8305_v23 = vpop.f32.mrf.mxu1  ;;  %v1819_v16 = vpop.f32.mrf.mxu0 }
 0x19a   : > { %11624 = vst [vmem:[#allocation34_spill] sm:$0xff] %v10155_v2  ;;  %v1675_v29 = vadd.f32 %v8305_v23, %v10039_v17  ;;  %v10158_v25 = vadd.f32 %v1803_v4, %v1672_v19  ;;  %v8644_v2 = vld [vmem:[#allocation5 + $0x1f8] sm:$0xff]  }
 0x19b   : > { %v10160_v20 = vpop.f32.mrf.mxu1  ;;  %v8343_v57 = vpop.f32.mrf.mxu0  ;;  %8029 = vmatprep.subr.bf16.mxu0 %v8644_v2 }
 0x19c   : > { %11625 = vst [vmem:[#allocation36_spill] sm:$0xff] %v10158_v25  ;;  %v10162_v18 = vadd.f32 %v8339_v47, %v1675_v29 }
 0x19d   : > { %v8308_v49 = vpop.f32.mrf.mxu1  ;;  %v10164_v53 = vpop.f32.mrf.mxu0 }
 0x19e   : > { %v1678_v13 = vadd.f32 %v8308_v49, %v10055_v60 }
 0x19f   : > { %v1609_v15 = vpop.f32.mrf.mxu1  ;;  %v8346_v30 = vpop.f32.mrf.mxu0 }
 0x1a0   : > { %v1676_v11 = vadd.f32 %v1609_v15, %v10058_v55  ;;  %v10168_v51 = vadd.f32 %v8342_v7, %v1678_v13 }
 0x1a1   : > { %v8309_v63 = vpop.f32.mrf.mxu1  ;;  %v1835_v17 = vpop.f32.mrf.mxu0 }
 0x1a2   : > { %v1679_v4 = vadd.f32 %v8309_v63, %v10062_v26  ;;  %v10171_v19 = vadd.f32 %v1819_v16, %v1676_v11 }
 0x1a3   : > { %v10173_v23 = vpop.f32.mrf.mxu1  ;;  %v8347_v47 = vpop.f32.mrf.mxu0 }
 0x1a4   : > { %v10175_v29 = vadd.f32 %v8343_v57, %v1679_v4  ;;  %v8643_v4 = vld [vmem:[#allocation5 + $0x178] sm:$0xff]  }
 0x1a5   : > { %v8312_v61 = vpop.f32.mrf.mxu1  ;;  %v10177_v25 = vpop.f32.mrf.mxu0  ;;  %7917 = vmatprep.subr.bf16.mxu1 %v8643_v4 }
 0x1a6   : > { %11626 = vst [vmem:[#allocation37_spill] sm:$0xff] %v10177_v25  ;;  %v1682_v60 = vadd.f32 %v8312_v61, %v10073_v14  ;;  %v8645_v61 = vld [vmem:[#allocation5 + $0x138] sm:$0xff]  }
 0x1a7   : > { %v1625_v49 = vpop.f32.mrf.mxu1  ;;  %v8350_v55 = vpop.f32.mrf.mxu0  ;;  %7918 = vmatpush3.bf16.msra.mxu1 %v8645_v61 }
 0x1a8   : > { %v1680_v7 = vadd.f32 %v1625_v49, %v10076_v0  ;;  %v10181_v13 = vadd.f32 %v8346_v30, %v1682_v60 }
 0x1a9   : > { %v8313_v15 = vpop.f32.mrf.mxu1  ;;  %v1851_v26 = vpop.f32.mrf.mxu0 }
 0x1aa   : > { %v1683_v16 = vadd.f32 %v8313_v15, %v10080_v39  ;;  %v10184_v11 = vadd.f32 %v1835_v17, %v1680_v7 }
 0x1ab   : > { %v10186_v63 = vpop.f32.mrf.mxu1  ;;  %v8351_v57 = vpop.f32.mrf.mxu0 }
 0x1ac   : > { %v10188_v32 = vadd.f32 %v8347_v47, %v1683_v16 }
 0x1ad   : > { %v8316_v14 = vpop.f32.mrf.mxu1  ;;  %v10190_v8 = vpop.f32.mrf.mxu0 }
 0x1ae   : > { %11627 = vst [vmem:[#allocation38_spill] sm:$0xff] %v10190_v8  ;;  %v1686_v0 = vadd.f32 %v8316_v14, %v10090_v46  ;;  %v8664_v8 = vld [vmem:[#allocation5 + $0x130] sm:$0xff]  }
 0x1af   : > { %v1641_v30 = vpop.f32.mrf.mxu1  ;;  %v10193_v39 = vpop.f32.mrf.mxu0 }
 0x1b0   : > { %v1684_v17 = vadd.f32 %v1641_v30, %v10093_v22  ;;  %v10196_v60 = vadd.f32 %v8350_v55, %v1686_v0 }
 0x1b1   : > { %v8317_v49 = vpop.f32.mrf.mxu1  ;;  %v10198_v7 = vpop.f32.mrf.mxu0 }
 0x1b2   : > { %v1687_v47 = vadd.f32 %v8317_v49, %v10097_v27  ;;  %v10201_v15 = vadd.f32 %v1851_v26, %v1684_v17 }
 0x1b3   : > { %v10203_v16 = vpop.f32.mrf.mxu1  ;;  %v10205_v2 = vpop.f32.mrf.mxu0 }
 0x1b4   : > { %11628 = vst [vmem:[#allocation39_spill] sm:$0xff] %v10205_v2  ;;  %v10207_v46 = vadd.f32 %v8351_v57, %v1687_v47  ;;  %v8662_v47 = vld [vmem:[#allocation5 + $0x170] sm:$0xff]  }
 0x1b5   : > { %v10209_v4 = vpop.f32.mrf.mxu1  ;;  %v10211_v61 = vpop.f32.mrf.mxu0  ;;  %7919 = vmatprep.subr.bf16.mxu1 %v8662_v47 }
 0x1b6   : > { %11629 = vst [vmem:[#allocation40_spill] sm:$0xff] %v10211_v61  ;;  %7920 = vmatpush3.bf16.msra.mxu1 %v8664_v8 }
 0x1b7   : > { %v10213_v22 = vpop.f32.mrf.mxu1  ;;  %v10215_v55 = vpop.f32.mrf.mxu0 }
 0x1b8   : > { %11630 = vst [vmem:[#allocation41_spill] sm:$0xff] %v10215_v55 }
 0x1b9   : > { %v10217_v14 = vpop.f32.mrf.mxu1  ;;  %v10219_v0 = vpop.f32.mrf.mxu0 }
 0x1ba   : > { %11631 = vst [vmem:[#allocation42_spill] sm:$0xff] %v10219_v0 }
 0x1bb   : > { %v10221_v27 = vpop.f32.mrf.mxu1  ;;  %v10223_v26 = vpop.f32.mrf.mxu0 }
 0x1bc   : > { %11632 = vst [vmem:[#allocation43_spill] sm:$0xff] %v10223_v26 }
 0x1bd   : > { %v10225_v30 = vpop.f32.mrf.mxu1  ;;  %v10227_v57 = vpop.f32.mrf.mxu0 }
 0x1be   : > { %11633 = vst [vmem:[#allocation44_spill] sm:$0xff] %v10227_v57 }
 0x1bf   : > { %v10229_v17 = vpop.f32.mrf.mxu1  ;;  %v10231_v49 = vpop.f32.mrf.mxu0 }
 0x1c0   : > { %11634 = vst [vmem:[#allocation45_spill] sm:$0xff] %v10229_v17  ;;  %11635 = vst [vmem:[#allocation46_spill] sm:$0xff] %v10231_v49 }
 0x1c1   : > { %v10233_v61 = vpop.f32.mrf.mxu1  ;;  %v10235_v55 = vpop.f32.mrf.mxu0 }
 0x1c2   : > { %11636 = vst [vmem:[#allocation47_spill] sm:$0xff] %v10233_v61  ;;  %11637 = vst [vmem:[#allocation48_spill] sm:$0xff] %v10235_v55  ;;  %v8680_v61 = vld [vmem:[#allocation5 + $0x128] sm:$0xff]  }
 0x1c3   : > { %v10237_v0 = vpop.f32.mrf.mxu1  ;;  %v10239_v28 = vpop.f32.mrf.mxu0 }
 0x1c4   : > { %11638 = vst [vmem:[#allocation49_spill] sm:$0xff] %v10237_v0  ;;  %11639 = vst [vmem:[#allocation50_spill] sm:$0xff] %v10239_v28 }
 0x1c5   : > { %v10241_v26 = vpop.f32.mrf.mxu1  ;;  %v10243_v6 = vpop.f32.mrf.mxu0 }
 0x1c6   : > { %11640 = vst [vmem:[#allocation51_spill] sm:$0xff] %v10241_v26  ;;  %11641 = vst [vmem:[#allocation52_spill] sm:$0xff] %v10243_v6 }
 0x1c7   : > { %v10245_v57 = vpop.f32.mrf.mxu1  ;;  %v10247_v41 = vpop.f32.mrf.mxu0 }
 0x1c8   : > { %11642 = vst [vmem:[#allocation53_spill] sm:$0xff] %v10245_v57  ;;  %11643 = vst [vmem:[#allocation54_spill] sm:$0xff] %v10247_v41 }
 0x1c9   : > { %v10249_v49 = vpop.f32.mrf.mxu1  ;;  %v10251_v2 = vpop.f32.mrf.mxu0 }
 0x1ca   : > { %11644 = vst [vmem:[#allocation55_spill] sm:$0xff] %v10249_v49  ;;  %11645 = vst [vmem:[#allocation56_spill] sm:$0xff] %v10251_v2  ;;  %v8678_v2 = vld [vmem:[#allocation5 + $0x168] sm:$0xff]  }
 0x1cb   : > { %v10253_v55 = vpop.f32.mrf.mxu1  ;;  %v8403_v47 = vpop.f32.mrf.mxu0  ;;  %7921 = vmatprep.subr.bf16.mxu1 %v8678_v2 }
 0x1cc   : > { %11646 = vst [vmem:[#allocation57_spill] sm:$0xff] %v10253_v55  ;;  %7922 = vmatpush3.bf16.msra.mxu1 %v8680_v61 }
 0x1cd   : > { %v10255_v25 = vpop.f32.mrf.mxu1  ;;  %v10257_v0 = vpop.f32.mrf.mxu0 }
 0x1ce   : > { %11647 = vst [vmem:[#allocation58_spill] sm:$0xff] %v10255_v25  ;;  %11648 = vst [vmem:[#allocation59_spill] sm:$0xff] %v10257_v0 }
 0x1cf   : > { %v10259_v8 = vpop.f32.mrf.mxu1  ;;  %v10261_v28 = vpop.f32.mrf.mxu0 }
 0x1d0   : > { %11649 = vst [vmem:[#allocation60_spill] sm:$0xff] %v10259_v8  ;;  %11650 = vst [vmem:[#allocation61_spill] sm:$0xff] %v10261_v28  ;;  %v8694_v8 = vld [vmem:[#allocation5 + $0x160] sm:$0xff]  }
 0x1d1   : > { %v8369_v6 = vpop.f32.mrf.mxu1  ;;  %v10263_v26 = vpop.f32.mrf.mxu0  ;;  %7923 = vmatprep.subr.bf16.mxu1 %v8694_v8 }
 0x1d2   : > { %11651 = vst [vmem:[#allocation62_spill] sm:$0xff] %v10263_v26  ;;  %v2088_v41 = vadd.f32 %v8369_v6, %v10149_v48 }
 0x1d3   : > { %v10266_v57 = vpop.f32.mrf.mxu1  ;;  %v8407_v49 = vpop.f32.mrf.mxu0 }
 0x1d4   : > { %11652 = vst [vmem:[#allocation63_spill] sm:$0xff] %v10266_v57  ;;  %v10268_v55 = vadd.f32 %v8403_v47, %v2088_v41  ;;  %v8696_v47 = vld [vmem:[#allocation5 + $0x120] sm:$0xff]  }
 0x1d5   : > { %v10270_v36 = vpop.f32.mrf.mxu1  ;;  %v10272_v25 = vpop.f32.mrf.mxu0  ;;  %7924 = vmatpush3.bf16.msra.mxu1 %v8696_v47 }
 0x1d6   : > { %11653 = vst [vmem:[#allocation64_spill] sm:$0xff] %v10268_v55  ;;  %11654 = vst [vmem:[#allocation65_spill] sm:$0xff] %v10270_v36 }
 0x1d7   : > { %11655 = vst [vmem:[#allocation66_spill] sm:$0xff] %v10272_v25  ;;  %v10274_v0 = vpop.f32.mrf.mxu1  ;;  %v8410_v28 = vpop.f32.mrf.mxu0 }
 0x1d8   : > { %11656 = vst [vmem:[#allocation67_spill] sm:$0xff] %v10274_v0 }
 0x1d9   : > { %v8373_v26 = vpop.f32.mrf.mxu1  ;;  %v2226_v17 = vpop.f32.mrf.mxu0 }
 0x1da   : > { %v2092_v6 = vadd.f32 %v8373_v26, %v10162_v18 }
 0x1db   : > { %v10277_v48 = vpop.f32.mrf.mxu1  ;;  %v8411_v57 = vpop.f32.mrf.mxu0 }
 0x1dc   : > { %11657 = vst [vmem:[#allocation68_spill] sm:$0xff] %v10277_v48  ;;  %v10279_v41 = vadd.f32 %v8407_v49, %v2092_v6 }
 0x1dd   : > { %v8376_v55 = vpop.f32.mrf.mxu1  ;;  %v10281_v36 = vpop.f32.mrf.mxu0 }
 0x1de   : > { %11658 = vst [vmem:[#allocation69_spill] sm:$0xff] %v10279_v41  ;;  %11659 = vst [vmem:[#allocation70_spill] sm:$0xff] %v10281_v36  ;;  %v2095_v2 = vadd.f32 %v8376_v55, %v10168_v51 }
 0x1df   : > { %v2026_v61 = vpop.f32.mrf.mxu1  ;;  %v8414_v25 = vpop.f32.mrf.mxu0 }
 0x1e0   : > { %v2093_v0 = vadd.f32 %v2026_v61, %v10171_v19  ;;  %v10285_v62 = vadd.f32 %v8410_v28, %v2095_v2  ;;  %v8710_v61 = vld [vmem:[#allocation5 + $0x158] sm:$0xff]  }
 0x1e1   : > { %v8377_v18 = vpop.f32.mrf.mxu1  ;;  %v2242_v26 = vpop.f32.mrf.mxu0  ;;  %7925 = vmatprep.subr.bf16.mxu1 %v8710_v61  ;;  %v1657_v61 = vadd.f32 %v10108_v54, %v9960_v9  ;;  %v1669_v9 = vadd.f32 %v10147_v59, %v10022_v3 }
 0x1e2   : > { %v2096_v8 = vadd.f32 %v8377_v18, %v10175_v29  ;;  %v10288_v48 = vadd.f32 %v2226_v17, %v2093_v0 }
 0x1e3   : > { %v10290_v49 = vpop.f32.mrf.mxu1  ;;  %v8415_v6 = vpop.f32.mrf.mxu0 }
 0x1e4   : > { %11660 = vst [vmem:[#allocation71_spill] sm:$0xff] %v10288_v48  ;;  %v10292_v41 = vadd.f32 %v8411_v57, %v2096_v8  ;;  %v11663_v57 = vld [vmem:[#allocation26_spill] sm:$0xff] }
 0x1e5   : > { %v8380_v36 = vpop.f32.mrf.mxu1  ;;  %v10294_v51 = vpop.f32.mrf.mxu0  ;;  %v1056_v8 = vadd.f32 %v10034_v31, %v11663_v57  ;;  %v2075_v57 = vadd.f32 %v10209_v4, %v10103_v45  ;;  %v2073_v45 = vadd.f32 %v10213_v22, %v10106_v37 }
 0x1e6   : > { %11661 = vst [vmem:[#allocation72_spill] sm:$0xff] %v10292_v41  ;;  %v2099_v55 = vadd.f32 %v8380_v36, %v10181_v13  ;;  %v11664_v13 = vld [vmem:[#allocation27_spill] sm:$0xff] }
 0x1e7   : > { %v2042_v47 = vpop.f32.mrf.mxu1  ;;  %v8418_v19 = vpop.f32.mrf.mxu0  ;;  %v1072_v48 = vadd.f32 %v10060_v52, %v11664_v13  ;;  %v1661_v52 = vadd.f32 %v10121_v43, %v9980_v21  ;;  %v2275_v37 = vadd.f32 %v10193_v39, %v2075_v57  ;;  %v2273_v39 = vadd.f32 %v10198_v7, %v2073_v45 }
 0x1e8   : > { %v2097_v28 = vadd.f32 %v2042_v47, %v10184_v11  ;;  %v10298_v2 = vadd.f32 %v8414_v25, %v2099_v55  ;;  %v8712_v25 = vld [vmem:[#allocation5 + $0x118] sm:$0xff]  }
 0x1e9   : > { %v8381_v29 = vpop.f32.mrf.mxu1  ;;  %v2258_v0 = vpop.f32.mrf.mxu0  ;;  %v11665_v55 = vld [vmem:[#allocation31_spill] sm:$0xff]  ;;  %7926 = vmatpush3.bf16.msra.mxu1 %v8712_v25  ;;  %v1871_v3 = vadd.f32 %v10112_v58, %v1661_v52 }
 0x1ea   : > { %11662 = vst [vmem:[#allocation73_spill] sm:$0xff] %v10298_v2  ;;  %v2100_v17 = vadd.f32 %v8381_v29, %v10188_v32  ;;  %v10301_v18 = vadd.f32 %v2242_v26, %v2097_v28  ;;  %v1088_v47 = vadd.f32 %v10078_v35, %v11665_v55  ;;  %v11666_v28 = vld [vmem:[#allocation35_spill] sm:$0xff]  ;;  %v1477_v35 = vadd.f32 %v10043_v34, %v1072_v48 }
 0x1eb   : > { %v10305_v41 = vpop.f32.mrf.mxu1  ;;  %v8419_v36 = vpop.f32.mrf.mxu0  ;;  %v1104_v31 = vadd.f32 %v10095_v12, %v11666_v28  ;;  %v1665_v12 = vadd.f32 %v10134_v24, %v10000_v5  ;;  %v1867_v5 = vadd.f32 %v10099_v10, %v1657_v61  ;;  %v1879_v10 = vadd.f32 %v10138_v44, %v1669_v9  ;;  %v11670_v44 = vld [vmem:[#allocation47_spill] sm:$0xff]  ;;  %v11674_v61 = vld [vmem:[#allocation30_spill] sm:$0xff] }
 0x1ec   : > { %v10309_v11 = vadd.f32 %v8415_v6, %v2100_v17  ;;  %v1473_v6 = vadd.f32 %v10017_v50, %v1056_v8  ;;  %v1481_v50 = vadd.f32 %v10066_v1, %v1088_v47  ;;  %v1677_v34 = vadd.f32 %v10173_v23, %v1477_v35  ;;  %v11668_v8 = vld [vmem:[#allocation45_spill] sm:$0xff]  ;;  %v11675_v52 = vld [vmem:[#allocation51_spill] sm:$0xff] }
 0x1ed   : > { %v8384_v2 = vpop.f32.mrf.mxu1  ;;  %v10313_v32 = vpop.f32.mrf.mxu0  ;;  %v1485_v24 = vadd.f32 %v10086_v33, %v1104_v31  ;;  %v2076_v23 = vadd.f32 %v10217_v14, %v10110_v40  ;;  %v1875_v33 = vadd.f32 %v10125_v56, %v1665_v12  ;;  %v2079_v14 = vadd.f32 %v10225_v30, %v10116_v42  ;;  %v11672_v47 = vld [vmem:[#allocation37_spill] sm:$0xff]  ;;  %v11673_v42 = vld [vmem:[#allocation39_spill] sm:$0xff]  ;;  %v8726_v31 = vld [vmem:[#allocation5 + $0x150] sm:$0xff]  }
 0x1ee   : > { %v2103_v26 = vadd.f32 %v8384_v2, %v10196_v60  ;;  %v1673_v21 = vadd.f32 %v10160_v20, %v1473_v6  ;;  %v1681_v20 = vadd.f32 %v10186_v63, %v1481_v50  ;;  %v2074_v63 = vadd.f32 %v10221_v27, %v1867_v5  ;;  %v10371_v27 = vld [vmem:[%s11501_s2] ss:$0 sm:$0xff]  ;;  %v11677_v35 = vld [vmem:[#allocation53_spill] sm:$0xff]  ;;  %v11679_v12 = vld [vmem:[#allocation55_spill] sm:$0xff]  ;;  %7927 = vmatprep.subr.bf16.mxu1 %v8726_v31 }
 0x1ef   : > { %v2058_v29 = vpop.f32.mrf.mxu1  ;;  %v8458_v17 = vpop.f32.mrf.mxu0  ;;  %v2276_v30 = vadd.f32 %v11673_v42, %v2076_v23  ;;  %v2083_v6 = vadd.f32 %v11675_v52, %v11674_v61 }
 0x1f0   : > { %v2101_v60 = vadd.f32 %v2058_v29, %v10201_v15  ;;  %v10327_v2 = vadd.f32 %v8418_v19, %v2103_v26  ;;  %v10356_v58 = vadd.f32 %v10151_v38, %v1673_v21  ;;  %v11671_v38 = vld [vmem:[#allocation49_spill] sm:$0xff]  ;;  %v1891_v7 = vadd.f32 %v11672_v47, %v1681_v20  ;;  %v11680_v21 = vld [vmem:[#allocation38_spill] sm:$0xff] }
 0x1f1   : > { %v8385_v54 = vpop.f32.mrf.mxu1  ;;  %v2563_v43 = vpop.f32.mrf.mxu0  ;;  %v2078_v25 = vadd.f32 %v11671_v38, %v1871_v3  ;;  %v11676_v29 = vld [vmem:[#allocation25_spill] sm:$0xff] }
 0x1f2   : > { %v2104_v15 = vadd.f32 %v8385_v54, %v10207_v46  ;;  %v10339_v4 = vadd.f32 %v2258_v0, %v2101_v60  ;;  %v1685_v46 = vadd.f32 %v10203_v16, %v1485_v24  ;;  %v1887_v0 = vadd.f32 %v10164_v53, %v1677_v34  ;;  %v11667_v16 = vld [vmem:[#allocation28_spill] sm:$0xff]  ;;  %v11678_v60 = vld [vmem:[#allocation23_spill] sm:$0xff]  ;;  %v11682_v20 = vld [vmem:[#allocation41_spill] sm:$0xff] }
 0x1f3   : > { %v10344_v59 = vpop.f32.mrf.mxu1  ;;  %v8459_v1 = vpop.f32.mrf.mxu0  ;;  %v2077_v56 = vadd.f32 %v11668_v8, %v11667_v16  ;;  %v2081_v57 = vadd.f32 %v11677_v35, %v11676_v29  ;;  %v2084_v9 = vadd.f32 %v11679_v12, %v11678_v60  ;;  %v11681_v24 = vld [vmem:[#allocation40_spill] sm:$0xff]  ;;  %v2279_v23 = vadd.f32 %v11682_v20, %v2079_v14  ;;  %v11686_v47 = vld [vmem:[#allocation57_spill] sm:$0xff]  ;;  %v11691_v35 = vld [vmem:[#allocation58_spill] sm:$0xff] }
 0x1f4   : > { %v10350_v22 = vadd.f32 %v8419_v36, %v2104_v15  ;;  %v11669_v36 = vld [vmem:[#allocation29_spill] sm:$0xff]  ;;  %v1895_v50 = vadd.f32 %v11680_v21, %v1685_v46  ;;  %v2274_v5 = vadd.f32 %v11681_v24, %v2074_v63  ;;  %v11685_v16 = vld [vmem:[#allocation44_spill] sm:$0xff]  ;;  %v11694_v21 = vld [vmem:[#allocation63_spill] sm:$0xff] }
 0x1f5   : > { %v8424_v48 = vpop.f32.mrf.mxu1  ;;  %v2566_v19 = vpop.f32.mrf.mxu0  ;;  %v2080_v13 = vadd.f32 %v11670_v44, %v11669_v36  ;;  %v2278_v8 = vadd.f32 %v11685_v16, %v2078_v25  ;;  %v11688_v14 = vld [vmem:[#allocation48_spill] sm:$0xff]  ;;  %v11692_v60 = vld [vmem:[#allocation33_spill] sm:$0xff] }
 0x1f6   : > { %v2485_v40 = vadd.f32 %v8424_v48, %v2275_v37  ;;  %v11683_v37 = vld [vmem:[#allocation42_spill] sm:$0xff]  ;;  %v10392_v31 = vadd.f32 %v11688_v14, %v2081_v57  ;;  %v11690_v29 = vld [vmem:[#allocation32_spill] sm:$0xff] }
 0x1f7   : > { %v2356_v53 = vpop.f32.mrf.mxu1  ;;  %v8462_v55 = vpop.f32.mrf.mxu0  ;;  %v2277_v48 = vadd.f32 %v11683_v37, %v2077_v56  ;;  %v11689_v56 = vld [vmem:[#allocation50_spill] sm:$0xff]  ;;  %v11693_v12 = vld [vmem:[#allocation60_spill] sm:$0xff] }
 0x1f8   : > { %v2692_v26 = vadd.f32 %v8458_v17, %v2485_v40  ;;  %v2483_v28 = vadd.f32 %v2356_v53, %v2273_v39  ;;  %v11684_v40 = vld [vmem:[#allocation43_spill] sm:$0xff]  ;;  %v11695_v57 = vld [vmem:[#allocation34_spill] sm:$0xff]  ;;  %v11697_v20 = vld [vmem:[#allocation36_spill] sm:$0xff] }
 0x1f9   : > { %v8425_v54 = vpop.f32.mrf.mxu1  ;;  %v2579_v34 = vpop.f32.mrf.mxu0  ;;  %v2280_v39 = vadd.f32 %v11684_v40, %v2080_v13  ;;  %v10395_v13 = vadd.f32 %v11689_v56, %v2084_v9  ;;  %v11699_v40 = vld [vmem:[#allocation68_spill] sm:$0xff] }
 0x1fa   : > { %v2731_v45 = vadd.f32 %v10371_v27, %v2692_v26  ;;  %v2690_v17 = vadd.f32 %v2563_v43, %v2483_v28  ;;  %v2486_v15 = vadd.f32 %v8425_v54, %v2276_v30  ;;  %v8728_v43 = vld [vmem:[#allocation5 + $0x110] sm:$0xff]   ;;  %v2082_v26 = vadd.f32 %v11686_v47, %v1875_v33 }
 0x1fb   : > { %v2359_v3 = vpop.f32.mrf.mxu1  ;;  %v8463_v36 = vpop.f32.mrf.mxu0  ;;  %v11687_v28 = vld [vmem:[#allocation46_spill] sm:$0xff]  ;;  %7928 = vmatpush3.bf16.msra.mxu1 %v8728_v43  ;;  %v2087_v33 = vadd.f32 %v11691_v35, %v11690_v29  ;;  %v2086_v54 = vadd.f32 %v11694_v21, %v1879_v10  ;;  %v2090_v16 = vadd.f32 %v11699_v40, %v10356_v58  ;;  %v2098_v10 = vadd.f32 %v10305_v41, %v1891_v7  ;;  %v11702_v41 = vld [vmem:[#allocation56_spill] sm:$0xff] }
 0x1fc   : > { %v2763_v46 = vmax.f32 %v2731_v45, 0.0  ;;  %v2729_v44 = vadd.f32 %v10371_v27, %v2690_v17  ;;  %v2693_v38 = vadd.f32 %v8459_v1, %v2486_v15  ;;  %v2484_v53 = vadd.f32 %v2359_v3, %v2274_v5  ;;  %v11696_v45 = vld [vmem:[#allocation65_spill] sm:$0xff]  ;;  %v11705_v35 = vld [vmem:[#allocation62_spill] sm:$0xff] }
 0x1fd   : > { %v8428_v63 = vpop.f32.mrf.mxu1  ;;  %v2283_v42 = vadd.f32 %v11687_v28, %v2083_v6  ;;  %v2582_v30 = vpop.f32.mrf.mxu0  ;;  %v2085_v6 = vadd.f32 %v11693_v12, %v11692_v60  ;;  %v2091_v17 = vadd.f32 %v11696_v45, %v11695_v57  ;;  %v11700_v28 = vld [vmem:[#allocation52_spill] sm:$0xff]  ;;  %v11706_v60 = vld [vmem:[#allocation66_spill] sm:$0xff] }
 0x1fe   : > { %2835 = vst [vmem:[#allocation3 + $0x31] sm:$0xff] %v2763_v46  ;;  %v2761_v25 = vmax.f32 %v2729_v44, 0.0  ;;  %v2732_v61 = vadd.f32 %v10371_v27, %v2693_v38  ;;  %v2691_v52 = vadd.f32 %v2566_v19, %v2484_v53  ;;  %v2489_v1 = vadd.f32 %v8428_v63, %v2279_v23  ;;  %v11698_v23 = vld [vmem:[#allocation67_spill] sm:$0xff] }
 0x1ff   : > { %v2372_v9 = vpop.f32.mrf.mxu1  ;;  %v8466_v15 = vpop.f32.mrf.mxu0  ;;  %v2089_v37 = vadd.f32 %v11698_v23, %v11697_v20  ;;  %v2094_v46 = vadd.f32 %v10290_v49, %v1887_v0  ;;  %v10417_v14 = vadd.f32 %v11700_v28, %v2082_v26  ;;  %v11701_v49 = vld [vmem:[#allocation54_spill] sm:$0xff]  ;;  %v10425_v7 = vadd.f32 %v11702_v41, %v2085_v6  ;;  %v11703_v26 = vld [vmem:[#allocation59_spill] sm:$0xff] }
 0x200   : > { %2833 = vst [vmem:[#allocation3 + $0x19] sm:$0xff] %v2761_v25  ;;  %v2764_v24 = vmax.f32 %v2732_v61, 0.0  ;;  %v2730_v5 = vadd.f32 %v10371_v27, %v2691_v52  ;;  %v2487_v19 = vadd.f32 %v2372_v9, %v2277_v48  ;;  %v2696_v3 = vadd.f32 %v8462_v55, %v2489_v1  ;;  %v11704_v1 = vld [vmem:[#allocation61_spill] sm:$0xff]  ;;  %v11707_v6 = vld [vmem:[#allocation70_spill] sm:$0xff] }
 0x201   : > { %v8429_v44 = vpop.f32.mrf.mxu1  ;;  %v10412_v38 = vpop.f32.mrf.mxu0  ;;  %v2102_v55 = vadd.f32 %v10344_v59, %v1895_v50  ;;  %v10422_v0 = vadd.f32 %v11701_v49, %v2087_v33  ;;  %v10433_v52 = vadd.f32 %v11703_v26, %v2086_v54  ;;  %v10436_v29 = vadd.f32 %v11704_v1, %v2091_v17  ;;  %v8744_v26 = vld [vmem:[#allocation5 + $0x108] sm:$0xff]  }
 0x202   : > { %2836 = vst [vmem:[#allocation3 + $0x39] sm:$0xff] %v2764_v24  ;;  %v2762_v53 = vmax.f32 %v2730_v5, 0.0  ;;  %v2735_v43 = vadd.f32 %v10371_v27, %v2696_v3  ;;  %v2490_v47 = vadd.f32 %v8429_v44, %v2280_v39  ;;  %v2694_v48 = vadd.f32 %v2579_v34, %v2487_v19 }
 0x203   : > { %v2375_v63 = vpop.f32.mrf.mxu1  ;;  %v10419_v58 = vpop.f32.mrf.mxu0  ;;  %v10439_v33 = vadd.f32 %v11705_v35, %v2089_v37  ;;  %v10442_v12 = vadd.f32 %v11706_v60, %v2090_v16  ;;  %v10447_v21 = vadd.f32 %v11707_v6, %v2094_v46  ;;  %v10450_v54 = vadd.f32 %v10294_v51, %v2098_v10 }
 0x204   : > { %2834 = vst [vmem:[#allocation3 + $0x21] sm:$0xff] %v2762_v53  ;;  %v2767_v56 = vmax.f32 %v2735_v43, 0.0  ;;  %v2733_v25 = vadd.f32 %v10371_v27, %v2694_v48  ;;  %v2488_v39 = vadd.f32 %v2375_v63, %v2278_v8  ;;  %v2697_v34 = vadd.f32 %v8463_v36, %v2490_v47 }
 0x205   : > { %v10428_v61 = vld [vmem:[#allocation3 + $0x30] sm:$0xff]  ;;  %v8432_v59 = vpop.f32.mrf.mxu1  ;;  %v10430_v50 = vpop.f32.mrf.mxu0  ;;  %v10458_v19 = vadd.f32 %v10313_v32, %v2102_v55 }
 0x206   : > { %v7230_v8 = vpack.c.bf16 %v10428_v61, %v10428_v61  ;;  %2839 = vst [vmem:[#allocation3 + $0x61] sm:$0xff] %v2767_v56  ;;  %v2765_v36 = vmax.f32 %v2733_v25, 0.0  ;;  %v2736_v45 = vadd.f32 %v10371_v27, %v2697_v34  ;;  %v2493_v17 = vadd.f32 %v8432_v59, %v2283_v42 }
 0x207   : > { %v10452_v57 = vld [vmem:[#allocation3 + $0x18] sm:$0xff]  ;;  %v2695_v9 = vadd.f32 %v2582_v30, %v2488_v39  ;;  %v2388_v24 = vpop.f32.mrf.mxu1  ;;  %v10455_v5 = vpop.f32.mrf.mxu0  ;;  %v3281_v3 = vrot.slane %v10428_v61, 1  ;;  %v3553_v20 = vrot.slane %v10428_v61, 2 }
 0x208   : > { %3195 = vst [vmem:[#allocation4 + $0x90] sm:$0xf] %v7230_v8  ;;  %3825 = vst [vmem:[#allocation4 + $0x54] sm:$0xf] %v7230_v8  ;;  %v3276_v51 = vrot.slane %v10452_v57, 1  ;;  %v7228_v42 = vpack.c.bf16 %v10452_v57, %v10452_v57  ;;  %v8742_v30 = vld [vmem:[#allocation5 + $0x148] sm:$0xff]   ;;  %v2491_v16 = vadd.f32 %v2388_v24, %v10392_v31  ;;  %v2700_v46 = vadd.f32 %v8466_v15, %v2493_v17 }
 0x209   : > { %3960 = vst [vmem:[#allocation4 + $0x18] sm:$0xf] %v7230_v8  ;;  %2837 = vst [vmem:[#allocation3 + $0x49] sm:$0xff] %v2765_v36  ;;  %v10465_v23 = vld [vmem:[#allocation3 + $0x38] sm:$0xff]  ;;  %v10467_v37 = vld [vmem:[#allocation3 + $0x40] sm:$0xff]  ;;  %v2768_v32 = vmax.f32 %v2736_v45, 0.0  ;;  %v2734_v40 = vadd.f32 %v10371_v27, %v2695_v9  ;;  %v8433_v10 = vpop.f32.mrf.mxu1  ;;  %v10471_v44 = vpop.f32.mrf.mxu0  ;;  %7929 = vmatprep.subr.bf16.mxu1 %v8742_v30 }
 0x20a   : > { %v3548_v53 = vrot.slane %v10452_v57, 2  ;;  %v7231_v43 = vpack.c.bf16 %v10465_v23, %v10465_v23  ;;  %v3282_v47 = vrot.slane %v10465_v23, 1  ;;  %v3284_v48 = vrot.slane %v10467_v37, 1  ;;  %3823 = vst [vmem:[#allocation4 + $0xc] sm:$0xf] %v7228_v42  ;;  %7930 = vmatpush3.bf16.msra.mxu1 %v8744_v26  ;;  %v8646_v26 = vld [vmem:[#allocation5 + $0x1b8] sm:$0xff]  }
 0x20b   : > { %3193 = vst [vmem:[#allocation4 + $0x48] sm:$0xf] %v7228_v42  ;;  %v3554_v55 = vrot.slane %v10465_v23, 2  ;;  %v10479_v63 = vld [vmem:[#allocation3 + $0x20] sm:$0xff]  ;;  %v10481_v31 = vld [vmem:[#allocation3 + $0x28] sm:$0xff]  ;;  %2840 = vst [vmem:[#allocation3 + $0x69] sm:$0xff] %v2768_v32  ;;  %v2739_v28 = vadd.f32 %v10371_v27, %v2700_v46  ;;  %v2494_v49 = vadd.f32 %v8433_v10, %v10395_v13  ;;  %v2391_v41 = vpop.f32.mrf.mxu1  ;;  %v10485_v56 = vpop.f32.mrf.mxu0  ;;  %v2698_v13 = vadd.f32 %v10412_v38, %v2491_v16 }
 0x20c   : > { %v2766_v15 = vmax.f32 %v2734_v40, 0.0  ;;  %v3556_v25 = vrot.slane %v10467_v37, 2  ;;  %3196 = vst [vmem:[#allocation4 + $0xb4] sm:$0xf] %v7231_v43  ;;  %3826 = vst [vmem:[#allocation4 + $0x78] sm:$0xf] %v7231_v43  ;;  %v2492_v60 = vadd.f32 %v2391_v41, %v10417_v14  ;;  %v7229_v40 = vpack.c.bf16 %v10479_v63, %v10479_v63 }
 0x20d   : > { %3961 = vst [vmem:[#allocation4 + $0x3c] sm:$0xf] %v7231_v43  ;;  %v3277_v39 = vrot.slane %v10479_v63, 1  ;;  %v3279_v34 = vrot.slane %v10481_v31, 1  ;;  %v3549_v59 = vrot.slane %v10479_v63, 2  ;;  %v10491_v1 = vld [vmem:[#allocation3 + $0x60] sm:$0xff]  ;;  %v2701_v8 = vadd.f32 %v10419_v58, %v2494_v49  ;;  %v8436_v36 = vpop.f32.mrf.mxu1  ;;  %v10496_v6 = vpop.f32.mrf.mxu0 }
 0x20e   : > { %2838 = vst [vmem:[#allocation3 + $0x51] sm:$0xff] %v2766_v15  ;;  %v2771_v35 = vmax.f32 %v2739_v28, 0.0  ;;  %v3551_v45 = vrot.slane %v10481_v31, 2  ;;  %v7234_v17 = vpack.c.bf16 %v10491_v1, %v10491_v1  ;;  %v2497_v24 = vadd.f32 %v8436_v36, %v10422_v0  ;;  %3824 = vst [vmem:[#allocation4 + $0x30] sm:$0xf] %v7229_v40 }
 0x20f   : > { %v2737_v38 = vadd.f32 %v10371_v27, %v2698_v13  ;;  %v2740_v14 = vadd.f32 %v10371_v27, %v2701_v8  ;;  %v2699_v58 = vadd.f32 %v10430_v50, %v2492_v60  ;;  %v2404_v30 = vpop.f32.mrf.mxu1  ;;  %v10508_v32 = vpop.f32.mrf.mxu0  ;;  %3194 = vst [vmem:[#allocation4 + $0x6c] sm:$0xf] %v7229_v40 }
 0x210   : > { %v10503_v42 = vld [vmem:[#allocation3 + $0x48] sm:$0xff]  ;;  %2843 = vst [vmem:[#allocation3 + $0x91] sm:$0xff] %v2771_v35  ;;  %3199 = vst [vmem:[#allocation4 + $0x120] sm:$0xf] %v7234_v17  ;;  %v2495_v10 = vadd.f32 %v2404_v30, %v10425_v7  ;;  %v2704_v28 = vadd.f32 %v10455_v5, %v2497_v24  ;;  %v11708_v7 = vld [vmem:[#allocation64_spill] sm:$0xff]  ;;  %v3278_v5 = vsel %vm561_vm4, %v3276_v51, %v3277_v39 }
 0x211   : > { %3829 = vst [vmem:[#allocation4 + $0xe4] sm:$0xf] %v7234_v17  ;;  %3964 = vst [vmem:[#allocation4 + $0xa8] sm:$0xf] %v7234_v17  ;;  %v7232_v0 = vpack.c.bf16 %v10503_v42, %v10503_v42  ;;  %v3286_v46 = vrot.slane %v10503_v42, 1  ;;  %v2769_v43 = vmax.f32 %v2737_v38, 0.0  ;;  %v2738_v15 = vadd.f32 %v10371_v27, %v2699_v58  ;;  %v8437_v49 = vpop.f32.mrf.mxu1  ;;  %v10519_v41 = vpop.f32.mrf.mxu0 }
 0x212   : > { %v2772_v50 = vmax.f32 %v2740_v14, 0.0  ;;  %v10522_v35 = vld [vmem:[#allocation3 + $0x68] sm:$0xff]  ;;  %v10524_v13 = vld [vmem:[#allocation3 + $0x70] sm:$0xff]  ;;  %v2498_v60 = vadd.f32 %v8437_v49, %v11708_v7  ;;  %v2702_v8 = vadd.f32 %v10471_v44, %v2495_v10  ;;  %v3280_v58 = vsel %vm561_vm4, %v3277_v39, %v3279_v34 }
 0x213   : > { %3197 = vst [vmem:[#allocation4 + $0xd8] sm:$0xf] %v7232_v0  ;;  %3827 = vst [vmem:[#allocation4 + $0x9c] sm:$0xf] %v7232_v0  ;;  %v7235_v36 = vpack.c.bf16 %v10522_v35, %v10522_v35  ;;  %v2407_v38 = vpop.f32.mrf.mxu1  ;;  %v10535_v14 = vpop.f32.mrf.mxu0  ;;  %v2770_v51 = vmax.f32 %v2738_v15, 0.0  ;;  %v7261_v24 = vpack.c.bf16 %v3280_v58, %v3280_v58 }
 0x214   : > { %3962 = vst [vmem:[#allocation4 + $0x60] sm:$0xf] %v7232_v0  ;;  %2841 = vst [vmem:[#allocation3 + $0x79] sm:$0xff] %v2769_v43  ;;  %v2743_v0 = vadd.f32 %v10371_v27, %v2704_v28  ;;  %v2741_v10 = vadd.f32 %v10371_v27, %v2702_v8  ;;  %v2496_v16 = vadd.f32 %v2407_v38, %v10433_v52 }
 0x215   : > { %2844 = vst [vmem:[#allocation3 + $0x99] sm:$0xff] %v2772_v50  ;;  %v10539_v30 = vld [vmem:[#allocation3 + $0x50] sm:$0xff]  ;;  %v10541_v40 = vld [vmem:[#allocation3 + $0x58] sm:$0xff]  ;;  %3200 = vst [vmem:[#allocation4 + $0x144] sm:$0xf] %v7235_v36  ;;  %v8440_v50 = vpop.f32.mrf.mxu1  ;;  %v10550_v7 = vpop.f32.mrf.mxu0  ;;  %v2705_v9 = vadd.f32 %v10485_v56, %v2498_v60 }
 0x216   : > { %3830 = vst [vmem:[#allocation4 + $0x108] sm:$0xf] %v7235_v36  ;;  %3965 = vst [vmem:[#allocation4 + $0xcc] sm:$0xf] %v7235_v36  ;;  %v7233_v43 = vpack.c.bf16 %v10539_v30, %v10539_v30  ;;  %v3287_v39 = vrot.slane %v10539_v30, 1  ;;  %v3289_v34 = vrot.slane %v10541_v40, 1  ;;  %v2501_v52 = vadd.f32 %v8440_v50, %v10436_v29 }
 0x217   : > { %v10553_v28 = vld [vmem:[#allocation3 + $0x90] sm:$0xff]  ;;  %2842 = vst [vmem:[#allocation3 + $0x81] sm:$0xff] %v2770_v51  ;;  %v2775_v8 = vmax.f32 %v2743_v0, 0.0  ;;  %v2773_v49 = vmax.f32 %v2741_v10, 0.0  ;;  %v2420_v17 = vpop.f32.mrf.mxu1  ;;  %v10561_v15 = vpop.f32.mrf.mxu0  ;;  %v2703_v38 = vadd.f32 %v10496_v6, %v2496_v16  ;;  %v8640_v0 = vld [vmem:[#allocation4 + $0x8] ss:$36 sps:$4 sm:$0xff]   ;;  %v2744_v56 = vadd.f32 %v10371_v27, %v2705_v9 }
 0x218   : > { %3198 = vst [vmem:[#allocation4 + $0xfc] sm:$0xf] %v7233_v43  ;;  %3828 = vst [vmem:[#allocation4 + $0xc0] sm:$0xf] %v7233_v43  ;;  %v7238_v44 = vpack.c.bf16 %v10553_v28, %v10553_v28  ;;  %v2499_v51 = vadd.f32 %v2420_v17, %v10439_v33  ;;  %v8642_v10 = vld [vmem:[#allocation4 + $0xc] ss:$36 sps:$4 sm:$0xff]   ;;  %v10573_v29 = vsel %vm1115_vm5, %v3548_v53, %v3549_v59 }
 0x219   : > { %3963 = vst [vmem:[#allocation4 + $0x84] sm:$0xf] %v7233_v43  ;;  %2847 = vst [vmem:[#allocation3 + $0xc1] sm:$0xff] %v2775_v8  ;;  %v7260_v43 = vpack.c.bf16 %v3278_v5, %v3278_v5  ;;  %v8441_v60 = vpop.f32.mrf.mxu1  ;;  %v10575_v33 = vpop.f32.mrf.mxu0  ;;  %v8663_v6 = vld [vmem:[#allocation5 + $0x1f0] sm:$0xff]   ;;  %v8758_v16 = vld [vmem:[#allocation5 + $0x140] sm:$0xff]   ;;  %v2742_v9 = vadd.f32 %v10371_v27, %v2703_v38  ;;  %v2708_v58 = vadd.f32 %v10508_v32, %v2501_v52  ;;  %5617 = vmatprep.mubr.bf16.mxu0 %v8642_v10 }
 0x21a   : > { %2845 = vst [vmem:[#allocation3 + $0xa9] sm:$0xff] %v2773_v49  ;;  %3203 = vst [vmem:[#allocation4 + $0x1b0] sm:$0xf] %v7238_v44  ;;  %v2706_v57 = vadd.f32 %v10519_v41, %v2499_v51  ;;  %v10591_v53 = vsel %vm1115_vm5, %v3549_v59, %v3551_v45  ;;  %v11709_v8 = vld [vmem:[#allocation69_spill] sm:$0xff]  ;;  %5618 = vmatmul.mubr.bf16.vlgmr.msra.gmra.mxu0 %v8640_v0  ;;  %7931 = vmatprep.subr.bf16.mxu1 %v8758_v16  ;;  %v8665_v51 = vld [vmem:[#allocation5 + $0x1b0] sm:$0xff]  }
 0x21b   : > { %3833 = vst [vmem:[#allocation4 + $0x174] sm:$0xf] %v7238_v44  ;;  %3968 = vst [vmem:[#allocation4 + $0x138] sm:$0xf] %v7238_v44  ;;  %v10577_v5 = vld [vmem:[#allocation3 + $0x78] sm:$0xff]  ;;  %v2502_v52 = vadd.f32 %v8441_v60, %v11709_v8  ;;  %v2423_v41 = vpop.f32.mrf.mxu1  ;;  %v10599_v31 = vpop.f32.mrf.mxu0  ;;  %8030 = vmatpush3.bf16.msra.mxu0 %v8646_v26  ;;  %v8760_v10 = vld [vmem:[#allocation5 + $0x100] sm:$0xff]   ;;  %v2747_v16 = vadd.f32 %v10371_v27, %v2708_v58 }
 0x21c   : > { %v10579_v17 = vld [vmem:[#allocation3 + $0x98] sm:$0xff]  ;;  %v10581_v44 = vld [vmem:[#allocation3 + $0xa0] sm:$0xff]  ;;  %3513 = vst [vmem:[#allocation4 + $0x4c] sm:$0xf] %v7260_v43  ;;  %3873 = vst [vmem:[#allocation4 + $0x10] sm:$0xf] %v7260_v43  ;;  %v7236_v49 = vpack.c.bf16 %v10577_v5, %v10577_v5  ;;  %v2745_v8 = vadd.f32 %v10371_v27, %v2706_v57  ;;  %8031 = vmatprep.subr.bf16.mxu0 %v8663_v6  ;;  %7932 = vmatpush3.bf16.msra.mxu1 %v8760_v10 }
 0x21d   : > { %v7239_v32 = vpack.c.bf16 %v10579_v17, %v10579_v17  ;;  %3514 = vst [vmem:[#allocation4 + $0x70] sm:$0xf] %v7261_v24  ;;  %3874 = vst [vmem:[#allocation4 + $0x34] sm:$0xf] %v7261_v24  ;;  %v2776_v43 = vmax.f32 %v2744_v56, 0.0  ;;  %v2774_v60 = vmax.f32 %v2742_v9, 0.0  ;;  %v8444_v36 = vpop.f32.mrf.mxu1  ;;  %v10611_v26 = vpop.f32.mrf.mxu0 }
 0x21e   : > { %3201 = vst [vmem:[#allocation4 + $0x168] sm:$0xf] %v7236_v49  ;;  %3831 = vst [vmem:[#allocation4 + $0x12c] sm:$0xf] %v7236_v49  ;;  %v10605_v24 = vld [vmem:[#allocation3 + $0x80] sm:$0xff]  ;;  %v10607_v0 = vld [vmem:[#allocation3 + $0x88] sm:$0xff] }
 0x21f   : > { %3966 = vst [vmem:[#allocation4 + $0xf0] sm:$0xf] %v7236_v49  ;;  %3204 = vst [vmem:[#allocation4 + $0x1d4] sm:$0xf] %v7239_v32  ;;  %v8679_v38 = vld [vmem:[#allocation5 + $0x1e8] sm:$0xff]   ;;  %v3297_v45 = vrot.slane %v10605_v24, 1  ;;  %v2500_v49 = vadd.f32 %v2423_v41, %v10442_v12  ;;  %v2436_v63 = vpop.f32.mrf.mxu1  ;;  %8032 = vmatpush3.bf16.msra.mxu0 %v8665_v51  ;;  %v2709_v12 = vadd.f32 %v10535_v14, %v2502_v52 }
 0x220   : > { %3834 = vst [vmem:[#allocation4 + $0x198] sm:$0xf] %v7239_v32  ;;  %3969 = vst [vmem:[#allocation4 + $0x15c] sm:$0xf] %v7239_v32  ;;  %v7237_v32 = vpack.c.bf16 %v10605_v24, %v10605_v24  ;;  %v10619_v9 = vld [vmem:[#allocation3 + $0xc0] sm:$0xff]  ;;  %v2779_v6 = vmax.f32 %v2747_v16, 0.0  ;;  %v7292_v41 = vpack.c.bf16 %v10573_v29, %v10573_v29  ;;  %8033 = vmatprep.subr.bf16.mxu0 %v8679_v38 }
 0x221   : > { %v10621_v58 = vld [vmem:[#allocation3 + $0xa8] sm:$0xff]  ;;  %2848 = vst [vmem:[#allocation3 + $0xc9] sm:$0xff] %v2776_v43  ;;  %2846 = vst [vmem:[#allocation3 + $0xb1] sm:$0xff] %v2774_v60  ;;  %v2777_v57 = vmax.f32 %v2745_v8, 0.0  ;;  %v3571_v50 = vrot.slane %v10607_v0, 2  ;;  %v7242_v10 = vpack.c.bf16 %v10619_v9, %v10619_v9  ;;  %v8445_v16 = vpop.f32.mrf.mxu1  ;;  %v10635_v8 = vpop.f32.mrf.mxu0  ;;  %v8695_v56 = vld [vmem:[#allocation5 + $0x1e0] sm:$0xff]   ;;  %v7293_v14 = vpack.c.bf16 %v10591_v53, %v10591_v53 }
 0x222   : > { %3202 = vst [vmem:[#allocation4 + $0x18c] sm:$0xf] %v7237_v32  ;;  %3832 = vst [vmem:[#allocation4 + $0x150] sm:$0xf] %v7237_v32  ;;  %v7240_v59 = vpack.c.bf16 %v10621_v58, %v10621_v58  ;;  %v3306_v60 = vrot.slane %v10621_v58, 1  ;;  %v2505_v52 = vadd.f32 %v8444_v36, %v10285_v62  ;;  %v2707_v29 = vadd.f32 %v10550_v7, %v2500_v49  ;;  %v11710_v62 = vld [vmem:[#allocation71_spill] sm:$0xff] }
 0x223   : > { %3967 = vst [vmem:[#allocation4 + $0x114] sm:$0xf] %v7237_v32  ;;  %2851 = vst [vmem:[#allocation3 + $0xf1] sm:$0xff] %v2779_v6  ;;  %v8681_v32 = vld [vmem:[#allocation5 + $0x1a8] sm:$0xff]   ;;  %v3283_v38 = vsel %vm561_vm4, %v3281_v3, %v3282_v47  ;;  %v3285_v53 = vsel %vm561_vm4, %v3282_v47, %v3284_v48  ;;  %v2503_v36 = vadd.f32 %v2436_v63, %v11710_v62  ;;  %v10653_v7 = vpop.f32.mrf.mxu1  ;;  %v11711_v47 = vld [vmem:[#allocation72_spill] sm:$0xff] }
 0x224   : > { %2849 = vst [vmem:[#allocation3 + $0xd9] sm:$0xff] %v2777_v57  ;;  %3207 = vst [vmem:[#allocation4 + $0x240] sm:$0xf] %v7242_v10  ;;  %v8647_v51 = vld [vmem:[#allocation4 + $0x48] ss:$36 sps:$4 sm:$0xff]   ;;  %v2748_v57 = vadd.f32 %v10371_v27, %v2709_v12  ;;  %v2746_v3 = vadd.f32 %v10371_v27, %v2707_v29  ;;  %v2712_v12 = vadd.f32 %v10561_v15, %v2505_v52  ;;  %8034 = vmatpush3.bf16.msra.mxu0 %v8681_v32  ;;  %v8713_v43 = vld [vmem:[#allocation5 + $0x198] sm:$0xff]  }
 0x225   : > { %3837 = vst [vmem:[#allocation4 + $0x204] sm:$0xf] %v7242_v10  ;;  %3972 = vst [vmem:[#allocation4 + $0x1c8] sm:$0xf] %v7242_v10  ;;  %v8649_v6 = vld [vmem:[#allocation4 + $0x4c] ss:$36 sps:$4 sm:$0xff]   ;;  %v7263_v10 = vpack.c.bf16 %v3285_v53, %v3285_v53  ;;  %v10659_v48 = vadd.f32 %v8445_v16, %v11711_v47  ;;  %v3555_v63 = vsel %vm1115_vm5, %v3553_v20, %v3554_v55  ;;  %8035 = vmatprep.subr.bf16.mxu0 %v8695_v56 }
 0x226   : > { %3205 = vst [vmem:[#allocation4 + $0x1f8] sm:$0xf] %v7240_v59  ;;  %3835 = vst [vmem:[#allocation4 + $0x1bc] sm:$0xf] %v7240_v59  ;;  %5464 = vmatprep.mubr.bf16.mxu1 %v8649_v6  ;;  %v3557_v15 = vsel %vm1115_vm5, %v3554_v55, %v3556_v25  ;;  %v10671_v6 = vpop.f32.mrf.mxu1  ;;  %v8711_v16 = vld [vmem:[#allocation5 + $0x1d8] sm:$0xff]   ;;  %v2778_v20 = vmax.f32 %v2746_v3, 0.0  ;;  %v2710_v23 = vadd.f32 %v10575_v33, %v2503_v36 }
 0x227   : > { %3970 = vst [vmem:[#allocation4 + $0x180] sm:$0xf] %v7240_v59  ;;  %3785 = vst [vmem:[#allocation4 + $0x50] sm:$0xf] %v7292_v41  ;;  %v7262_v59 = vpack.c.bf16 %v3283_v38, %v3283_v38  ;;  %5465 = vmatmul.mubr.bf16.gmra.mxu1 %v8647_v51  ;;  %v10673_v51 = vpop.f32.mrf.mxu0  ;;  %v7294_v37 = vpack.c.bf16 %v3555_v63, %v3555_v63  ;;  %v7295_v55 = vpack.c.bf16 %v3557_v15, %v3557_v15  ;;  %v8727_v38 = vld [vmem:[#allocation5 + $0x1d0] sm:$0xff]   ;;  %v8743_v62 = vld [vmem:[#allocation5 + $0x1c8] sm:$0xff]  }
 0x228   : > { %3920 = vst [vmem:[#allocation4 + $0x14] sm:$0xf] %v7292_v41  ;;  %3786 = vst [vmem:[#allocation4 + $0x74] sm:$0xf] %v7293_v14  ;;  %v2780_v41 = vmax.f32 %v2748_v57, 0.0  ;;  %v10675_v52 = vld [vmem:[#allocation3 + $0xc8] sm:$0xff]  ;;  %v2751_v53 = vadd.f32 %v10371_v27, %v2712_v12  ;;  %v2749_v63 = vadd.f32 %v10371_v27, %v2710_v23  ;;  %v3288_v23 = vsel %vm561_vm4, %v3286_v46, %v3287_v39 }
 0x229   : > { %3921 = vst [vmem:[#allocation4 + $0x38] sm:$0xf] %v7293_v14  ;;  %3515 = vst [vmem:[#allocation4 + $0x94] sm:$0xf] %v7262_v59  ;;  %v8697_v14 = vld [vmem:[#allocation5 + $0x1a0] sm:$0xff]   ;;  %v7243_v25 = vpack.c.bf16 %v10675_v52, %v10675_v52  ;;  %v10686_v57 = vld [vmem:[#allocation3 + $0xb8] sm:$0xff]  ;;  %v10703_v33 = vpop.f32.mrf.mxu0 }
 0x22a   : > { %3875 = vst [vmem:[#allocation4 + $0x58] sm:$0xf] %v7262_v59  ;;  %4010 = vst [vmem:[#allocation4 + $0x1c] sm:$0xf] %v7262_v59  ;;  %v10677_v29 = vld [vmem:[#allocation3 + $0xd0] sm:$0xff]  ;;  %v2452_v59 = vpop.f32.mrf.mxu1  ;;  %v8774_v12 = vld [vmem:[#allocation5 + $0x238] sm:$0xff]   ;;  %8036 = vmatpush3.bf16.msra.mxu0 %v8697_v14 }
 0x22b   : > { %v10679_v61 = vld [vmem:[#allocation3 + $0xb0] sm:$0xff]  ;;  %3516 = vst [vmem:[#allocation4 + $0xb8] sm:$0xf] %v7263_v10  ;;  %3876 = vst [vmem:[#allocation4 + $0x7c] sm:$0xf] %v7263_v10  ;;  %8037 = vmatprep.subr.bf16.mxu0 %v8711_v16  ;;  %8488 = vmatprep.subr.bf16.mxu1 %v8774_v12  ;;  %v2783_v32 = vmax.f32 %v2751_v53, 0.0  ;;  %v10734_v46 = vpop.f32.mrf.mxu0 }
 0x22c   : > { %4011 = vst [vmem:[#allocation4 + $0x40] sm:$0xf] %v7263_v10  ;;  %2852 = vst [vmem:[#allocation3 + $0xf9] sm:$0xff] %v2780_v41  ;;  %v7241_v56 = vpack.c.bf16 %v10679_v61, %v10679_v61  ;;  %v3307_v36 = vrot.slane %v10679_v61, 1  ;;  %v10694_v3 = vld [vmem:[#allocation3 + $0xf0] sm:$0xff]  ;;  %v10696_v10 = vld [vmem:[#allocation3 + $0xd8] sm:$0xff] }
 0x22d   : > { %2850 = vst [vmem:[#allocation3 + $0xe1] sm:$0xff] %v2778_v20  ;;  %3787 = vst [vmem:[#allocation4 + $0x98] sm:$0xf] %v7294_v37  ;;  %v3309_v41 = vrot.slane %v10686_v57, 1  ;;  %v7246_v15 = vpack.c.bf16 %v10694_v3, %v10694_v3  ;;  %v8449_v20 = vpop.f32.mrf.mxu1  ;;  %v8652_v14 = vld [vmem:[#allocation4 + $0x54] ss:$36 sps:$4 sm:$0xff]  }
 0x22e   : > { %3788 = vst [vmem:[#allocation4 + $0xbc] sm:$0xf] %v7295_v55  ;;  %3922 = vst [vmem:[#allocation4 + $0x5c] sm:$0xf] %v7294_v37  ;;  %v8729_v49 = vld [vmem:[#allocation5 + $0x190] sm:$0xff]   ;;  %v11712_v12 = vld [vmem:[#allocation73_spill] sm:$0xff]  ;;  %5625 = vmatprep.mubr.bf16.mxu0 %v8652_v14  ;;  %8038 = vmatpush3.bf16.msra.mxu0 %v8713_v43 }
 0x22f   : > { %3923 = vst [vmem:[#allocation4 + $0x80] sm:$0xf] %v7295_v55  ;;  %4057 = vst [vmem:[#allocation4 + $0x20] sm:$0xf] %v7294_v37  ;;  %v10715_v37 = vpop.f32.mrf.mxu1  ;;  %v8650_v16 = vld [vmem:[#allocation4 + $0x50] ss:$36 sps:$4 sm:$0xff]   ;;  %8039 = vmatprep.subr.bf16.mxu0 %v8727_v38 }
 0x230   : > { %4058 = vst [vmem:[#allocation4 + $0x44] sm:$0xf] %v7295_v55  ;;  %3208 = vst [vmem:[#allocation4 + $0x264] sm:$0xf] %v7243_v25  ;;  %v2713_v55 = vadd.f32 %v10599_v31, %v10659_v48  ;;  %v2507_v31 = vadd.f32 %v2452_v59, %v10301_v18  ;;  %v2781_v48 = vmax.f32 %v2749_v63, 0.0  ;;  %v3588_v47 = vrot.slane %v10696_v10, 2  ;;  %5626 = vmatmul.mubr.bf16.gmra.mxu0 %v8650_v16 }
 0x231   : > { %3838 = vst [vmem:[#allocation4 + $0x228] sm:$0xf] %v7243_v25  ;;  %3973 = vst [vmem:[#allocation4 + $0x1ec] sm:$0xf] %v7243_v25  ;;  %v7244_v25 = vpack.c.bf16 %v10696_v10, %v10696_v10  ;;  %v11713_v16 = vrot.slane %v10539_v30, 2  ;;  %v11715_v43 = vrot.slane %v10541_v40, 2 }
 0x232   : > { %3206 = vst [vmem:[#allocation4 + $0x21c] sm:$0xf] %v7241_v56  ;;  %3836 = vst [vmem:[#allocation4 + $0x1e0] sm:$0xf] %v7241_v56  ;;  %8040 = vmatpush3.bf16.msra.mxu0 %v8729_v49 }
 0x233   : > { %3971 = vst [vmem:[#allocation4 + $0x1a4] sm:$0xf] %v7241_v56  ;;  %3211 = vst [vmem:[#allocation4 + $0x2d0] sm:$0xf] %v7246_v15  ;;  %v2504_v56 = vadd.f32 %v10653_v7, %v10447_v21  ;;  %v3290_v21 = vsel %vm561_vm4, %v3287_v39, %v3289_v34  ;;  %v8655_v7 = vld [vmem:[#allocation4 + $0x94] ss:$36 sps:$4 sm:$0xff]   ;;  %8041 = vmatprep.subr.bf16.mxu0 %v8743_v62 }
 0x234   : > { %3841 = vst [vmem:[#allocation4 + $0x294] sm:$0xf] %v7246_v15  ;;  %3976 = vst [vmem:[#allocation4 + $0x258] sm:$0xf] %v7246_v15  ;;  %v2509_v15 = vadd.f32 %v10671_v6, %v11712_v12  ;;  %v2752_v6 = vadd.f32 %v10371_v27, %v2713_v55  ;;  %v10732_v12 = vpop.f32.mrf.mxu1  ;;  %v10737_v39 = vld [vmem:[#allocation3 + $0xf8] sm:$0xff]  ;;  %v10739_v18 = vld [vmem:[#allocation3 + $0x100] sm:$0xff]  ;;  %5472 = vmatprep.mubr.bf16.mxu1 %v8655_v7 }
 0x235   : > { %3209 = vst [vmem:[#allocation4 + $0x288] sm:$0xf] %v7244_v25  ;;  %3839 = vst [vmem:[#allocation4 + $0x24c] sm:$0xf] %v7244_v25  ;;  %v2711_v53 = vadd.f32 %v10611_v26, %v2504_v56  ;;  %v8653_v34 = vld [vmem:[#allocation4 + $0x90] ss:$36 sps:$4 sm:$0xff]   ;;  %v2714_v26 = vadd.f32 %v10673_v51, %v2507_v31  ;;  %v7247_v63 = vpack.c.bf16 %v10737_v39, %v10737_v39 }
 0x236   : > { %3974 = vst [vmem:[#allocation4 + $0x210] sm:$0xf] %v7244_v25  ;;  %2855 = vst [vmem:[#allocation3 + $0x121] sm:$0xff] %v2783_v32  ;;  %v7264_v25 = vpack.c.bf16 %v3288_v23, %v3288_v23  ;;  %v7265_v32 = vpack.c.bf16 %v3290_v21, %v3290_v21  ;;  %v2716_v59 = vadd.f32 %v10635_v8, %v2509_v15  ;;  %v10747_v14 = vld [vmem:[#allocation3 + $0xe0] sm:$0xff]  ;;  %v10749_v56 = vld [vmem:[#allocation3 + $0xe8] sm:$0xff]  ;;  %5473 = vmatmul.mubr.bf16.gmra.mxu1 %v8653_v34  ;;  %v2468_v21 = vpop.f32.mrf.mxu1 }
 0x237   : > { %2853 = vst [vmem:[#allocation3 + $0x109] sm:$0xff] %v2781_v48  ;;  %v2510_v8 = vadd.f32 %v8449_v20, %v10309_v11  ;;  %v7245_v15 = vpack.c.bf16 %v10747_v14, %v10747_v14  ;;  %v3317_v23 = vrot.slane %v10747_v14, 1  ;;  %v8745_v31 = vld [vmem:[#allocation5 + $0x188] sm:$0xff]   ;;  %3212 = vst [vmem:[#allocation4 + $0x2f4] sm:$0xf] %v7247_v63  ;;  %v3319_v11 = vrot.slane %v10749_v56, 1 }
 0x238   : > { %3517 = vst [vmem:[#allocation4 + $0xdc] sm:$0xf] %v7264_v25  ;;  %3877 = vst [vmem:[#allocation4 + $0xa0] sm:$0xf] %v7264_v25  ;;  %v3589_v38 = vrot.slane %v10747_v14, 2  ;;  %v2784_v7 = vmax.f32 %v2752_v6, 0.0  ;;  %v2750_v48 = vadd.f32 %v10371_v27, %v2711_v53  ;;  %v2755_v34 = vadd.f32 %v10371_v27, %v2716_v59  ;;  %v8453_v62 = vpop.f32.mrf.mxu1  ;;  %8042 = vmatpush3.bf16.msra.mxu0 %v8745_v31 }
 0x239   : > { %4012 = vst [vmem:[#allocation4 + $0x64] sm:$0xf] %v7264_v25  ;;  %3518 = vst [vmem:[#allocation4 + $0x100] sm:$0xf] %v7265_v32  ;;  %v8658_v20 = vld [vmem:[#allocation4 + $0x9c] ss:$36 sps:$4 sm:$0xff]   ;;  %v8486_v25 = vpop.f32.mrf.mxu0  ;;  %v11716_v6 = vmov %v11713_v16  ;;  %v2717_v40 = vadd.f32 %v10703_v33, %v2510_v8  ;;  %v2513_v30 = vadd.f32 %v10732_v12, %v10327_v2 }
 0x23a   : > { %3878 = vst [vmem:[#allocation4 + $0xc4] sm:$0xf] %v7265_v32  ;;  %4013 = vst [vmem:[#allocation4 + $0x88] sm:$0xf] %v7265_v32  ;;  %v2753_v32 = vadd.f32 %v10371_v27, %v2714_v26  ;;  %v3562_v53 = vsel %vm1115_vm5, %v11716_v6, %v11715_v43  ;;  %5633 = vmatprep.mubr.bf16.mxu0 %v8658_v20  ;;  %v2782_v49 = vmax.f32 %v2750_v48, 0.0  ;;  %v8759_v26 = vld [vmem:[#allocation5 + $0x1c0] sm:$0xff]  }
 0x23b   : > { %3842 = vst [vmem:[#allocation4 + $0x2b8] sm:$0xf] %v7247_v63  ;;  %3977 = vst [vmem:[#allocation4 + $0x27c] sm:$0xf] %v7247_v63  ;;  %v11714_v63 = vrot.slane %v10503_v42, 2  ;;  %v7297_v59 = vpack.c.bf16 %v3562_v53, %v3562_v53  ;;  %v2508_v27 = vadd.f32 %v10715_v37, %v10450_v54  ;;  %v8761_v43 = vld [vmem:[#allocation5 + $0x180] sm:$0xff]   ;;  %v2675_v37 = vpop.f32.mrf.mxu0  ;;  %v2511_v6 = vadd.f32 %v2468_v21, %v10339_v4 }
 0x23c   : > { %3210 = vst [vmem:[#allocation4 + $0x2ac] sm:$0xf] %v7245_v15  ;;  %3840 = vst [vmem:[#allocation4 + $0x270] sm:$0xf] %v7245_v15  ;;  %v8656_v42 = vld [vmem:[#allocation4 + $0x98] ss:$36 sps:$4 sm:$0xff]   ;;  %8043 = vmatprep.subr.bf16.mxu0 %v8759_v26 }
 0x23d   : > { %3975 = vst [vmem:[#allocation4 + $0x234] sm:$0xf] %v7245_v15  ;;  %v3560_v51 = vsel %vm1115_vm5, %v11714_v63, %v11713_v16  ;;  %2856 = vst [vmem:[#allocation3 + $0x129] sm:$0xff] %v2784_v7  ;;  %v10774_v55 = vld [vmem:[#allocation3 + $0x120] sm:$0xff]  ;;  %v2787_v16 = vmax.f32 %v2755_v34, 0.0  ;;  %v2785_v63 = vmax.f32 %v2753_v32, 0.0  ;;  %v2715_v33 = vadd.f32 %v10734_v46, %v2508_v27  ;;  %5634 = vmatmul.mubr.bf16.gmra.mxu0 %v8656_v42 }
 0x23e   : > { %v7296_v15 = vpack.c.bf16 %v3560_v51, %v3560_v51  ;;  %v3591_v20 = vrot.slane %v10749_v56, 2  ;;  %v7250_v51 = vpack.c.bf16 %v10774_v55, %v10774_v55  ;;  %v3331_v54 = vrot.slane %v10774_v55, 1  ;;  %2854 = vst [vmem:[#allocation3 + $0x111] sm:$0xff] %v2782_v49  ;;  %3790 = vst [vmem:[#allocation4 + $0x104] sm:$0xf] %v7297_v59  ;;  %v10784_v2 = vld [vmem:[#allocation3 + $0x108] sm:$0xff]  ;;  %8044 = vmatpush3.bf16.msra.mxu0 %v8761_v43 }
 0x23f   : > { %4060 = vst [vmem:[#allocation4 + $0x8c] sm:$0xf] %v7297_v59  ;;  %3925 = vst [vmem:[#allocation4 + $0xc8] sm:$0xf] %v7297_v59  ;;  %v10789_v12 = vld [vmem:[%s11501_s2] ss:$0 sm:$0xff]  ;;  %v7248_v49 = vpack.c.bf16 %v10784_v2, %v10784_v2 }
 0x240   : > { %3789 = vst [vmem:[#allocation4 + $0xe0] sm:$0xf] %v7296_v15  ;;  %4059 = vst [vmem:[#allocation4 + $0x68] sm:$0xf] %v7296_v15  ;;  %v2756_v8 = vadd.f32 %v10789_v12, %v2717_v40  ;;  %v11717_v7 = vrot.slane %v10522_v35, 1  ;;  %v11718_v48 = vrot.slane %v10491_v1, 1  ;;  %v2754_v59 = vadd.f32 %v10789_v12, %v2715_v33 }
 0x241   : > { %3924 = vst [vmem:[#allocation4 + $0xa4] sm:$0xf] %v7296_v15  ;;  %2859 = vst [vmem:[#allocation3 + $0x151] sm:$0xff] %v2787_v16  ;;  %v11719_v31 = vrot.slane %v10524_v13, 1  ;;  %v3326_v15 = vrot.slane %v10784_v2, 1  ;;  %v2720_v40 = vadd.f32 %v8486_v25, %v2513_v30  ;;  %v3598_v21 = vrot.slane %v10784_v2, 2  ;;  %v8487_v25 = vpop.f32.mrf.mxu0 }
 0x242   : > { %2857 = vst [vmem:[#allocation3 + $0x139] sm:$0xff] %v2785_v63  ;;  %v3293_v46 = vsel %vm561_vm4, %v11718_v48, %v11717_v7  ;;  %v11720_v34 = vmov %v11717_v7  ;;  %3215 = vst [vmem:[#allocation4 + $0x360] sm:$0xf] %v7250_v51  ;;  %v8661_v27 = vld [vmem:[#allocation4 + $0xdc] ss:$36 sps:$4 sm:$0xff]   ;;  %v2788_v42 = vmax.f32 %v2756_v8, 0.0  ;;  %v2471_v7 = vpop.f32.mrf.mxu1 }
 0x243   : > { %v3295_v32 = vsel %vm561_vm4, %v11720_v34, %v11719_v31  ;;  %3845 = vst [vmem:[#allocation4 + $0x324] sm:$0xf] %v7250_v51  ;;  %3980 = vst [vmem:[#allocation4 + $0x2e8] sm:$0xf] %v7250_v51  ;;  %v7266_v16 = vpack.c.bf16 %v3293_v46, %v3293_v46  ;;  %v6229_v4 = vld [vmem:[%s11504_s5] sm:$0x3]  ;;  %v2718_v31 = vadd.f32 %v2675_v37, %v2511_v6  ;;  %5480 = vmatprep.mubr.bf16.mxu1 %v8661_v27 }
 0x244   : > { %v7267_v63 = vpack.c.bf16 %v3295_v32, %v3295_v32  ;;  %3213 = vst [vmem:[#allocation4 + $0x318] sm:$0xf] %v7248_v49  ;;  %3843 = vst [vmem:[#allocation4 + $0x2dc] sm:$0xf] %v7248_v49  ;;  %v8659_v51 = vld [vmem:[#allocation4 + $0xd8] ss:$36 sps:$4 sm:$0xff]   ;;  %v2759_v37 = vadd.f32 %v10789_v12, %v2720_v40  ;;  %8582 = vmatprep.subr.msk.bf16.mxu0 %vm738_vm3, %v6229_v4 }
 0x245   : > { %3978 = vst [vmem:[#allocation4 + $0x2a0] sm:$0xf] %v7248_v49  ;;  %v2786_v48 = vmax.f32 %v2754_v59, 0.0  ;;  %v11721_v26 = vrot.slane %v10522_v35, 2  ;;  %v11722_v33 = vrot.slane %v10491_v1, 2  ;;  %v10817_v30 = vld [vmem:[#allocation3 + $0x128] sm:$0xff]  ;;  %v2514_v1 = vadd.f32 %v8453_v62, %v10350_v22  ;;  %5481 = vmatmul.mubr.bf16.gmra.mxu1 %v8659_v51 }
 0x246   : > { %v10819_v46 = vld [vmem:[#allocation3 + $0x130] sm:$0xff]  ;;  %2860 = vst [vmem:[#allocation3 + $0x159] sm:$0xff] %v2788_v42  ;;  %3519 = vst [vmem:[#allocation4 + $0x124] sm:$0xf] %v7266_v16  ;;  %v11723_v34 = vrot.slane %v10524_v13, 2  ;;  %v7251_v49 = vpack.c.bf16 %v10817_v30, %v10817_v30  ;;  %v3332_v59 = vrot.slane %v10817_v30, 1  ;;  %v2512_v42 = vadd.f32 %v2471_v7, %v10458_v19 }
 0x247   : > { %v3565_v8 = vsel %vm1115_vm5, %v11722_v33, %v11721_v26  ;;  %3520 = vst [vmem:[#allocation4 + $0x148] sm:$0xf] %v7267_v63  ;;  %3879 = vst [vmem:[#allocation4 + $0xe8] sm:$0xf] %v7266_v16  ;;  %v11724_v43 = vmov %v11721_v26  ;;  %v3334_v27 = vrot.slane %v10819_v46, 1  ;;  %v3604_v22 = vrot.slane %v10817_v30, 2 }
 0x248   : > { %3880 = vst [vmem:[#allocation4 + $0x10c] sm:$0xf] %v7267_v63  ;;  %4014 = vst [vmem:[#allocation4 + $0xac] sm:$0xf] %v7266_v16  ;;  %v3567_v32 = vsel %vm1115_vm5, %v11724_v43, %v11723_v34  ;;  %v7298_v6 = vpack.c.bf16 %v3565_v8, %v3565_v8  ;;  %v10835_v13 = vld [vmem:[#allocation3 + $0x110] sm:$0xff]  ;;  %v10837_v35 = vld [vmem:[#allocation3 + $0x118] sm:$0xff]  ;;  %v2757_v16 = vadd.f32 %v10789_v12, %v2718_v31  ;;  %v2678_v31 = vpop.f32.mrf.mxu0 }
 0x249   : > { %4015 = vst [vmem:[#allocation4 + $0xd0] sm:$0xf] %v7267_v63  ;;  %2858 = vst [vmem:[#allocation3 + $0x141] sm:$0xff] %v2786_v48  ;;  %v2791_v62 = vmax.f32 %v2759_v37, 0.0  ;;  %v7299_v63 = vpack.c.bf16 %v3567_v32, %v3567_v32  ;;  %v7249_v19 = vpack.c.bf16 %v10835_v13, %v10835_v13  ;;  %v3327_v7 = vrot.slane %v10835_v13, 1  ;;  %v10845_v51 = vld [vmem:[#allocation3 + $0x150] sm:$0xff] }
 0x24a   : > { %3791 = vst [vmem:[#allocation4 + $0x128] sm:$0xf] %v7298_v6  ;;  %3926 = vst [vmem:[#allocation4 + $0xec] sm:$0xf] %v7298_v6  ;;  %v3329_v4 = vrot.slane %v10837_v35, 1  ;;  %v10847_v48 = vld [vmem:[#allocation3 + $0x138] sm:$0xff]  ;;  %v7254_v8 = vpack.c.bf16 %v10845_v51, %v10845_v51  ;;  %v2719_v40 = vadd.f32 %v2678_v31, %v2512_v42  ;;  %v3333_v2 = vsel %vm561_vm4, %v3331_v54, %v3332_v59 }
 0x24b   : > { %4061 = vst [vmem:[#allocation4 + $0xb0] sm:$0xf] %v7298_v6  ;;  %3216 = vst [vmem:[#allocation4 + $0x384] sm:$0xf] %v7251_v49  ;;  %v3599_v26 = vrot.slane %v10835_v13, 2  ;;  %v3601_v33 = vrot.slane %v10837_v35, 2  ;;  %v7252_v43 = vpack.c.bf16 %v10847_v48, %v10847_v48  ;;  %v7282_v35 = vpack.c.bf16 %v3333_v2, %v3333_v2 }
 0x24c   : > { %3846 = vst [vmem:[#allocation4 + $0x348] sm:$0xf] %v7251_v49  ;;  %3981 = vst [vmem:[#allocation4 + $0x30c] sm:$0xf] %v7251_v49  ;;  %v8668_v6 = vld [vmem:[#allocation4 + $0xe4] ss:$36 sps:$4 sm:$0xff]  }
 0x24d   : > { %2863 = vst [vmem:[#allocation3 + $0x181] sm:$0xff] %v2791_v62  ;;  %3792 = vst [vmem:[#allocation4 + $0x14c] sm:$0xf] %v7299_v63  ;;  %v2789_v49 = vmax.f32 %v2757_v16, 0.0  ;;  %v8666_v37 = vld [vmem:[#allocation4 + $0xe0] ss:$36 sps:$4 sm:$0xff]   ;;  %v2721_v62 = vadd.f32 %v8487_v25, %v2514_v1  ;;  %5641 = vmatprep.mubr.bf16.mxu0 %v8668_v6 }
 0x24e   : > { %3927 = vst [vmem:[#allocation4 + $0x110] sm:$0xf] %v7299_v63  ;;  %4062 = vst [vmem:[#allocation4 + $0xd4] sm:$0xf] %v7299_v63  ;;  %v11725_v63 = vrot.slane %v10577_v5, 1  ;;  %v11726_v34 = vrot.slane %v10607_v0, 1  ;;  %5642 = vmatmul.mubr.bf16.gmra.mxu0 %v8666_v37 }
 0x24f   : > { %3214 = vst [vmem:[#allocation4 + $0x33c] sm:$0xf] %v7249_v19  ;;  %3844 = vst [vmem:[#allocation4 + $0x300] sm:$0xf] %v7249_v19  ;;  %v10869_v25 = vld [vmem:[#allocation3 + $0x158] sm:$0xff]  ;;  %v10871_v1 = vld [vmem:[#allocation3 + $0x160] sm:$0xff]  ;;  %v2760_v37 = vadd.f32 %v10789_v12, %v2721_v62 }
 0x250   : > { %3979 = vst [vmem:[#allocation4 + $0x2c4] sm:$0xf] %v7249_v19  ;;  %3219 = vst [vmem:[#allocation4 + $0x3f0] sm:$0xf] %v7254_v8  ;;  %v3298_v19 = vsel %vm561_vm4, %v11725_v63, %v3297_v45  ;;  %v3300_v32 = vsel %vm561_vm4, %v3297_v45, %v11726_v34  ;;  %v11728_v63 = vrot.slane %v10577_v5, 2  ;;  %v7255_v45 = vpack.c.bf16 %v10869_v25, %v10869_v25  ;;  %v10882_v6 = vld [vmem:[#allocation3 + $0x140] sm:$0xff] }
 0x251   : > { %3849 = vst [vmem:[#allocation4 + $0x3b4] sm:$0xf] %v7254_v8  ;;  %3984 = vst [vmem:[#allocation4 + $0x378] sm:$0xf] %v7254_v8  ;;  %v7268_v42 = vpack.c.bf16 %v3298_v19, %v3298_v19  ;;  %v7269_v31 = vpack.c.bf16 %v3300_v32, %v3300_v32  ;;  %v11727_v8 = vrot.slane %v10605_v24, 2  ;;  %v10884_v16 = vld [vmem:[#allocation3 + $0x148] sm:$0xff] }
 0x252   : > { %3217 = vst [vmem:[#allocation4 + $0x3a8] sm:$0xf] %v7252_v43  ;;  %3847 = vst [vmem:[#allocation4 + $0x36c] sm:$0xf] %v7252_v43  ;;  %v8671_v0 = vld [vmem:[#allocation4 + $0x124] ss:$36 sps:$4 sm:$0xff]  }
 0x253   : > { %3982 = vst [vmem:[#allocation4 + $0x330] sm:$0xf] %v7252_v43  ;;  %2861 = vst [vmem:[#allocation3 + $0x169] sm:$0xff] %v2789_v49  ;;  %v3570_v53 = vsel %vm1115_vm5, %v11728_v63, %v11727_v8  ;;  %v11729_v32 = vmov %v11727_v8  ;;  %v7253_v8 = vpack.c.bf16 %v10882_v6, %v10882_v6  ;;  %v8669_v19 = vld [vmem:[#allocation4 + $0x120] ss:$36 sps:$4 sm:$0xff]   ;;  %v11730_v43 = vrot.slane %v10579_v17, 1  ;;  %5488 = vmatprep.mubr.bf16.mxu1 %v8671_v0 }
 0x254   : > { %v3572_v5 = vsel %vm1115_vm5, %v11729_v32, %v3571_v50  ;;  %3521 = vst [vmem:[#allocation4 + $0x16c] sm:$0xf] %v7268_v42  ;;  %3522 = vst [vmem:[#allocation4 + $0x190] sm:$0xf] %v7269_v31  ;;  %v2758_v32 = vadd.f32 %v10789_v12, %v2719_v40  ;;  %v10900_v49 = vld [vmem:[#allocation3 + $0x180] sm:$0xff]  ;;  %v11732_v24 = vrot.slane %v10581_v44, 1  ;;  %5489 = vmatmul.mubr.bf16.gmra.mxu1 %v8669_v19 }
 0x255   : > { %3881 = vst [vmem:[#allocation4 + $0x130] sm:$0xf] %v7268_v42  ;;  %3882 = vst [vmem:[#allocation4 + $0x154] sm:$0xf] %v7269_v31  ;;  %v11733_v62 = vmov %v11730_v43  ;;  %v3611_v40 = vrot.slane %v10884_v16, 2  ;;  %v11734_v63 = vrot.slane %v10579_v17, 2  ;;  %v3310_v17 = vsel %vm561_vm4, %v3307_v36, %v3309_v41 }
 0x256   : > { %4016 = vst [vmem:[#allocation4 + $0xf4] sm:$0xf] %v7268_v42  ;;  %4017 = vst [vmem:[#allocation4 + $0x118] sm:$0xf] %v7269_v31  ;;  %v7300_v42 = vpack.c.bf16 %v3570_v53, %v3570_v53  ;;  %v7301_v31 = vpack.c.bf16 %v3572_v5, %v3572_v5  ;;  %v3305_v12 = vsel %vm561_vm4, %v11733_v62, %v11732_v24  ;;  %v8674_v50 = vld [vmem:[#allocation4 + $0x12c] ss:$36 sps:$4 sm:$0xff]  }
 0x257   : > { %3220 = vst [vmem:[#allocation4 + $0x414] sm:$0xf] %v7255_v45  ;;  %3850 = vst [vmem:[#allocation4 + $0x3d8] sm:$0xf] %v7255_v45  ;;  %v2792_v53 = vmax.f32 %v2760_v37, 0.0  ;;  %v2790_v5 = vmax.f32 %v2758_v32, 0.0  ;;  %v11737_v37 = vmov %v11734_v63  ;;  %5649 = vmatprep.mubr.bf16.mxu0 %v8674_v50 }
 0x258   : > { %3985 = vst [vmem:[#allocation4 + $0x39c] sm:$0xf] %v7255_v45  ;;  %3218 = vst [vmem:[#allocation4 + $0x3cc] sm:$0xf] %v7253_v8  ;;  %v11731_v45 = vrot.slane %v10553_v28, 1  ;;  %v11735_v24 = vrot.slane %v10553_v28, 2  ;;  %v3308_v28 = vsel %vm561_vm4, %v3306_v60, %v3307_v36  ;;  %v7273_v36 = vpack.c.bf16 %v3310_v17, %v3310_v17 }
 0x259   : > { %3848 = vst [vmem:[#allocation4 + $0x390] sm:$0xf] %v7253_v8  ;;  %3983 = vst [vmem:[#allocation4 + $0x354] sm:$0xf] %v7253_v8  ;;  %v11736_v62 = vrot.slane %v10581_v44, 2  ;;  %v3905_v44 = vrot.slane %v10900_v49, 2  ;;  %v7272_v60 = vpack.c.bf16 %v3308_v28, %v3308_v28 }
 0x25a   : > { %v3303_v34 = vsel %vm561_vm4, %v11731_v45, %v11730_v43  ;;  %3793 = vst [vmem:[#allocation4 + $0x170] sm:$0xf] %v7300_v42  ;;  %3794 = vst [vmem:[#allocation4 + $0x194] sm:$0xf] %v7301_v31  ;;  %v7271_v45 = vpack.c.bf16 %v3305_v12, %v3305_v12  ;;  %v3575_v0 = vsel %vm1115_vm5, %v11735_v24, %v11734_v63  ;;  %v10924_v32 = vld [vmem:[#allocation3 + $0x168] sm:$0xff]  ;;  %v11738_v41 = vrot.slane %v10679_v61, 2 }
 0x25b   : > { %3928 = vst [vmem:[#allocation4 + $0x134] sm:$0xf] %v7300_v42  ;;  %3929 = vst [vmem:[#allocation4 + $0x158] sm:$0xf] %v7301_v31  ;;  %v7270_v43 = vpack.c.bf16 %v3303_v34, %v3303_v34  ;;  %v3577_v19 = vsel %vm1115_vm5, %v11737_v37, %v11736_v62  ;;  %v8672_v8 = vld [vmem:[#allocation4 + $0x128] ss:$36 sps:$4 sm:$0xff]   ;;  %v7302_v34 = vpack.c.bf16 %v3575_v0, %v3575_v0 }
 0x25c   : > { %4063 = vst [vmem:[#allocation4 + $0xf8] sm:$0xf] %v7300_v42  ;;  %4064 = vst [vmem:[#allocation4 + $0x11c] sm:$0xf] %v7301_v31  ;;  %v7303_v42 = vpack.c.bf16 %v3577_v19, %v3577_v19  ;;  %v7256_v63 = vpack.c.bf16 %v10924_v32, %v10924_v32  ;;  %v3346_v50 = vrot.slane %v10924_v32, 1  ;;  %5650 = vmatmul.mubr.bf16.gmra.mxu0 %v8672_v8  ;;  %v11739_v31 = vrot.slane %v10621_v58, 2 }
 0x25d   : > { %2864 = vst [vmem:[#allocation3 + $0x189] sm:$0xff] %v2792_v53  ;;  %2862 = vst [vmem:[#allocation3 + $0x171] sm:$0xff] %v2790_v5  ;;  %v11740_v53 = vrot.slane %v10686_v57, 2  ;;  %v11741_v5 = vmov %v11738_v41  ;;  %v11742_v8 = vrot.slane %v10675_v52, 1  ;;  %v8677_v0 = vld [vmem:[#allocation4 + $0x16c] ss:$36 sps:$4 sm:$0xff]  }
 0x25e   : > { %3523 = vst [vmem:[#allocation4 + $0x1b4] sm:$0xf] %v7270_v43  ;;  %3524 = vst [vmem:[#allocation4 + $0x1d8] sm:$0xf] %v7271_v45  ;;  %v3580_v12 = vsel %vm1115_vm5, %v11739_v31, %v11738_v41  ;;  %v11744_v57 = vrot.slane %v10677_v29, 1  ;;  %v11747_v28 = vrot.slane %v10619_v9, 2  ;;  %5496 = vmatprep.mubr.bf16.mxu1 %v8677_v0 }
 0x25f   : > { %3883 = vst [vmem:[#allocation4 + $0x178] sm:$0xf] %v7270_v43  ;;  %3884 = vst [vmem:[#allocation4 + $0x19c] sm:$0xf] %v7271_v45  ;;  %v7304_v58 = vpack.c.bf16 %v3580_v12, %v3580_v12  ;;  %v11745_v61 = vmov %v11742_v8  ;;  %v11750_v31 = vrot.slane %v10696_v10, 1  ;;  %v11753_v14 = vrot.slane %v10739_v18, 1 }
 0x260   : > { %4018 = vst [vmem:[#allocation4 + $0x13c] sm:$0xf] %v7270_v43  ;;  %4019 = vst [vmem:[#allocation4 + $0x160] sm:$0xf] %v7271_v45  ;;  %v3582_v43 = vsel %vm1115_vm5, %v11741_v5, %v11740_v53  ;;  %v11743_v45 = vrot.slane %v10619_v9, 1  ;;  %v3315_v37 = vsel %vm561_vm4, %v11745_v61, %v11744_v57  ;;  %v11759_v54 = vrot.slane %v10774_v55, 2 }
 0x261   : > { %3795 = vst [vmem:[#allocation4 + $0x1b8] sm:$0xf] %v7302_v34  ;;  %3796 = vst [vmem:[#allocation4 + $0x1dc] sm:$0xf] %v7303_v42  ;;  %v7305_v62 = vpack.c.bf16 %v3582_v43, %v3582_v43  ;;  %v3318_v12 = vsel %vm561_vm4, %v11750_v31, %v3317_v23  ;;  %v3590_v43 = vsel %vm1115_vm5, %v3588_v47, %v3589_v38  ;;  %v11763_v55 = vrot.slane %v10884_v16, 1 }
 0x262   : > { %3930 = vst [vmem:[#allocation4 + $0x17c] sm:$0xf] %v7302_v34  ;;  %3931 = vst [vmem:[#allocation4 + $0x1a0] sm:$0xf] %v7303_v42  ;;  %v3313_v24 = vsel %vm561_vm4, %v11743_v45, %v11742_v8  ;;  %v7276_v53 = vpack.c.bf16 %v3318_v12, %v3318_v12  ;;  %v3592_v8 = vsel %vm1115_vm5, %v3589_v38, %v3591_v20  ;;  %v11751_v45 = vrot.slane %v10737_v39, 1 }
 0x263   : > { %4065 = vst [vmem:[#allocation4 + $0x140] sm:$0xf] %v7302_v34  ;;  %4066 = vst [vmem:[#allocation4 + $0x164] sm:$0xf] %v7303_v42  ;;  %v7274_v19 = vpack.c.bf16 %v3313_v24, %v3313_v24  ;;  %v7275_v34 = vpack.c.bf16 %v3315_v37, %v3315_v37  ;;  %v11746_v42 = vrot.slane %v10675_v52, 2  ;;  %v7308_v10 = vpack.c.bf16 %v3590_v43, %v3590_v43 }
 0x264   : > { %3221 = vst [vmem:[#allocation4 + $0x438] sm:$0xf] %v7256_v63  ;;  %3851 = vst [vmem:[#allocation4 + $0x3fc] sm:$0xf] %v7256_v63  ;;  %v10995_v24 = vld [vmem:[#allocation3 + $0x188] sm:$0xff]  ;;  %v10997_v0 = vld [vmem:[#allocation3 + $0x190] sm:$0xff]  ;;  %v7309_v47 = vpack.c.bf16 %v3592_v8, %v3592_v8  ;;  %v11754_v56 = vmov %v11751_v45 }
 0x265   : > { %3986 = vst [vmem:[#allocation4 + $0x3c0] sm:$0xf] %v7256_v63  ;;  %3525 = vst [vmem:[#allocation4 + $0x1fc] sm:$0xf] %v7272_v60  ;;  %v3585_v17 = vsel %vm1115_vm5, %v11747_v28, %v11746_v42  ;;  %v11748_v63 = vrot.slane %v10677_v29, 2  ;;  %v3320_v29 = vsel %vm561_vm4, %v3317_v23, %v3319_v11  ;;  %v11752_v23 = vrot.slane %v10694_v3, 1 }
 0x266   : > { %3885 = vst [vmem:[#allocation4 + $0x1c0] sm:$0xf] %v7272_v60  ;;  %4020 = vst [vmem:[#allocation4 + $0x184] sm:$0xf] %v7272_v60  ;;  %v11749_v60 = vmov %v11746_v42  ;;  %v7306_v9 = vpack.c.bf16 %v3585_v17, %v3585_v17  ;;  %v7277_v5 = vpack.c.bf16 %v3320_v29, %v3320_v29  ;;  %v3325_v38 = vsel %vm561_vm4, %v11754_v56, %v11753_v14  ;;  %v8687_v31 = vld [vmem:[#allocation4 + $0x1b4] ss:$36 sps:$4 sm:$0xff]  }
 0x267   : > { %3526 = vst [vmem:[#allocation4 + $0x220] sm:$0xf] %v7273_v36  ;;  %3886 = vst [vmem:[#allocation4 + $0x1e4] sm:$0xf] %v7273_v36  ;;  %v3587_v41 = vsel %vm1115_vm5, %v11749_v60, %v11748_v63  ;;  %v3323_v11 = vsel %vm561_vm4, %v11752_v23, %v11751_v45  ;;  %v3859_v57 = vrot.slane %v10995_v24, 1  ;;  %v3861_v61 = vrot.slane %v10997_v0, 1 }
 0x268   : > { %4021 = vst [vmem:[#allocation4 + $0x1a8] sm:$0xf] %v7273_v36  ;;  %v8675_v36 = vld [vmem:[#allocation4 + $0x168] ss:$36 sps:$4 sm:$0xff]   ;;  %3797 = vst [vmem:[#allocation4 + $0x200] sm:$0xf] %v7304_v58  ;;  %v7307_v52 = vpack.c.bf16 %v3587_v41, %v3587_v41  ;;  %v7278_v20 = vpack.c.bf16 %v3323_v11, %v3323_v11  ;;  %v7279_v12 = vpack.c.bf16 %v3325_v38, %v3325_v38 }
 0x269   : > { %3798 = vst [vmem:[#allocation4 + $0x224] sm:$0xf] %v7305_v62  ;;  %3932 = vst [vmem:[#allocation4 + $0x1c4] sm:$0xf] %v7304_v58  ;;  %5497 = vmatmul.mubr.bf16.gmra.mxu1 %v8675_v36  ;;  %v3906_v37 = vrot.slane %v10995_v24, 2  ;;  %v11755_v36 = vrot.slane %v10737_v39, 2  ;;  %v3330_v39 = vsel %vm561_vm4, %v3327_v7, %v3329_v4 }
 0x26a   : > { %3933 = vst [vmem:[#allocation4 + $0x1e8] sm:$0xf] %v7305_v62  ;;  %4067 = vst [vmem:[#allocation4 + $0x188] sm:$0xf] %v7304_v58  ;;  %v10999_v58 = vld [vmem:[#allocation3 + $0x170] sm:$0xff]  ;;  %v11757_v29 = vrot.slane %v10739_v18, 2  ;;  %5504 = vmatprep.mubr.bf16.mxu1 %v8687_v31  ;;  %v7281_v11 = vpack.c.bf16 %v3330_v39, %v3330_v39 }
 0x26b   : > { %4068 = vst [vmem:[#allocation4 + $0x1ac] sm:$0xf] %v7305_v62  ;;  %3527 = vst [vmem:[#allocation4 + $0x244] sm:$0xf] %v7274_v19  ;;  %v3618_v62 = vrot.slane %v10924_v32, 2  ;;  %v7257_v42 = vpack.c.bf16 %v10999_v58, %v10999_v58  ;;  %v3347_v28 = vrot.slane %v10999_v58, 1  ;;  %v7323_v32 = vpack.c.bf16 %v10995_v24, %v10995_v24 }
 0x26c   : > { %3887 = vst [vmem:[#allocation4 + $0x208] sm:$0xf] %v7274_v19  ;;  %4022 = vst [vmem:[#allocation4 + $0x1cc] sm:$0xf] %v7274_v19  ;;  %v11010_v19 = vld [vmem:[#allocation3 + $0x178] sm:$0xff]  ;;  %v3619_v60 = vrot.slane %v10999_v58, 2 }
 0x26d   : > { %3528 = vst [vmem:[#allocation4 + $0x268] sm:$0xf] %v7275_v34  ;;  %3888 = vst [vmem:[#allocation4 + $0x22c] sm:$0xf] %v7275_v34  ;;  %v3349_v17 = vrot.slane %v11010_v19, 1  ;;  %v3621_v18 = vrot.slane %v11010_v19, 2  ;;  %v3348_v2 = vsel %vm561_vm4, %v3346_v50, %v3347_v28 }
 0x26e   : > { %4023 = vst [vmem:[#allocation4 + $0x1f0] sm:$0xf] %v7275_v34  ;;  %3799 = vst [vmem:[#allocation4 + $0x248] sm:$0xf] %v7306_v9  ;;  %v3908_v34 = vrot.slane %v10997_v0, 2  ;;  %v11761_v56 = vrot.slane %v10882_v6, 1  ;;  %v3620_v50 = vsel %vm1115_vm5, %v3618_v62, %v3619_v60 }
 0x26f   : > { %3800 = vst [vmem:[#allocation4 + $0x26c] sm:$0xf] %v7307_v52  ;;  %3934 = vst [vmem:[#allocation4 + $0x20c] sm:$0xf] %v7306_v9  ;;  %v8684_v63 = vld [vmem:[#allocation4 + $0x174] ss:$36 sps:$4 sm:$0xff]  }
 0x270   : > { %3935 = vst [vmem:[#allocation4 + $0x230] sm:$0xf] %v7307_v52  ;;  %4069 = vst [vmem:[#allocation4 + $0x1d0] sm:$0xf] %v7306_v9  ;;  %v8682_v41 = vld [vmem:[#allocation4 + $0x170] ss:$36 sps:$4 sm:$0xff]   ;;  %5657 = vmatprep.mubr.bf16.mxu0 %v8684_v63 }
 0x271   : > { %4070 = vst [vmem:[#allocation4 + $0x1f4] sm:$0xf] %v7307_v52  ;;  %3529 = vst [vmem:[#allocation4 + $0x28c] sm:$0xf] %v7276_v53  ;;  %v11756_v9 = vrot.slane %v10694_v3, 2  ;;  %v3328_v3 = vsel %vm561_vm4, %v3326_v15, %v3327_v7  ;;  %5658 = vmatmul.mubr.bf16.gmra.mxu0 %v8682_v41  ;;  %v3600_v15 = vsel %vm1115_vm5, %v3598_v21, %v3599_v26  ;;  %v11762_v38 = vrot.slane %v10847_v48, 1 }
 0x272   : > { %3889 = vst [vmem:[#allocation4 + $0x250] sm:$0xf] %v7276_v53  ;;  %4024 = vst [vmem:[#allocation4 + $0x214] sm:$0xf] %v7276_v53  ;;  %v11758_v53 = vmov %v11755_v36  ;;  %v8690_v43 = vld [vmem:[#allocation4 + $0x1bc] ss:$36 sps:$4 sm:$0xff]   ;;  %v7280_v23 = vpack.c.bf16 %v3328_v3, %v3328_v3  ;;  %v3602_v7 = vsel %vm1115_vm5, %v3599_v26, %v3601_v33  ;;  %v7312_v4 = vpack.c.bf16 %v3600_v15, %v3600_v15 }
 0x273   : > { %3530 = vst [vmem:[#allocation4 + $0x2b0] sm:$0xf] %v7277_v5  ;;  %3890 = vst [vmem:[#allocation4 + $0x274] sm:$0xf] %v7277_v5  ;;  %v3595_v52 = vsel %vm1115_vm5, %v11756_v9, %v11755_v36  ;;  %5665 = vmatprep.mubr.bf16.mxu0 %v8690_v43  ;;  %v3335_v21 = vsel %vm561_vm4, %v3332_v59, %v3334_v27  ;;  %v7313_v13 = vpack.c.bf16 %v3602_v7, %v3602_v7  ;;  %v8706_v0 = vld [vmem:[#allocation4 + $0x24c] ss:$36 sps:$4 sm:$0xff]  }
 0x274   : > { %4025 = vst [vmem:[#allocation4 + $0x238] sm:$0xf] %v7277_v5  ;;  %3801 = vst [vmem:[#allocation4 + $0x290] sm:$0xf] %v7308_v10  ;;  %v3597_v5 = vsel %vm1115_vm5, %v11758_v53, %v11757_v29  ;;  %v7310_v8 = vpack.c.bf16 %v3595_v52, %v3595_v52  ;;  %v7283_v26 = vpack.c.bf16 %v3335_v21, %v3335_v21  ;;  %v11760_v59 = vrot.slane %v10819_v46, 2 }
 0x275   : > { %3802 = vst [vmem:[#allocation4 + $0x2b4] sm:$0xf] %v7309_v47  ;;  %3936 = vst [vmem:[#allocation4 + $0x254] sm:$0xf] %v7308_v10  ;;  %v7311_v45 = vpack.c.bf16 %v3597_v5, %v3597_v5  ;;  %v3605_v33 = vsel %vm1115_vm5, %v11759_v54, %v3604_v22  ;;  %v11765_v41 = vrot.slane %v10882_v6, 2  ;;  %v11766_v31 = vrot.slane %v10847_v48, 2 }
 0x276   : > { %3937 = vst [vmem:[#allocation4 + $0x278] sm:$0xf] %v7309_v47  ;;  %4071 = vst [vmem:[#allocation4 + $0x218] sm:$0xf] %v7308_v10  ;;  %v8685_v10 = vld [vmem:[#allocation4 + $0x1b0] ss:$36 sps:$4 sm:$0xff]   ;;  %v3607_v27 = vsel %vm1115_vm5, %v3604_v22, %v11760_v59  ;;  %v7314_v14 = vpack.c.bf16 %v3605_v33, %v3605_v33 }
 0x277   : > { %4072 = vst [vmem:[#allocation4 + $0x23c] sm:$0xf] %v7309_v47  ;;  %3531 = vst [vmem:[#allocation4 + $0x2d4] sm:$0xf] %v7278_v20  ;;  %v8693_v47 = vld [vmem:[#allocation4 + $0x1fc] ss:$36 sps:$4 sm:$0xff]   ;;  %5505 = vmatmul.mubr.bf16.gmra.mxu1 %v8685_v10  ;;  %v7315_v30 = vpack.c.bf16 %v3607_v27, %v3607_v27  ;;  %v11767_v36 = vmov %v11765_v41 }
 0x278   : > { %3891 = vst [vmem:[#allocation4 + $0x298] sm:$0xf] %v7278_v20  ;;  %4026 = vst [vmem:[#allocation4 + $0x25c] sm:$0xf] %v7278_v20  ;;  %v3338_v20 = vsel %vm561_vm4, %v11762_v38, %v11761_v56  ;;  %5512 = vmatprep.mubr.bf16.mxu1 %v8693_v47  ;;  %v3612_v9 = vsel %vm1115_vm5, %v11767_v36, %v3611_v40  ;;  %v11768_v29 = vrot.slane %v10869_v25, 1  ;;  %v11769_v53 = vrot.slane %v10845_v51, 1 }
 0x279   : > { %3222 = vst [vmem:[#allocation4 + $0x45c] sm:$0xf] %v7257_v42  ;;  %3852 = vst [vmem:[#allocation4 + $0x420] sm:$0xf] %v7257_v42  ;;  %v7284_v46 = vpack.c.bf16 %v3338_v20, %v3338_v20  ;;  %v11770_v48 = vrot.slane %v10871_v1, 1  ;;  %v7317_v16 = vpack.c.bf16 %v3612_v9, %v3612_v9  ;;  %v11772_v3 = vrot.slane %v10869_v25, 2 }
 0x27a   : > { %3987 = vst [vmem:[#allocation4 + $0x3e4] sm:$0xf] %v7257_v42  ;;  %3532 = vst [vmem:[#allocation4 + $0x2f8] sm:$0xf] %v7279_v12  ;;  %v11764_v42 = vmov %v11761_v56  ;;  %v3343_v5 = vsel %vm561_vm4, %v11769_v53, %v11768_v29  ;;  %v11771_v43 = vmov %v11768_v29  ;;  %v11773_v39 = vrot.slane %v10845_v51, 2 }
 0x27b   : > { %3892 = vst [vmem:[#allocation4 + $0x2bc] sm:$0xf] %v7279_v12  ;;  %4027 = vst [vmem:[#allocation4 + $0x280] sm:$0xf] %v7279_v12  ;;  %v3340_v63 = vsel %vm561_vm4, %v11764_v42, %v11763_v55  ;;  %v3610_v12 = vsel %vm1115_vm5, %v11766_v31, %v11765_v41  ;;  %v7286_v6 = vpack.c.bf16 %v3343_v5, %v3343_v5  ;;  %v11774_v15 = vrot.slane %v10871_v1, 2 }
 0x27c   : > { %3803 = vst [vmem:[#allocation4 + $0x2d8] sm:$0xf] %v7310_v8  ;;  %3804 = vst [vmem:[#allocation4 + $0x2fc] sm:$0xf] %v7311_v45  ;;  %v7285_v22 = vpack.c.bf16 %v3340_v63, %v3340_v63  ;;  %v7316_v52 = vpack.c.bf16 %v3610_v12, %v3610_v12  ;;  %v11775_v10 = vmov %v11772_v3  ;;  %v3350_v51 = vsel %vm561_vm4, %v3347_v28, %v3349_v17  ;;  %v8691_v28 = vld [vmem:[#allocation4 + $0x1f8] ss:$36 sps:$4 sm:$0xff]  }
 0x27d   : > { %3938 = vst [vmem:[#allocation4 + $0x29c] sm:$0xf] %v7310_v8  ;;  %3939 = vst [vmem:[#allocation4 + $0x2c0] sm:$0xf] %v7311_v45  ;;  %v3617_v7 = vsel %vm1115_vm5, %v11775_v10, %v11774_v15  ;;  %v7288_v1 = vpack.c.bf16 %v3348_v2, %v3348_v2  ;;  %v7289_v21 = vpack.c.bf16 %v3350_v51, %v3350_v51  ;;  %v11776_v62 = vrot.slane %v10900_v49, 1  ;;  %v8787_v15 = vld [vmem:[#allocation5 + $0x230] sm:$0xff]  }
 0x27e   : > { %4073 = vst [vmem:[#allocation4 + $0x260] sm:$0xf] %v7310_v8  ;;  %4074 = vst [vmem:[#allocation4 + $0x284] sm:$0xf] %v7311_v45  ;;  %v3345_v8 = vsel %vm561_vm4, %v11771_v43, %v11770_v48  ;;  %v8688_v45 = vld [vmem:[#allocation4 + $0x1b8] ss:$36 sps:$4 sm:$0xff]   ;;  %v7319_v25 = vpack.c.bf16 %v3617_v7, %v3617_v7  ;;  %v3622_v17 = vsel %vm1115_vm5, %v3619_v60, %v3621_v18 }
 0x27f   : > { %3533 = vst [vmem:[#allocation4 + $0x31c] sm:$0xf] %v7280_v23  ;;  %3534 = vst [vmem:[#allocation4 + $0x340] sm:$0xf] %v7281_v11  ;;  %v7287_v40 = vpack.c.bf16 %v3345_v8, %v3345_v8  ;;  %5666 = vmatmul.mubr.bf16.gmra.mxu0 %v8688_v45  ;;  %v7320_v47 = vpack.c.bf16 %v3620_v50, %v3620_v50  ;;  %v7321_v58 = vpack.c.bf16 %v3622_v17, %v3622_v17  ;;  %v8701_v24 = vld [vmem:[#allocation4 + $0x240] ss:$36 sps:$4 sm:$0xff]  }
 0x280   : > { %3893 = vst [vmem:[#allocation4 + $0x2e0] sm:$0xf] %v7280_v23  ;;  %3894 = vst [vmem:[#allocation4 + $0x304] sm:$0xf] %v7281_v11  ;;  %v3860_v19 = vsel %vm561_vm4, %v11776_v62, %v3859_v57  ;;  %v3862_v60 = vsel %vm561_vm4, %v3859_v57, %v3861_v61  ;;  %v3907_v18 = vsel %vm1115_vm5, %v3905_v44, %v3906_v37  ;;  %5513 = vmatmul.mubr.bf16.gmra.mxu1 %v8691_v28  ;;  %v8698_v44 = vld [vmem:[#allocation4 + $0x200] ss:$36 sps:$4 sm:$0xff]  }
 0x281   : > { %4028 = vst [vmem:[#allocation4 + $0x2a4] sm:$0xf] %v7280_v23  ;;  %4029 = vst [vmem:[#allocation4 + $0x2c8] sm:$0xf] %v7281_v11  ;;  %v3615_v23 = vsel %vm1115_vm5, %v11773_v39, %v11772_v3  ;;  %v8700_v11 = vld [vmem:[#allocation4 + $0x204] ss:$36 sps:$4 sm:$0xff]   ;;  %v7325_v54 = vpack.c.bf16 %v3862_v60, %v3862_v60  ;;  %v3909_v57 = vsel %vm1115_vm5, %v3906_v37, %v3908_v34  ;;  %v7709_v37 = vpop.f32.mrf.mxu1 }
 0x282   : > { %3805 = vst [vmem:[#allocation4 + $0x320] sm:$0xf] %v7312_v4  ;;  %3940 = vst [vmem:[#allocation4 + $0x2e4] sm:$0xf] %v7312_v4  ;;  %5673 = vmatprep.mubr.bf16.mxu0 %v8700_v11  ;;  %v7326_v61 = vpack.c.bf16 %v3907_v18, %v3907_v18  ;;  %v8709_v34 = vld [vmem:[#allocation4 + $0x28c] ss:$36 sps:$4 sm:$0xff]  }
 0x283   : > { %4075 = vst [vmem:[#allocation4 + $0x2a8] sm:$0xf] %v7312_v4  ;;  %3806 = vst [vmem:[#allocation4 + $0x344] sm:$0xf] %v7313_v13  ;;  %v7318_v4 = vpack.c.bf16 %v3615_v23, %v3615_v23  ;;  %v7710_v33 = vpop.f32.mrf.mxu1  ;;  %v8704_v27 = vld [vmem:[#allocation4 + $0x248] ss:$36 sps:$4 sm:$0xff]  }
 0x284   : > { %3941 = vst [vmem:[#allocation4 + $0x308] sm:$0xf] %v7313_v13  ;;  %4076 = vst [vmem:[#allocation4 + $0x2cc] sm:$0xf] %v7313_v13  ;;  %v7322_v13 = vpack.c.bf16 %v10900_v49, %v10900_v49  ;;  %v7327_v49 = vpack.c.bf16 %v3909_v57, %v3909_v57  ;;  %v11153_v59 = vadd.f32 %v7710_v33, %v7709_v37  ;;  %v8707_v56 = vld [vmem:[#allocation4 + $0x288] ss:$36 sps:$4 sm:$0xff]  }
 0x285   : > { %3535 = vst [vmem:[#allocation4 + $0x364] sm:$0xf] %v7282_v35  ;;  %3536 = vst [vmem:[#allocation4 + $0x388] sm:$0xf] %v7283_v26  ;;  %v8719_v38 = vld [vmem:[#allocation4 + $0x2d4] ss:$36 sps:$4 sm:$0xff]  }
 0x286   : > { %3895 = vst [vmem:[#allocation4 + $0x328] sm:$0xf] %v7282_v35  ;;  %3896 = vst [vmem:[#allocation4 + $0x34c] sm:$0xf] %v7283_v26  ;;  %v8714_v20 = vld [vmem:[#allocation4 + $0x290] ss:$36 sps:$4 sm:$0xff]  }
 0x287   : > { %4030 = vst [vmem:[#allocation4 + $0x2ec] sm:$0xf] %v7282_v35  ;;  %4031 = vst [vmem:[#allocation4 + $0x310] sm:$0xf] %v7283_v26  ;;  %v8703_v35 = vld [vmem:[#allocation4 + $0x244] ss:$36 sps:$4 sm:$0xff]   ;;  %v7324_v26 = vpack.c.bf16 %v3860_v19, %v3860_v19  ;;  %5674 = vmatmul.mubr.bf16.gmra.mxu0 %v8698_v44 }
 0x288   : > { %3807 = vst [vmem:[#allocation4 + $0x368] sm:$0xf] %v7314_v14  ;;  %3942 = vst [vmem:[#allocation4 + $0x32c] sm:$0xf] %v7314_v14  ;;  %5520 = vmatprep.mubr.bf16.mxu1 %v8703_v35  ;;  %5681 = vmatprep.mubr.bf16.mxu0 %v8706_v0  ;;  %v8722_v55 = vld [vmem:[#allocation4 + $0x2dc] ss:$36 sps:$4 sm:$0xff]  }
 0x289   : > { %4077 = vst [vmem:[#allocation4 + $0x2f0] sm:$0xf] %v7314_v14  ;;  %3808 = vst [vmem:[#allocation4 + $0x38c] sm:$0xf] %v7315_v30  ;;  %5521 = vmatmul.mubr.bf16.gmra.mxu1 %v8701_v24  ;;  %v8716_v14 = vld [vmem:[#allocation4 + $0x294] ss:$36 sps:$4 sm:$0xff]  }
 0x28a   : > { %3943 = vst [vmem:[#allocation4 + $0x350] sm:$0xf] %v7315_v30  ;;  %4078 = vst [vmem:[#allocation4 + $0x314] sm:$0xf] %v7315_v30  ;;  %5528 = vmatprep.mubr.bf16.mxu1 %v8709_v34  ;;  %v8717_v42 = vld [vmem:[#allocation4 + $0x2d0] ss:$36 sps:$4 sm:$0xff]  }
 0x28b   : > { %3537 = vst [vmem:[#allocation4 + $0x3ac] sm:$0xf] %v7284_v46  ;;  %3538 = vst [vmem:[#allocation4 + $0x3d0] sm:$0xf] %v7285_v22  ;;  %v8725_v63 = vld [vmem:[#allocation4 + $0x31c] ss:$36 sps:$4 sm:$0xff]  }
 0x28c   : > { %3897 = vst [vmem:[#allocation4 + $0x370] sm:$0xf] %v7284_v46  ;;  %3898 = vst [vmem:[#allocation4 + $0x394] sm:$0xf] %v7285_v22  ;;  %v8720_v30 = vld [vmem:[#allocation4 + $0x2d8] ss:$36 sps:$4 sm:$0xff]  }
 0x28d   : > { %4032 = vst [vmem:[#allocation4 + $0x334] sm:$0xf] %v7284_v46  ;;  %4033 = vst [vmem:[#allocation4 + $0x358] sm:$0xf] %v7285_v22  ;;  %v8732_v46 = vld [vmem:[#allocation4 + $0x324] ss:$36 sps:$4 sm:$0xff]  }
 0x28e   : > { %3809 = vst [vmem:[#allocation4 + $0x3b0] sm:$0xf] %v7316_v52  ;;  %3944 = vst [vmem:[#allocation4 + $0x374] sm:$0xf] %v7316_v52  ;;  %v8723_v22 = vld [vmem:[#allocation4 + $0x318] ss:$36 sps:$4 sm:$0xff]  }
 0x28f   : > { %4079 = vst [vmem:[#allocation4 + $0x338] sm:$0xf] %v7316_v52  ;;  %3810 = vst [vmem:[#allocation4 + $0x3d4] sm:$0xf] %v7317_v16  ;;  %5682 = vmatmul.mubr.bf16.gmra.mxu0 %v8704_v27  ;;  %v8735_v41 = vld [vmem:[#allocation4 + $0x364] ss:$36 sps:$4 sm:$0xff]  }
 0x290   : > { %3945 = vst [vmem:[#allocation4 + $0x398] sm:$0xf] %v7317_v16  ;;  %4080 = vst [vmem:[#allocation4 + $0x35c] sm:$0xf] %v7317_v16  ;;  %5689 = vmatprep.mubr.bf16.mxu0 %v8716_v14  ;;  %v8730_v31 = vld [vmem:[#allocation4 + $0x320] ss:$36 sps:$4 sm:$0xff]  }
 0x291   : > { %3539 = vst [vmem:[#allocation4 + $0x3f4] sm:$0xf] %v7286_v6  ;;  %3540 = vst [vmem:[#allocation4 + $0x418] sm:$0xf] %v7287_v40  ;;  %5529 = vmatmul.mubr.bf16.gmra.mxu1 %v8707_v56  ;;  %v8738_v12 = vld [vmem:[#allocation4 + $0x36c] ss:$36 sps:$4 sm:$0xff]  }
 0x292   : > { %3899 = vst [vmem:[#allocation4 + $0x3b8] sm:$0xf] %v7286_v6  ;;  %3900 = vst [vmem:[#allocation4 + $0x3dc] sm:$0xf] %v7287_v40  ;;  %5536 = vmatprep.mubr.bf16.mxu1 %v8719_v38  ;;  %v8733_v36 = vld [vmem:[#allocation4 + $0x360] ss:$36 sps:$4 sm:$0xff]  }
 0x293   : > { %4034 = vst [vmem:[#allocation4 + $0x37c] sm:$0xf] %v7286_v6  ;;  %4035 = vst [vmem:[#allocation4 + $0x3a0] sm:$0xf] %v7287_v40  ;;  %v8741_v9 = vld [vmem:[#allocation4 + $0x3ac] ss:$36 sps:$4 sm:$0xff]  }
 0x294   : > { %3811 = vst [vmem:[#allocation4 + $0x3f8] sm:$0xf] %v7318_v4  ;;  %3946 = vst [vmem:[#allocation4 + $0x3bc] sm:$0xf] %v7318_v4  ;;  %v8736_v52 = vld [vmem:[#allocation4 + $0x368] ss:$36 sps:$4 sm:$0xff]  }
 0x295   : > { %4081 = vst [vmem:[#allocation4 + $0x380] sm:$0xf] %v7318_v4  ;;  %3812 = vst [vmem:[#allocation4 + $0x41c] sm:$0xf] %v7319_v25  ;;  %v8748_v29 = vld [vmem:[#allocation4 + $0x3b4] ss:$36 sps:$4 sm:$0xff]  }
 0x296   : > { %3947 = vst [vmem:[#allocation4 + $0x3e0] sm:$0xf] %v7319_v25  ;;  %4082 = vst [vmem:[#allocation4 + $0x3a4] sm:$0xf] %v7319_v25  ;;  %v8739_v53 = vld [vmem:[#allocation4 + $0x3a8] ss:$36 sps:$4 sm:$0xff]  }
 0x297   : > { %3541 = vst [vmem:[#allocation4 + $0x43c] sm:$0xf] %v7288_v1  ;;  %3542 = vst [vmem:[#allocation4 + $0x460] sm:$0xf] %v7289_v21  ;;  %5690 = vmatmul.mubr.bf16.gmra.mxu0 %v8714_v20  ;;  %v8746_v48 = vld [vmem:[#allocation4 + $0x3b0] ss:$36 sps:$4 sm:$0xff]  }
 0x298   : > { %3901 = vst [vmem:[#allocation4 + $0x400] sm:$0xf] %v7288_v1  ;;  %3902 = vst [vmem:[#allocation4 + $0x424] sm:$0xf] %v7289_v21  ;;  %5697 = vmatprep.mubr.bf16.mxu0 %v8722_v55  ;;  %v8751_v5 = vld [vmem:[#allocation4 + $0x3f4] ss:$36 sps:$4 sm:$0xff]  }
 0x299   : > { %4036 = vst [vmem:[#allocation4 + $0x3c4] sm:$0xf] %v7288_v1  ;;  %4037 = vst [vmem:[#allocation4 + $0x3e8] sm:$0xf] %v7289_v21  ;;  %5537 = vmatmul.mubr.bf16.gmra.mxu1 %v8717_v42  ;;  %v8754_v43 = vld [vmem:[#allocation4 + $0x3fc] ss:$36 sps:$4 sm:$0xff]  }
 0x29a   : > { %3813 = vst [vmem:[#allocation4 + $0x440] sm:$0xf] %v7320_v47  ;;  %3853 = vst [vmem:[#allocation4 + $0x444] sm:$0xf] %v7322_v13  ;;  %5544 = vmatprep.mubr.bf16.mxu1 %v8725_v63  ;;  %v8749_v8 = vld [vmem:[#allocation4 + $0x3f0] ss:$36 sps:$4 sm:$0xff]   ;;  %v7712_v63 = vpop.f32.mrf.mxu1 }
 0x29b   : > { %3854 = vst [vmem:[#allocation4 + $0x468] sm:$0xf] %v7323_v32  ;;  %3948 = vst [vmem:[#allocation4 + $0x404] sm:$0xf] %v7320_v47  ;;  %v8755_v40 = vld [vmem:[#allocation4 + $0x438] ss:$36 sps:$4 sm:$0xff]  }
 0x29c   : > { %3988 = vst [vmem:[#allocation4 + $0x408] sm:$0xf] %v7322_v13  ;;  %3989 = vst [vmem:[#allocation4 + $0x42c] sm:$0xf] %v7323_v32  ;;  %v8752_v16 = vld [vmem:[#allocation4 + $0x3f8] ss:$36 sps:$4 sm:$0xff]  }
 0x29d   : > { %4083 = vst [vmem:[#allocation4 + $0x3c8] sm:$0xf] %v7320_v47  ;;  %3814 = vst [vmem:[#allocation4 + $0x464] sm:$0xf] %v7321_v58  ;;  %v8767_v3 = vld [vmem:[#allocation4 + $0x14] ss:$36 sps:$4 sm:$0xff]  }
 0x29e   : > { %3949 = vst [vmem:[#allocation4 + $0x428] sm:$0xf] %v7321_v58  ;;  %4084 = vst [vmem:[#allocation4 + $0x3ec] sm:$0xf] %v7321_v58  ;;  %v8757_v45 = vld [vmem:[#allocation4 + $0x43c] ss:$36 sps:$4 sm:$0xff]  }
 0x29f   : > { %4038 = vst [vmem:[#allocation4 + $0x40c] sm:$0xf] %v7324_v26  ;;  %4039 = vst [vmem:[#allocation4 + $0x430] sm:$0xf] %v7325_v54  ;;  %5698 = vmatmul.mubr.bf16.gmra.mxu0 %v8720_v30  ;;  %v8770_v23 = vld [vmem:[#allocation4 + $0x1c] ss:$36 sps:$4 sm:$0xff]  }
 0x2a0   : > { %3903 = vst [vmem:[#allocation4 + $0x448] sm:$0xf] %v7324_v26  ;;  %3904 = vst [vmem:[#allocation4 + $0x46c] sm:$0xf] %v7325_v54  ;;  %5705 = vmatprep.mubr.bf16.mxu0 %v8732_v46  ;;  %v8765_v11 = vld [vmem:[#allocation4 + $0x10] ss:$36 sps:$4 sm:$0xff]  }
 0x2a1   : > { %3950 = vst [vmem:[#allocation4 + $0x44c] sm:$0xf] %v7326_v61  ;;  %4085 = vst [vmem:[#allocation4 + $0x410] sm:$0xf] %v7326_v61  ;;  %5545 = vmatmul.mubr.bf16.gmra.mxu1 %v8723_v22  ;;  %v11155_v10 = vld [vmem:[#allocation3] sm:$0xff]  ;;  %v8888_v51 = vld [vmem:[#allocation5 + $0x238] sm:$0xff]  }
 0x2a2   : > { %3951 = vst [vmem:[#allocation4 + $0x470] sm:$0xf] %v7327_v49  ;;  %4086 = vst [vmem:[#allocation4 + $0x434] sm:$0xf] %v7327_v49  ;;  %5552 = vmatprep.mubr.bf16.mxu1 %v8735_v41  ;;  %v8764_v6 = vld [vmem:[#allocation4 + $0x444] ss:$36 sps:$4 sm:$0xff]   ;;  %v7328_v7 = vpack.c.bf16 %v11155_v10, %v11155_v10  ;;  %v7713_v41 = vpop.f32.mrf.mxu1 }
 0x2a3   : > { %v3995_v4 = vrot.slane %v11155_v10, 1  ;;  %v8773_v2 = vld [vmem:[#allocation4 + $0x5c] ss:$36 sps:$4 sm:$0xff]   ;;  %v8800_v28 = vld [vmem:[#allocation5 + $0x228] sm:$0xff]   ;;  %v8839_v60 = vld [vmem:[#allocation5 + $0x210] sm:$0xff]  }
 0x2a4   : > { %v8762_v39 = vld [vmem:[#allocation4 + $0x440] ss:$36 sps:$4 sm:$0xff]   ;;  %3990 = vst [vmem:[#allocation4 + $0x450] sm:$0xf] %v7328_v7  ;;  %3991 = vst [vmem:[#allocation4 + $0x474] sm:$0xf] %v7328_v7 }
 0x2a5   : > { %v7330_v25 = vpack.c.bf16 %v3995_v4, %v3995_v4  ;;  %v8768_v1 = vld [vmem:[#allocation4 + $0x18] ss:$36 sps:$4 sm:$0xff]   ;;  %v8889_v21 = vld [vmem:[%s11504_s5] sm:$0x3]  ;;  %v8777_v17 = vld [vmem:[#allocation4 + $0x64] ss:$36 sps:$4 sm:$0xff]  }
 0x2a6   : > { %v6238_v50 = vsel %vm738_vm3, %v8889_v21, 0  ;;  %v8771_v47 = vld [vmem:[#allocation4 + $0x58] ss:$36 sps:$4 sm:$0xff]   ;;  %v8813_v13 = vld [vmem:[#allocation5 + $0x220] sm:$0xff]   ;;  %v8783_v62 = vld [vmem:[#allocation4 + $0xac] ss:$36 sps:$4 sm:$0xff]  }
 0x2a7   : > { %5706 = vmatmul.mubr.bf16.gmra.mxu0 %v8730_v31  ;;  %4040 = vst [vmem:[#allocation4 + $0x454] sm:$0xf] %v7330_v25  ;;  %4041 = vst [vmem:[#allocation4 + $0x478] sm:$0xf] %v7330_v25  ;;  %v8780_v32 = vld [vmem:[#allocation4 + $0xa4] ss:$36 sps:$4 sm:$0xff]  }
 0x2a8   : > { %5713 = vmatprep.mubr.bf16.mxu0 %v8738_v12  ;;  %v8826_v35 = vld [vmem:[#allocation5 + $0x218] sm:$0xff]   ;;  %v8775_v58 = vld [vmem:[#allocation4 + $0x60] ss:$36 sps:$4 sm:$0xff]   ;;  %v8786_v18 = vld [vmem:[#allocation4 + $0xec] ss:$36 sps:$4 sm:$0xff]  }
 0x2a9   : > { %5553 = vmatmul.mubr.bf16.gmra.mxu1 %v8733_v36  ;;  %v8778_v19 = vld [vmem:[#allocation4 + $0xa0] ss:$36 sps:$4 sm:$0xff]   ;;  %v8852_v26 = vld [vmem:[#allocation5 + $0x208] sm:$0xff]   ;;  %v8790_v57 = vld [vmem:[#allocation4 + $0xf4] ss:$36 sps:$4 sm:$0xff]  }
 0x2aa   : > { %5560 = vmatprep.mubr.bf16.mxu1 %v8741_v9  ;;  %v8781_v54 = vld [vmem:[#allocation4 + $0xa8] ss:$36 sps:$4 sm:$0xff]   ;;  %v8865_v49 = vld [vmem:[#allocation5 + $0x200] sm:$0xff]   ;;  %v8793_v44 = vld [vmem:[#allocation4 + $0x134] ss:$36 sps:$4 sm:$0xff]  }
 0x2ab   : > { %v8784_v61 = vld [vmem:[#allocation4 + $0xe8] ss:$36 sps:$4 sm:$0xff]   ;;  %v8788_v0 = vld [vmem:[#allocation4 + $0xf0] ss:$36 sps:$4 sm:$0xff]   ;;  %v8796_v24 = vld [vmem:[#allocation4 + $0x13c] ss:$36 sps:$4 sm:$0xff]  }
 0x2ac   : > { %v8791_v37 = vld [vmem:[#allocation4 + $0x130] ss:$36 sps:$4 sm:$0xff]   ;;  %v8799_v34 = vld [vmem:[#allocation4 + $0x17c] ss:$36 sps:$4 sm:$0xff]   ;;  %v8803_v27 = vld [vmem:[#allocation4 + $0x184] ss:$36 sps:$4 sm:$0xff]  }
 0x2ad   : > { %v8794_v33 = vld [vmem:[#allocation4 + $0x138] ss:$36 sps:$4 sm:$0xff]   ;;  %v8806_v56 = vld [vmem:[#allocation4 + $0x1c4] ss:$36 sps:$4 sm:$0xff]   ;;  %v8809_v20 = vld [vmem:[#allocation4 + $0x1cc] ss:$36 sps:$4 sm:$0xff]  }
 0x2ae   : > { %v8797_v14 = vld [vmem:[#allocation4 + $0x178] ss:$36 sps:$4 sm:$0xff]   ;;  %v8801_v38 = vld [vmem:[#allocation4 + $0x180] ss:$36 sps:$4 sm:$0xff]   ;;  %v8812_v42 = vld [vmem:[#allocation4 + $0x20c] ss:$36 sps:$4 sm:$0xff]  }
 0x2af   : > { %5714 = vmatmul.mubr.bf16.gmra.mxu0 %v8736_v52  ;;  %v8804_v55 = vld [vmem:[#allocation4 + $0x1c0] ss:$36 sps:$4 sm:$0xff]   ;;  %v8807_v46 = vld [vmem:[#allocation4 + $0x1c8] ss:$36 sps:$4 sm:$0xff]   ;;  %v8816_v22 = vld [vmem:[#allocation4 + $0x214] ss:$36 sps:$4 sm:$0xff]  }
 0x2b0   : > { %5721 = vmatprep.mubr.bf16.mxu0 %v8748_v29  ;;  %v11167_v30 = vld [vmem:[%s11503_s4] ss:$0 sm:$0xff]  ;;  %v8810_v36 = vld [vmem:[#allocation4 + $0x208] ss:$36 sps:$4 sm:$0xff]   ;;  %v4042_v52 = vrot.slane %v11155_v10, 2 }
 0x2b1   : > { %5561 = vmatmul.mubr.bf16.gmra.mxu1 %v8739_v53  ;;  %v5459_v12 = vadd.f32 %v11153_v59, %v11167_v30  ;;  %v8819_v29 = vld [vmem:[#allocation4 + $0x254] ss:$36 sps:$4 sm:$0xff]   ;;  %v7714_v53 = vadd.f32 %v7713_v41, %v7712_v63  ;;  %v8822_v59 = vld [vmem:[#allocation4 + $0x25c] ss:$36 sps:$4 sm:$0xff]   ;;  %v8832_v21 = vld [vmem:[#allocation4 + $0x2e4] ss:$36 sps:$4 sm:$0xff]  }
 0x2b2   : > { %5568 = vmatprep.mubr.bf16.mxu1 %v8751_v5  ;;  %v8820_v4 = vld [vmem:[#allocation4 + $0x258] ss:$36 sps:$4 sm:$0xff]   ;;  %v8836_v63 = vld [vmem:[#allocation4 + $0x328] ss:$36 sps:$4 sm:$0xff]  }
 0x2b7   : > { %5722 = vmatmul.mubr.bf16.gmra.mxu0 %v8746_v48 }
 0x2b8   : > { %5729 = vmatprep.mubr.bf16.mxu0 %v8754_v43 }
 0x2b9   : > { %5569 = vmatmul.mubr.bf16.gmra.mxu1 %v8749_v8 }
 0x2ba   : > { %5576 = vmatprep.mubr.bf16.mxu1 %v8757_v45  ;;  %v8814_v45 = vld [vmem:[#allocation4 + $0x210] ss:$36 sps:$4 sm:$0xff]  }
 0x2bf   : > { %5730 = vmatmul.mubr.bf16.gmra.mxu0 %v8752_v16  ;;  %v5462_v16 = vadd.f32 %v7714_v53, %v11167_v30 }
 0x2c0   : > { %5737 = vmatprep.mubr.bf16.mxu0 %v8764_v6 }
 0x2c1   : > { %5577 = vmatmul.mubr.bf16.gmra.mxu1 %v8755_v40  ;;  %v7332_v40 = vpack.c.bf16 %v4042_v52, %v4042_v52 }
 0x2c2   : > { %5778 = vmatprep.mubr.bf16.mxu1 %v8767_v3 }
 0x2c3   : > { %4087 = vst [vmem:[#allocation4 + $0x458] sm:$0xf] %v7332_v40  ;;  %4088 = vst [vmem:[#allocation4 + $0x47c] sm:$0xf] %v7332_v40 }
 0x2c7   : > { %5738 = vmatmul.mubr.bf16.gmra.mxu0 %v8762_v39  ;;  %v8817_v39 = vld [vmem:[#allocation4 + $0x250] ss:$36 sps:$4 sm:$0xff]  }
 0x2c8   : > { %5939 = vmatprep.mubr.bf16.mxu0 %v8770_v23 }
 0x2c9   : > { %5779 = vmatmul.mubr.bf16.vlgmr.msra.gmra.mxu1 %v8765_v11  ;;  %v8825_v11 = vld [vmem:[#allocation4 + $0x29c] ss:$36 sps:$4 sm:$0xff]  }
 0x2ca   : > { %5786 = vmatprep.mubr.bf16.mxu1 %v8773_v2  ;;  %8489 = vmatpush3.bf16.msra.mxu1 %v8888_v51  ;;  %v8829_v2 = vld [vmem:[#allocation4 + $0x2a4] ss:$36 sps:$4 sm:$0xff]  }
 0x2cb   : > { %8490 = vmatprep.subr.bf16.mxu1 %v8787_v15 }
 0x2ce   : > { %8491 = vmatpush3.bf16.msra.mxu1 %v8787_v15 }
 0x2cf   : > { %5940 = vmatmul.mubr.bf16.vlgmr.msra.gmra.mxu0 %v8768_v1  ;;  %8492 = vmatprep.subr.bf16.mxu1 %v8800_v28  ;;  %v8823_v1 = vld [vmem:[#allocation4 + $0x298] ss:$36 sps:$4 sm:$0xff]  }
 0x2d0   : > { %8537 = vmatpush3.bf16.msra.mxu0 %v6238_v50  ;;  %5947 = vmatprep.mubr.bf16.mxu0 %v8777_v17 }
 0x2d1   : > { %5787 = vmatmul.mubr.bf16.gmra.mxu1 %v8771_v47 }
 0x2d2   : > { %5794 = vmatprep.mubr.bf16.mxu1 %v8780_v32  ;;  %8493 = vmatpush3.bf16.msra.mxu1 %v8800_v28  ;;  %v8827_v32 = vld [vmem:[#allocation4 + $0x2a0] ss:$36 sps:$4 sm:$0xff]  }
 0x2d3   : > { %8494 = vmatprep.subr.bf16.mxu1 %v8813_v13 }
 0x2d6   : > { %8495 = vmatpush3.bf16.msra.mxu1 %v8813_v13 }
 0x2d7   : > { %5948 = vmatmul.mubr.bf16.gmra.mxu0 %v8775_v58  ;;  %8496 = vmatprep.subr.bf16.mxu1 %v8826_v35 }
 0x2d8   : > { %5955 = vmatprep.mubr.bf16.mxu0 %v8783_v62  ;;  %v8835_v62 = vld [vmem:[#allocation4 + $0x2ec] ss:$36 sps:$4 sm:$0xff]  }
 0x2d9   : > { %5795 = vmatmul.mubr.bf16.gmra.mxu1 %v8778_v19 }
 0x2da   : > { %5802 = vmatprep.mubr.bf16.mxu1 %v8786_v18  ;;  %8497 = vmatpush3.bf16.msra.mxu1 %v8826_v35  ;;  %v7821_v31 = vpop.f32.mrf.mxu0 }
 0x2db   : > { %8498 = vmatprep.subr.bf16.mxu1 %v8839_v60 }
 0x2dc   : > { %v7822_v9 = vpop.f32.mrf.mxu0 }
 0x2dd   : > { %v7823_v5 = vadd.f32 %v7822_v9, %v7821_v31  ;;  %v8845_v31 = vld [vmem:[#allocation4 + $0x374] ss:$36 sps:$4 sm:$0xff]  }
 0x2de   : > { %8499 = vmatpush3.bf16.msra.mxu1 %v8839_v60  ;;  %v7824_v48 = vpop.f32.mrf.mxu0 }
 0x2df   : > { %5956 = vmatmul.mubr.bf16.gmra.mxu0 %v8781_v54  ;;  %8500 = vmatprep.subr.bf16.mxu1 %v8852_v26  ;;  %v11172_v43 = vadd.f32 %v7823_v5, %v5459_v12  ;;  %v8830_v54 = vld [vmem:[#allocation4 + $0x2e0] ss:$36 sps:$4 sm:$0xff]  }
 0x2e0   : > { %5963 = vmatprep.mubr.bf16.mxu0 %v8790_v57  ;;  %v7825_v8 = vpop.f32.mrf.mxu0 }
 0x2e1   : > { %5803 = vmatmul.mubr.bf16.gmra.mxu1 %v8784_v61  ;;  %v7826_v6 = vadd.f32 %v7825_v8, %v7824_v48  ;;  %v8848_v48 = vld [vmem:[#allocation4 + $0x37c] ss:$36 sps:$4 sm:$0xff]  }
 0x2e2   : > { %5810 = vmatprep.mubr.bf16.mxu1 %v8793_v44  ;;  %8501 = vmatpush3.bf16.msra.mxu1 %v8852_v26 }
 0x2e3   : > { %8502 = vmatprep.subr.bf16.mxu1 %v8865_v49  ;;  %v11175_v3 = vadd.f32 %v7826_v6, %v5462_v16 }
 0x2e6   : > { %8503 = vmatpush3.bf16.msra.mxu1 %v8865_v49  ;;  %v8838_v49 = vld [vmem:[#allocation4 + $0x32c] ss:$36 sps:$4 sm:$0xff]  }
 0x2e7   : > { %5964 = vmatmul.mubr.bf16.gmra.mxu0 %v8788_v0  ;;  %v7715_v23 = vpop.f32.mrf.mxu1 }
 0x2e8   : > { %5971 = vmatprep.mubr.bf16.mxu0 %v8796_v24 }
 0x2e9   : > { %5811 = vmatmul.mubr.bf16.gmra.mxu1 %v8791_v37  ;;  %v7716_v15 = vpop.f32.mrf.mxu1 }
 0x2ea   : > { %5818 = vmatprep.mubr.bf16.mxu1 %v8799_v34  ;;  %v7717_v10 = vadd.f32 %v7716_v15, %v7715_v23 }
 0x2eb   : > { %v7718_v7 = vpop.f32.mrf.mxu1 }
 0x2ec   : > { %v5467_v47 = vadd.f32 %v7717_v10, %v11167_v30 }
 0x2ed   : > { %v7719_v51 = vpop.f32.mrf.mxu1 }
 0x2ee   : > { %v7720_v25 = vadd.f32 %v7719_v51, %v7718_v7 }
 0x2ef   : > { %5972 = vmatmul.mubr.bf16.gmra.mxu0 %v8794_v33 }
 0x2f0   : > { %5979 = vmatprep.mubr.bf16.mxu0 %v8803_v27  ;;  %v7827_v50 = vpop.f32.mrf.mxu0  ;;  %v5470_v57 = vadd.f32 %v7720_v25, %v11167_v30 }
 0x2f1   : > { %5819 = vmatmul.mubr.bf16.gmra.mxu1 %v8797_v14  ;;  %v8833_v14 = vld [vmem:[#allocation4 + $0x2e8] ss:$36 sps:$4 sm:$0xff]  }
 0x2f2   : > { %5826 = vmatprep.mubr.bf16.mxu1 %v8806_v56  ;;  %v7828_v28 = vpop.f32.mrf.mxu0 }
 0x2f3   : > { %v7829_v13 = vadd.f32 %v7828_v28, %v7827_v50  ;;  %v8849_v28 = vld [vmem:[#allocation4 + $0x3b8] ss:$36 sps:$4 sm:$0xff]  }
 0x2f4   : > { %v7830_v35 = vpop.f32.mrf.mxu0 }
 0x2f5   : > { %v11178_v19 = vadd.f32 %v7829_v13, %v5467_v47 }
 0x2f6   : > { %v7721_v17 = vpop.f32.mrf.mxu1  ;;  %v7831_v18 = vpop.f32.mrf.mxu0 }
 0x2f7   : > { %5980 = vmatmul.mubr.bf16.gmra.mxu0 %v8801_v38  ;;  %v7832_v61 = vadd.f32 %v7831_v18, %v7830_v35  ;;  %v8842_v38 = vld [vmem:[#allocation4 + $0x334] ss:$36 sps:$4 sm:$0xff]  }
 0x2f8   : > { %5987 = vmatprep.mubr.bf16.mxu0 %v8809_v20  ;;  %v7722_v58 = vpop.f32.mrf.mxu1 }
 0x2f9   : > { %5827 = vmatmul.mubr.bf16.gmra.mxu1 %v8804_v55  ;;  %v7723_v60 = vadd.f32 %v7722_v58, %v7721_v17  ;;  %v11181_v24 = vadd.f32 %v7832_v61, %v5470_v57  ;;  %v8858_v58 = vld [vmem:[#allocation4 + $0x404] ss:$36 sps:$4 sm:$0xff]  }
 0x2fa   : > { %5834 = vmatprep.mubr.bf16.mxu1 %v8812_v42  ;;  %v7724_v26 = vpop.f32.mrf.mxu1  ;;  %v8853_v61 = vld [vmem:[#allocation4 + $0x3c0] ss:$36 sps:$4 sm:$0xff]  }
 0x2fb   : > { %v5475_v33 = vadd.f32 %v7723_v60, %v11167_v30 }
 0x2fc   : > { %v7725_v0 = vpop.f32.mrf.mxu1 }
 0x2fd   : > { %v7833_v44 = vpop.f32.mrf.mxu0  ;;  %v7726_v37 = vadd.f32 %v7725_v0, %v7724_v26 }
 0x2ff   : > { %5988 = vmatmul.mubr.bf16.gmra.mxu0 %v8807_v46  ;;  %v7834_v34 = vpop.f32.mrf.mxu0  ;;  %v5478_v46 = vadd.f32 %v7726_v37, %v11167_v30  ;;  %v8861_v37 = vld [vmem:[#allocation4 + $0x40c] ss:$36 sps:$4 sm:$0xff]  }
 0x300   : > { %5995 = vmatprep.mubr.bf16.mxu0 %v8816_v22  ;;  %v7835_v27 = vadd.f32 %v7834_v34, %v7833_v44 }
 0x301   : > { %5835 = vmatmul.mubr.bf16.gmra.mxu1 %v8810_v36  ;;  %v7836_v56 = vpop.f32.mrf.mxu0 }
 0x302   : > { %5842 = vmatprep.mubr.bf16.mxu1 %v8819_v29  ;;  %v11184_v20 = vadd.f32 %v7835_v27, %v5475_v33  ;;  %v8840_v29 = vld [vmem:[#allocation4 + $0x330] ss:$36 sps:$4 sm:$0xff]   ;;  %v8856_v33 = vld [vmem:[#allocation4 + $0x400] ss:$36 sps:$4 sm:$0xff]  }
 0x303   : > { %v7837_v42 = vpop.f32.mrf.mxu0 }
 0x304   : > { %v7838_v41 = vadd.f32 %v7837_v42, %v7836_v56 }
 0x305   : > { %v7727_v55 = vpop.f32.mrf.mxu1 }
 0x306   : > { %v11187_v36 = vadd.f32 %v7838_v41, %v5478_v46 }
 0x307   : > { %5996 = vmatmul.mubr.bf16.gmra.mxu0 %v8814_v45  ;;  %v7728_v22 = vpop.f32.mrf.mxu1  ;;  %v8843_v45 = vld [vmem:[#allocation4 + $0x370] ss:$36 sps:$4 sm:$0xff]  }
 0x308   : > { %6003 = vmatprep.mubr.bf16.mxu0 %v8822_v59  ;;  %v7729_v12 = vadd.f32 %v7728_v22, %v7727_v55  ;;  %v8851_v59 = vld [vmem:[#allocation4 + $0x3bc] ss:$36 sps:$4 sm:$0xff]  }
 0x309   : > { %5843 = vmatmul.mubr.bf16.gmra.mxu1 %v8817_v39  ;;  %v7730_v9 = vpop.f32.mrf.mxu1 }
 0x30a   : > { %5850 = vmatprep.mubr.bf16.mxu1 %v8825_v11  ;;  %v5483_v16 = vadd.f32 %v7729_v12, %v11167_v30  ;;  %v8859_v12 = vld [vmem:[#allocation4 + $0x408] ss:$36 sps:$4 sm:$0xff]  }
 0x30b   : > { %v7731_v52 = vpop.f32.mrf.mxu1 }
 0x30c   : > { %v7732_v5 = vadd.f32 %v7731_v52, %v7730_v9 }
 0x30e   : > { %v7839_v53 = vpop.f32.mrf.mxu0  ;;  %v5486_v15 = vadd.f32 %v7732_v5, %v11167_v30 }
 0x30f   : > { %6004 = vmatmul.mubr.bf16.gmra.mxu0 %v8820_v4  ;;  %v8846_v4 = vld [vmem:[#allocation4 + $0x378] ss:$36 sps:$4 sm:$0xff]  }
 0x310   : > { %6011 = vmatprep.mubr.bf16.mxu0 %v8829_v2  ;;  %v7840_v8 = vpop.f32.mrf.mxu0 }
 0x311   : > { %5851 = vmatmul.mubr.bf16.gmra.mxu1 %v8823_v1  ;;  %v7841_v6 = vadd.f32 %v7840_v8, %v7839_v53  ;;  %v8862_v8 = vld [vmem:[#allocation4 + $0x448] ss:$36 sps:$4 sm:$0xff]  }
 0x312   : > { %5858 = vmatprep.mubr.bf16.mxu1 %v8832_v21  ;;  %v7842_v40 = vpop.f32.mrf.mxu0  ;;  %v8855_v21 = vld [vmem:[#allocation4 + $0x3c4] ss:$36 sps:$4 sm:$0xff]  }
 0x313   : > { %v11190_v39 = vadd.f32 %v7841_v6, %v5483_v16 }
 0x314   : > { %v7733_v23 = vpop.f32.mrf.mxu1  ;;  %v7843_v11 = vpop.f32.mrf.mxu0 }
 0x315   : > { %v7844_v7 = vadd.f32 %v7843_v11, %v7842_v40 }
 0x316   : > { %v7734_v10 = vpop.f32.mrf.mxu1 }
 0x317   : > { %6012 = vmatmul.mubr.bf16.gmra.mxu0 %v8827_v32  ;;  %v7735_v2 = vadd.f32 %v7734_v10, %v7733_v23  ;;  %v11193_v25 = vadd.f32 %v7844_v7, %v5486_v15  ;;  %v8867_v7 = vld [vmem:[#allocation4 + $0x450] ss:$36 sps:$4 sm:$0xff]  }
 0x318   : > { %6019 = vmatprep.mubr.bf16.mxu0 %v8835_v62  ;;  %v7736_v1 = vpop.f32.mrf.mxu1 }
 0x319   : > { %5859 = vmatmul.mubr.bf16.gmra.mxu1 %v8830_v54  ;;  %v5491_v17 = vadd.f32 %v7735_v2, %v11167_v30 }
 0x31a   : > { %5866 = vmatprep.mubr.bf16.mxu1 %v8838_v49  ;;  %v7737_v47 = vpop.f32.mrf.mxu1 }
 0x31b   : > { %v7738_v32 = vadd.f32 %v7737_v47, %v7736_v1 }
 0x31c   : > { %v7845_v51 = vpop.f32.mrf.mxu0 }
 0x31d   : > { %v5494_v26 = vadd.f32 %v7738_v32, %v11167_v30  ;;  %v8870_v32 = vld [vmem:[#allocation4 + $0x68] ss:$36 sps:$4 sm:$0xff]  }
 0x31e   : > { %v7846_v50 = vpop.f32.mrf.mxu0 }
 0x31f   : > { %6020 = vmatmul.mubr.bf16.gmra.mxu0 %v8833_v14  ;;  %v7847_v13 = vadd.f32 %v7846_v50, %v7845_v51 }
 0x320   : > { %6027 = vmatprep.mubr.bf16.mxu0 %v8842_v38  ;;  %v7848_v35 = vpop.f32.mrf.mxu0  ;;  %v8864_v38 = vld [vmem:[#allocation4 + $0x44c] ss:$36 sps:$4 sm:$0xff]  }
 0x321   : > { %5867 = vmatmul.mubr.bf16.gmra.mxu1 %v8836_v63  ;;  %v11196_v62 = vadd.f32 %v7847_v13, %v5491_v17 }
 0x322   : > { %5874 = vmatprep.mubr.bf16.mxu1 %v8845_v31  ;;  %v7849_v18 = vpop.f32.mrf.mxu0  ;;  %v8869_v31 = vld [vmem:[#allocation4 + $0x454] ss:$36 sps:$4 sm:$0xff]  }
 0x323   : > { %v7850_v57 = vadd.f32 %v7849_v18, %v7848_v35  ;;  %v11777_v35 = vld [vmem:[#allocation8_spill] sm:$0xff]  ;;  %v8871_v18 = vld [vmem:[#allocation4 + $0xb0] ss:$36 sps:$4 sm:$0xff]  }
 0x325   : > { %v11199_v44 = vadd.f32 %v7850_v57, %v5494_v26 }
 0x327   : > { %6028 = vmatmul.mubr.bf16.gmra.mxu0 %v8840_v29 }
 0x328   : > { %6035 = vmatprep.mubr.bf16.mxu0 %v8848_v48 }
 0x329   : > { %5875 = vmatmul.mubr.bf16.gmra.mxu1 %v8843_v45  ;;  %v7739_v60 = vpop.f32.mrf.mxu1 }
 0x32a   : > { %5882 = vmatprep.mubr.bf16.mxu1 %v8851_v59  ;;  %v8866_v59 = vld [vmem:[#allocation4 + $0x20] ss:$36 sps:$4 sm:$0xff]  }
 0x32b   : > { %v7740_v54 = vpop.f32.mrf.mxu1 }
 0x32c   : > { %v7741_v49 = vadd.f32 %v7740_v54, %v7739_v60 }
 0x32d   : > { %v7742_v0 = vpop.f32.mrf.mxu1 }
 0x32e   : > { %v5499_v55 = vadd.f32 %v7741_v49, %v11167_v30 }
 0x32f   : > { %6036 = vmatmul.mubr.bf16.gmra.mxu0 %v8846_v4  ;;  %v7743_v27 = vpop.f32.mrf.mxu1 }
 0x330   : > { %6043 = vmatprep.mubr.bf16.mxu0 %v8855_v21  ;;  %v7744_v14 = vadd.f32 %v7743_v27, %v7742_v0 }
 0x331   : > { %5883 = vmatmul.mubr.bf16.gmra.mxu1 %v8849_v28  ;;  %v7851_v34 = vpop.f32.mrf.mxu0 }
 0x332   : > { %5890 = vmatprep.mubr.bf16.mxu1 %v8858_v58  ;;  %v5502_v29 = vadd.f32 %v7744_v14, %v11167_v30 }
 0x333   : > { %v7852_v56 = vpop.f32.mrf.mxu0 }
 0x334   : > { %v7853_v42 = vadd.f32 %v7852_v56, %v7851_v34 }
 0x335   : > { %v7854_v46 = vpop.f32.mrf.mxu0 }
 0x336   : > { %v11202_v22 = vadd.f32 %v7853_v42, %v5499_v55 }
 0x337   : > { %6044 = vmatmul.mubr.bf16.gmra.mxu0 %v8853_v61  ;;  %v7745_v63 = vpop.f32.mrf.mxu1  ;;  %v7855_v52 = vpop.f32.mrf.mxu0 }
 0x338   : > { %6051 = vmatprep.mubr.bf16.mxu0 %v8861_v37  ;;  %v7856_v53 = vadd.f32 %v7855_v52, %v7854_v46  ;;  %v11779_v46 = vld [vmem:[#allocation12_spill] sm:$0xff] }
 0x339   : > { %5891 = vmatmul.mubr.bf16.gmra.mxu1 %v8856_v33  ;;  %v7746_v41 = vpop.f32.mrf.mxu1 }
 0x33a   : > { %5898 = vmatprep.mubr.bf16.mxu1 %v8864_v38  ;;  %v7747_v9 = vadd.f32 %v7746_v41, %v7745_v63  ;;  %v11205_v45 = vadd.f32 %v7856_v53, %v5502_v29  ;;  %v11778_v38 = vld [vmem:[#allocation11_spill] sm:$0xff] }
 0x33b   : > { %v7748_v5 = vpop.f32.mrf.mxu1  ;;  %v8872_v63 = vld [vmem:[#allocation4 + $0xf8] ss:$36 sps:$4 sm:$0xff]  }
 0x33c   : > { %v5507_v23 = vadd.f32 %v7747_v9, %v11167_v30 }
 0x33d   : > { %v7749_v16 = vpop.f32.mrf.mxu1 }
 0x33e   : > { %v7750_v6 = vadd.f32 %v7749_v16, %v7748_v5 }
 0x33f   : > { %v7857_v48 = vpop.f32.mrf.mxu0  ;;  %6052 = vmatmul.mubr.bf16.gmra.mxu0 %v8859_v12  ;;  %v8873_v12 = vld [vmem:[#allocation4 + $0x140] ss:$36 sps:$4 sm:$0xff]  }
 0x340   : > { %6059 = vmatprep.mubr.bf16.mxu0 %v8869_v31  ;;  %v7751_v15 = vpop.f32.mrf.mxu1  ;;  %v5510_v21 = vadd.f32 %v7750_v6, %v11167_v30 }
 0x341   : > { %v7858_v40 = vpop.f32.mrf.mxu0  ;;  %5899 = vmatmul.mubr.bf16.gmra.mxu1 %v8862_v8 }
 0x342   : > { %v7859_v11 = vadd.f32 %v7858_v40, %v7857_v48  ;;  %8504 = vmatprep.mubr.bf16.mxu1 %v8866_v59  ;;  %v7752_v2 = vpop.f32.mrf.mxu1 }
 0x343   : > { %v7860_v10 = vpop.f32.mrf.mxu0  ;;  %v7753_v51 = vadd.f32 %v7752_v2, %v7751_v15  ;;  %v11781_v2 = vld [vmem:[#allocation17_spill] sm:$0xff] }
 0x344   : > { %v11208_v4 = vadd.f32 %v7859_v11, %v5507_v23  ;;  %v7754_v28 = vpop.f32.mrf.mxu1  ;;  %v11780_v11 = vld [vmem:[#allocation16_spill] sm:$0xff] }
 0x345   : > { %v7861_v1 = vpop.f32.mrf.mxu0  ;;  %v5515_v26 = vadd.f32 %v7753_v51, %v11167_v30 }
 0x346   : > { %v7862_v50 = vadd.f32 %v7861_v1, %v7860_v10  ;;  %v7755_v13 = vpop.f32.mrf.mxu1 }
 0x347   : > { %v7863_v17 = vpop.f32.mrf.mxu0  ;;  %6060 = vmatmul.mubr.bf16.gmra.mxu0 %v8867_v7  ;;  %v7756_v58 = vadd.f32 %v7755_v13, %v7754_v28  ;;  %v8874_v7 = vld [vmem:[#allocation4 + $0x188] ss:$36 sps:$4 sm:$0xff]  }
 0x348   : > { %v11211_v47 = vadd.f32 %v7862_v50, %v5510_v21  ;;  %8538 = vmatprep.mubr.msk.bf16.mxu0 %vm295_vm0, %v11777_v35  ;;  %v8875_v21 = vld [vmem:[#allocation4 + $0x1d0] ss:$36 sps:$4 sm:$0xff]  }
 0x349   : > { %v7864_v60 = vpop.f32.mrf.mxu0  ;;  %v7757_v57 = vpop.f32.mrf.mxu1  ;;  %8505 = vmatmul.mubr.bf16.vlgmr.msra.gmra.mxu1 %v8870_v32  ;;  %v5518_v33 = vadd.f32 %v7756_v58, %v11167_v30 }
 0x34a   : > { %v7865_v54 = vadd.f32 %v7864_v60, %v7863_v17  ;;  %8508 = vmatprep.mubr.bf16.mxu1 %v8871_v18 }
 0x34b   : > { %v7866_v61 = vpop.f32.mrf.mxu0  ;;  %v7758_v0 = vpop.f32.mrf.mxu1 }
 0x34c   : > { %v11216_v49 = vadd.f32 %v7865_v54, %v5515_v26  ;;  %v7759_v37 = vadd.f32 %v7758_v0, %v7757_v57 }
 0x34d   : > { %v7867_v34 = vpop.f32.mrf.mxu0  ;;  %v7760_v14 = vpop.f32.mrf.mxu1 }
 0x34e   : > { %v7868_v27 = vadd.f32 %v7867_v34, %v7866_v61  ;;  %v5523_v9 = vadd.f32 %v7759_v37, %v11167_v30  ;;  %v11782_v61 = vld [vmem:[#allocation20_spill] sm:$0xff]  ;;  %v8876_v34 = vld [vmem:[#allocation4 + $0x218] ss:$36 sps:$4 sm:$0xff]  }
 0x34f   : > { %v7869_v56 = vpop.f32.mrf.mxu0  ;;  %8539 = vmatmul.mubr.msk.bf16.vlgmr.msra.gmra.mxu0 %vm295_vm0, %v11778_v38  ;;  %v7761_v42 = vpop.f32.mrf.mxu1 }
 0x350   : > { %v11221_v55 = vadd.f32 %v7868_v27, %v5518_v33  ;;  %8542 = vmatprep.mubr.msk.bf16.mxu0 %vm295_vm0, %v11779_v46  ;;  %v7762_v41 = vadd.f32 %v7761_v42, %v7760_v14  ;;  %v11783_v33 = vld [vmem:[#allocation22_spill] sm:$0xff] }
 0x351   : > { %v7870_v31 = vpop.f32.mrf.mxu0  ;;  %v7763_v29 = vpop.f32.mrf.mxu1  ;;  %8509 = vmatmul.mubr.bf16.gmra.mxu1 %v8872_v63 }
 0x352   : > { %v7871_v52 = vadd.f32 %v7870_v31, %v7869_v56  ;;  %8512 = vmatprep.mubr.bf16.mxu1 %v8873_v12  ;;  %v5526_v6 = vadd.f32 %v7762_v41, %v11167_v30  ;;  %v8877_v56 = vld [vmem:[#allocation4 + $0x260] ss:$36 sps:$4 sm:$0xff]  }
 0x353   : > { %v7872_v53 = vpop.f32.mrf.mxu0  ;;  %v7764_v48 = vpop.f32.mrf.mxu1 }
 0x354   : > { %v11226_v5 = vadd.f32 %v7871_v52, %v5523_v9  ;;  %v7765_v8 = vadd.f32 %v7764_v48, %v7763_v29 }
 0x355   : > { %v7873_v16 = vpop.f32.mrf.mxu0  ;;  %v7766_v59 = vpop.f32.mrf.mxu1 }
 0x356   : > { %v7874_v40 = vadd.f32 %v7873_v16, %v7872_v53  ;;  %v5531_v50 = vadd.f32 %v7765_v8, %v11167_v30  ;;  %v11784_v8 = vld [vmem:[#allocation9_spill] sm:$0xff] }
 0x357   : > { %v7875_v23 = vpop.f32.mrf.mxu0  ;;  %8543 = vmatmul.mubr.msk.bf16.gmra.mxu0 %vm295_vm0, %v11780_v11  ;;  %v7767_v10 = vpop.f32.mrf.mxu1 }
 0x358   : > { %v11231_v15 = vadd.f32 %v7874_v40, %v5526_v6  ;;  %8546 = vmatprep.mubr.msk.bf16.mxu0 %vm295_vm0, %v11781_v2  ;;  %v7768_v51 = vadd.f32 %v7767_v10, %v7766_v59  ;;  %v8878_v40 = vld [vmem:[#allocation4 + $0x2a8] ss:$36 sps:$4 sm:$0xff]   ;;  %v11785_v59 = vld [vmem:[#allocation10_spill] sm:$0xff] }
 0x359   : > { %v7876_v1 = vpop.f32.mrf.mxu0  ;;  %v7769_v17 = vpop.f32.mrf.mxu1  ;;  %8513 = vmatmul.mubr.bf16.gmra.mxu1 %v8874_v7  ;;  %v8879_v10 = vld [vmem:[#allocation4 + $0x2f0] ss:$36 sps:$4 sm:$0xff]  }
 0x35a   : > { %v7877_v28 = vadd.f32 %v7876_v1, %v7875_v23  ;;  %8516 = vmatprep.mubr.bf16.mxu1 %v8875_v21  ;;  %v5534_v18 = vadd.f32 %v7768_v51, %v11167_v30 }
 0x35b   : > { %v7878_v13 = vpop.f32.mrf.mxu0  ;;  %v7770_v35 = vpop.f32.mrf.mxu1 }
 0x35c   : > { %v11236_v32 = vadd.f32 %v7877_v28, %v5531_v50  ;;  %v7771_v58 = vadd.f32 %v7770_v35, %v7769_v17 }
 0x35d   : > { %v7879_v60 = vpop.f32.mrf.mxu0  ;;  %v7772_v54 = vpop.f32.mrf.mxu1 }
 0x35e   : > { %v7880_v26 = vadd.f32 %v7879_v60, %v7878_v13  ;;  %v5539_v38 = vadd.f32 %v7771_v58, %v11167_v30 }
 0x35f   : > { %v7881_v57 = vpop.f32.mrf.mxu0  ;;  %8547 = vmatmul.mubr.msk.bf16.gmra.mxu0 %vm295_vm0, %v11782_v61  ;;  %v7773_v37 = vpop.f32.mrf.mxu1  ;;  %v11787_v61 = vld [vmem:[#allocation14_spill] sm:$0xff] }
 0x360   : > { %v11241_v0 = vadd.f32 %v7880_v26, %v5534_v18  ;;  %8550 = vmatprep.mubr.msk.bf16.mxu0 %vm295_vm0, %v11783_v33  ;;  %v7774_v27 = vadd.f32 %v7773_v37, %v7772_v54  ;;  %v11786_v18 = vld [vmem:[#allocation13_spill] sm:$0xff]  ;;  %v8881_v33 = vld [vmem:[#allocation4 + $0x380] ss:$36 sps:$4 sm:$0xff]  }
 0x361   : > { %v7882_v14 = vpop.f32.mrf.mxu0  ;;  %v7775_v63 = vpop.f32.mrf.mxu1  ;;  %8517 = vmatmul.mubr.bf16.gmra.mxu1 %v8876_v34 }
 0x362   : > { %v7883_v42 = vadd.f32 %v7882_v14, %v7881_v57  ;;  %8520 = vmatprep.mubr.bf16.mxu1 %v8877_v56  ;;  %v5542_v52 = vadd.f32 %v7774_v27, %v11167_v30  ;;  %v8880_v57 = vld [vmem:[#allocation4 + $0x338] ss:$36 sps:$4 sm:$0xff]  }
 0x363   : > { %v7884_v46 = vpop.f32.mrf.mxu0  ;;  %v7776_v31 = vpop.f32.mrf.mxu1 }
 0x364   : > { %v11246_v41 = vadd.f32 %v7883_v42, %v5539_v38  ;;  %v7777_v12 = vadd.f32 %v7776_v31, %v7775_v63 }
 0x365   : > { %v7885_v9 = vpop.f32.mrf.mxu0  ;;  %v7778_v53 = vpop.f32.mrf.mxu1 }
 0x366   : > { %v7886_v29 = vadd.f32 %v7885_v9, %v7884_v46  ;;  %v5547_v7 = vadd.f32 %v7777_v12, %v11167_v30 }
 0x367   : > { %v7887_v48 = vpop.f32.mrf.mxu0  ;;  %8551 = vmatmul.mubr.msk.bf16.gmra.mxu0 %vm295_vm0, %v11784_v8  ;;  %v7779_v6 = vpop.f32.mrf.mxu1 }
 0x368   : > { %v11251_v16 = vadd.f32 %v7886_v29, %v5542_v52  ;;  %8554 = vmatprep.mubr.msk.bf16.mxu0 %vm295_vm0, %v11785_v59  ;;  %v7780_v23 = vadd.f32 %v7779_v6, %v7778_v53  ;;  %v11788_v53 = vld [vmem:[#allocation18_spill] sm:$0xff]  ;;  %v8882_v6 = vld [vmem:[#allocation4 + $0x3c8] ss:$36 sps:$4 sm:$0xff]  }
 0x369   : > { %v7888_v11 = vpop.f32.mrf.mxu0  ;;  %v7781_v51 = vpop.f32.mrf.mxu1  ;;  %8521 = vmatmul.mubr.bf16.gmra.mxu1 %v8878_v40  ;;  %v11789_v40 = vld [vmem:[#allocation19_spill] sm:$0xff] }
 0x36a   : > { %v7889_v2 = vadd.f32 %v7888_v11, %v7887_v48  ;;  %8524 = vmatprep.mubr.bf16.mxu1 %v8879_v10  ;;  %v5550_v13 = vadd.f32 %v7780_v23, %v11167_v30  ;;  %v8883_v11 = vld [vmem:[#allocation4 + $0x410] ss:$36 sps:$4 sm:$0xff]  }
 0x36b   : > { %v7890_v1 = vpop.f32.mrf.mxu0  ;;  %v7782_v50 = vpop.f32.mrf.mxu1 }
 0x36c   : > { %v11256_v21 = vadd.f32 %v7889_v2, %v5547_v7  ;;  %v7783_v28 = vadd.f32 %v7782_v50, %v7781_v51 }
 0x36d   : > { %v7891_v17 = vpop.f32.mrf.mxu0  ;;  %v7784_v58 = vpop.f32.mrf.mxu1 }
 0x36e   : > { %v7892_v35 = vadd.f32 %v7891_v17, %v7890_v1  ;;  %v5555_v27 = vadd.f32 %v7783_v28, %v11167_v30 }
 0x36f   : > { %v7893_v60 = vpop.f32.mrf.mxu0  ;;  %8555 = vmatmul.mubr.msk.bf16.gmra.mxu0 %vm295_vm0, %v11786_v18  ;;  %v7785_v54 = vpop.f32.mrf.mxu1 }
 0x370   : > { %v11261_v26 = vadd.f32 %v7892_v35, %v5550_v13  ;;  %8558 = vmatprep.mubr.msk.bf16.mxu0 %vm295_vm0, %v11787_v61  ;;  %v7786_v37 = vadd.f32 %v7785_v54, %v7784_v58  ;;  %v11790_v54 = vld [vmem:[#allocation21_spill] sm:$0xff] }
 0x371   : > { %v7894_v34 = vpop.f32.mrf.mxu0  ;;  %v7787_v56 = vpop.f32.mrf.mxu1  ;;  %8525 = vmatmul.mubr.bf16.gmra.mxu1 %v8880_v57 }
 0x372   : > { %v7895_v14 = vadd.f32 %v7894_v34, %v7893_v60  ;;  %8528 = vmatprep.mubr.bf16.mxu1 %v8881_v33  ;;  %v5558_v12 = vadd.f32 %v7786_v37, %v11167_v30  ;;  %v8884_v60 = vld [vmem:[#allocation4 + $0x458] ss:$36 sps:$4 sm:$0xff]   ;;  %v11791_v37 = vld [vmem:[#allocation24_spill] sm:$0xff] }
 0x373   : > { %v7896_v38 = vpop.f32.mrf.mxu0  ;;  %v7788_v63 = vpop.f32.mrf.mxu1 }
 0x374   : > { %v11266_v42 = vadd.f32 %v7895_v14, %v5555_v27  ;;  %v7789_v46 = vadd.f32 %v7788_v63, %v7787_v56 }
 0x375   : > { %v7897_v31 = vpop.f32.mrf.mxu0  ;;  %v7790_v52 = vpop.f32.mrf.mxu1 }
 0x376   : > { %v7898_v9 = vadd.f32 %v7897_v31, %v7896_v38  ;;  %v5563_v10 = vadd.f32 %v7789_v46, %v11167_v30 }
 0x377   : > { %v7899_v29 = vpop.f32.mrf.mxu0  ;;  %8559 = vmatmul.mubr.msk.bf16.gmra.mxu0 %vm295_vm0, %v11788_v53  ;;  %v7791_v8 = vpop.f32.mrf.mxu1 }
 0x378   : > { %v11271_v48 = vadd.f32 %v7898_v9, %v5558_v12  ;;  %8562 = vmatprep.mubr.msk.bf16.mxu0 %vm295_vm0, %v11789_v40  ;;  %v7792_v59 = vadd.f32 %v7791_v8, %v7790_v52  ;;  %v11792_v8 = vld [vmem:[#allocation15_spill] sm:$0xff] }
 0x379   : > { %v7900_v23 = vpop.f32.mrf.mxu0  ;;  %v7793_v2 = vpop.f32.mrf.mxu1  ;;  %8529 = vmatmul.mubr.bf16.gmra.mxu1 %v8882_v6 }
 0x37a   : > { %v7901_v7 = vadd.f32 %v7900_v23, %v7899_v29  ;;  %8532 = vmatprep.mubr.bf16.mxu1 %v8883_v11  ;;  %v5566_v13 = vadd.f32 %v7792_v59, %v11167_v30 }
 0x37b   : > { %v7902_v51 = vpop.f32.mrf.mxu0  ;;  %v7794_v50 = vpop.f32.mrf.mxu1 }
 0x37c   : > { %v11276_v1 = vadd.f32 %v7901_v7, %v5563_v10  ;;  %v7795_v28 = vadd.f32 %v7794_v50, %v7793_v2 }
 0x37d   : > { %v7903_v17 = vpop.f32.mrf.mxu0  ;;  %v7796_v58 = vpop.f32.mrf.mxu1 }
 0x37e   : > { %v7904_v35 = vadd.f32 %v7903_v17, %v7902_v51  ;;  %v5571_v27 = vadd.f32 %v7795_v28, %v11167_v30 }
 0x37f   : > { %v7905_v18 = vpop.f32.mrf.mxu0  ;;  %8563 = vmatmul.mubr.msk.bf16.gmra.mxu0 %vm295_vm0, %v11790_v54  ;;  %v7797_v61 = vpop.f32.mrf.mxu1 }
 0x380   : > { %v11281_v57 = vadd.f32 %v7904_v35, %v5566_v13  ;;  %8566 = vmatprep.mubr.msk.bf16.mxu0 %vm295_vm0, %v11791_v37  ;;  %v7798_v34 = vadd.f32 %v7797_v61, %v7796_v58 }
 0x381   : > { %v7906_v33 = vpop.f32.mrf.mxu0  ;;  %v7799_v56 = vpop.f32.mrf.mxu1  ;;  %8533 = vmatmul.mubr.bf16.gmra.mxu1 %v8884_v60 }
 0x382   : > { %v7907_v14 = vadd.f32 %v7906_v33, %v7905_v18  ;;  %v5574_v9 = vadd.f32 %v7798_v34, %v11167_v30 }
 0x383   : > { %v7908_v38 = vpop.f32.mrf.mxu0  ;;  %v7800_v46 = vpop.f32.mrf.mxu1 }
 0x384   : > { %v11286_v63 = vadd.f32 %v7907_v14, %v5571_v27  ;;  %v7801_v31 = vadd.f32 %v7800_v46, %v7799_v56 }
 0x385   : > { %v7909_v12 = vpop.f32.mrf.mxu0  ;;  %v7802_v29 = vpop.f32.mrf.mxu1 }
 0x386   : > { %v7910_v52 = vadd.f32 %v7909_v12, %v7908_v38  ;;  %v5579_v11 = vadd.f32 %v7801_v31, %v11167_v30 }
 0x387   : > { %v7911_v53 = vpop.f32.mrf.mxu0  ;;  %8567 = vmatmul.mubr.msk.bf16.gmra.mxu0 %vm295_vm0, %v11792_v8  ;;  %v7803_v40 = vpop.f32.mrf.mxu1 }
 0x388   : > { %v11291_v6 = vadd.f32 %v7910_v52, %v5574_v9  ;;  %v7804_v59 = vadd.f32 %v7803_v40, %v7802_v29 }
 0x389   : > { %v7912_v23 = vpop.f32.mrf.mxu0  ;;  %v7933_v7 = vpop.f32.mrf.mxu1 }
 0x38a   : > { %v7913_v10 = vadd.f32 %v7912_v23, %v7911_v53  ;;  %v5582_v13 = vadd.f32 %v7804_v59, %v11167_v30 }
 0x38b   : > { %v7914_v2 = vpop.f32.mrf.mxu0  ;;  %v7934_v50 = vpop.f32.mrf.mxu1 }
 0x38c   : > { %v11294_v51 = vadd.f32 %v7913_v10, %v5579_v11  ;;  %v7935_v28 = vadd.f32 %v7934_v50, %v7933_v7 }
 0x38d   : > { %v7915_v17 = vpop.f32.mrf.mxu0  ;;  %v7936_v58 = vpop.f32.mrf.mxu1 }
 0x38e   : > { %v7916_v35 = vadd.f32 %v7915_v17, %v7914_v2  ;;  %v5781_v60 = vadd.f32 %v7935_v28, %v11172_v43 }
 0x38f   : > { %v8045_v18 = vpop.f32.mrf.mxu0  ;;  %v7937_v61 = vpop.f32.mrf.mxu1 }
 0x390   : > { %v11298_v54 = vadd.f32 %v7916_v35, %v5582_v13  ;;  %v7938_v37 = vadd.f32 %v7937_v61, %v7936_v58 }
 0x391   : > { %v8046_v34 = vpop.f32.mrf.mxu0  ;;  %v7939_v27 = vpop.f32.mrf.mxu1 }
 0x392   : > { %v8047_v33 = vadd.f32 %v8046_v34, %v8045_v18  ;;  %v5784_v14 = vadd.f32 %v7938_v37, %v11175_v3 }
 0x393   : > { %v8048_v56 = vpop.f32.mrf.mxu0  ;;  %v7940_v38 = vpop.f32.mrf.mxu1 }
 0x394   : > { %v11301_v46 = vadd.f32 %v8047_v33, %v5781_v60  ;;  %v7941_v31 = vadd.f32 %v7940_v38, %v7939_v27 }
 0x395   : > { %v8049_v30 = vpop.f32.mrf.mxu0  ;;  %v7942_v9 = vpop.f32.mrf.mxu1 }
 0x396   : > { %v8050_v12 = vadd.f32 %v8049_v30, %v8048_v56  ;;  %v5789_v43 = vadd.f32 %v7941_v31, %v11178_v19 }
 0x397   : > { %v8051_v52 = vpop.f32.mrf.mxu0  ;;  %v7943_v29 = vpop.f32.mrf.mxu1 }
 0x398   : > { %v11304_v53 = vadd.f32 %v8050_v12, %v5784_v14  ;;  %v7944_v8 = vadd.f32 %v7943_v29, %v7942_v9 }
 0x399   : > { %v8052_v40 = vpop.f32.mrf.mxu0  ;;  %v7945_v23 = vpop.f32.mrf.mxu1 }
 0x39a   : > { %v8053_v59 = vadd.f32 %v8052_v40, %v8051_v52  ;;  %v5792_v3 = vadd.f32 %v7944_v8, %v11181_v24 }
 0x39b   : > { %v8054_v11 = vpop.f32.mrf.mxu0  ;;  %v7946_v10 = vpop.f32.mrf.mxu1 }
 0x39c   : > { %v11307_v7 = vadd.f32 %v8053_v59, %v5789_v43  ;;  %v7947_v2 = vadd.f32 %v7946_v10, %v7945_v23 }
 0x39d   : > { %v8055_v50 = vpop.f32.mrf.mxu0  ;;  %v7948_v17 = vpop.f32.mrf.mxu1 }
 0x39e   : > { %v8056_v28 = vadd.f32 %v8055_v50, %v8054_v11  ;;  %v5797_v19 = vadd.f32 %v7947_v2, %v11184_v20 }
 0x39f   : > { %v8057_v13 = vpop.f32.mrf.mxu0  ;;  %v7949_v35 = vpop.f32.mrf.mxu1 }
 0x3a0   : > { %v11310_v58 = vadd.f32 %v8056_v28, %v5792_v3  ;;  %v7950_v60 = vadd.f32 %v7949_v35, %v7948_v17 }
 0x3a1   : > { %v8058_v18 = vpop.f32.mrf.mxu0  ;;  %v7951_v37 = vpop.f32.mrf.mxu1 }
 0x3a2   : > { %v8059_v61 = vadd.f32 %v8058_v18, %v8057_v13  ;;  %v5800_v24 = vadd.f32 %v7950_v60, %v11187_v36 }
 0x3a3   : > { %v8060_v34 = vpop.f32.mrf.mxu0  ;;  %v7952_v33 = vpop.f32.mrf.mxu1 }
 0x3a4   : > { %v11313_v27 = vadd.f32 %v8059_v61, %v5797_v19  ;;  %v7953_v14 = vadd.f32 %v7952_v33, %v7951_v37 }
 0x3a5   : > { %v8061_v56 = vpop.f32.mrf.mxu0  ;;  %v7954_v31 = vpop.f32.mrf.mxu1 }
 0x3a6   : > { %v8062_v38 = vadd.f32 %v8061_v56, %v8060_v34  ;;  %v5805_v20 = vadd.f32 %v7953_v14, %v11190_v39 }
 0x3a7   : > { %v8063_v30 = vpop.f32.mrf.mxu0  ;;  %v7955_v12 = vpop.f32.mrf.mxu1 }
 0x3a8   : > { %v11316_v9 = vadd.f32 %v8062_v38, %v5800_v24  ;;  %v7956_v43 = vadd.f32 %v7955_v12, %v7954_v31 }
 0x3a9   : > { %v8064_v52 = vpop.f32.mrf.mxu0  ;;  %v7957_v8 = vpop.f32.mrf.mxu1 }
 0x3aa   : > { %v8065_v29 = vadd.f32 %v8064_v52, %v8063_v30  ;;  %v5808_v36 = vadd.f32 %v7956_v43, %v11193_v25 }
 0x3ab   : > { %v8066_v40 = vpop.f32.mrf.mxu0  ;;  %v7958_v59 = vpop.f32.mrf.mxu1 }
 0x3ac   : > { %v11319_v23 = vadd.f32 %v8065_v29, %v5805_v20  ;;  %v7959_v3 = vadd.f32 %v7958_v59, %v7957_v8 }
 0x3ad   : > { %v8067_v11 = vpop.f32.mrf.mxu0  ;;  %v7960_v2 = vpop.f32.mrf.mxu1 }
 0x3ae   : > { %v8068_v10 = vadd.f32 %v8067_v11, %v8066_v40  ;;  %v5813_v39 = vadd.f32 %v7959_v3, %v11196_v62 }
 0x3af   : > { %v8069_v50 = vpop.f32.mrf.mxu0  ;;  %v7961_v28 = vpop.f32.mrf.mxu1 }
 0x3b0   : > { %v11322_v17 = vadd.f32 %v8068_v10, %v5808_v36  ;;  %v7962_v19 = vadd.f32 %v7961_v28, %v7960_v2 }
 0x3b1   : > { %v8070_v13 = vpop.f32.mrf.mxu0  ;;  %v7963_v60 = vpop.f32.mrf.mxu1 }
 0x3b2   : > { %v8071_v35 = vadd.f32 %v8070_v13, %v8069_v50  ;;  %v5816_v25 = vadd.f32 %v7962_v19, %v11199_v44 }
 0x3b3   : > { %v8072_v18 = vpop.f32.mrf.mxu0  ;;  %v7964_v61 = vpop.f32.mrf.mxu1 }
 0x3b4   : > { %v11325_v37 = vadd.f32 %v8071_v35, %v5813_v39  ;;  %v7965_v24 = vadd.f32 %v7964_v61, %v7963_v60 }
 0x3b5   : > { %v8073_v34 = vpop.f32.mrf.mxu0  ;;  %v7966_v14 = vpop.f32.mrf.mxu1 }
 0x3b6   : > { %v8074_v33 = vadd.f32 %v8073_v34, %v8072_v18  ;;  %v5821_v62 = vadd.f32 %v7965_v24, %v11202_v22 }
 0x3b7   : > { %v8075_v56 = vpop.f32.mrf.mxu0  ;;  %v7967_v38 = vpop.f32.mrf.mxu1 }
 0x3b8   : > { %v11328_v31 = vadd.f32 %v8074_v33, %v5816_v25  ;;  %v7968_v20 = vadd.f32 %v7967_v38, %v7966_v14 }
 0x3b9   : > { %v8076_v30 = vpop.f32.mrf.mxu0  ;;  %v7969_v43 = vpop.f32.mrf.mxu1 }
 0x3ba   : > { %v8077_v12 = vadd.f32 %v8076_v30, %v8075_v56  ;;  %v5824_v44 = vadd.f32 %v7968_v20, %v11205_v45 }
 0x3bb   : > { %v8078_v52 = vpop.f32.mrf.mxu0  ;;  %v7970_v29 = vpop.f32.mrf.mxu1 }
 0x3bc   : > { %v11331_v8 = vadd.f32 %v8077_v12, %v5821_v62  ;;  %v7971_v36 = vadd.f32 %v7970_v29, %v7969_v43 }
 0x3bd   : > { %v8079_v40 = vpop.f32.mrf.mxu0  ;;  %v7972_v3 = vpop.f32.mrf.mxu1 }
 0x3be   : > { %v8080_v59 = vadd.f32 %v8079_v40, %v8078_v52  ;;  %v5829_v22 = vadd.f32 %v7971_v36, %v11208_v4 }
 0x3bf   : > { %v8081_v11 = vpop.f32.mrf.mxu0  ;;  %v7973_v10 = vpop.f32.mrf.mxu1 }
 0x3c0   : > { %v11334_v2 = vadd.f32 %v8080_v59, %v5824_v44  ;;  %v7974_v39 = vadd.f32 %v7973_v10, %v7972_v3 }
 0x3c1   : > { %v8082_v50 = vpop.f32.mrf.mxu0  ;;  %v7975_v19 = vpop.f32.mrf.mxu1 }
 0x3c2   : > { %v8083_v28 = vadd.f32 %v8082_v50, %v8081_v11  ;;  %v5832_v45 = vadd.f32 %v7974_v39, %v11211_v47 }
 0x3c3   : > { %v8084_v13 = vpop.f32.mrf.mxu0  ;;  %v7976_v35 = vpop.f32.mrf.mxu1 }
 0x3c4   : > { %v11337_v60 = vadd.f32 %v8083_v28, %v5829_v22  ;;  %v7977_v25 = vadd.f32 %v7976_v35, %v7975_v19 }
 0x3c5   : > { %v8085_v18 = vpop.f32.mrf.mxu0  ;;  %v7978_v24 = vpop.f32.mrf.mxu1 }
 0x3c6   : > { %v8086_v61 = vadd.f32 %v8085_v18, %v8084_v13  ;;  %v5837_v4 = vadd.f32 %v7977_v25, %v11216_v49 }
 0x3c7   : > { %v8087_v34 = vpop.f32.mrf.mxu0  ;;  %v7979_v33 = vpop.f32.mrf.mxu1 }
 0x3c8   : > { %v11340_v14 = vadd.f32 %v8086_v61, %v5832_v45  ;;  %v7980_v62 = vadd.f32 %v7979_v33, %v7978_v24 }
 0x3c9   : > { %v8088_v56 = vpop.f32.mrf.mxu0  ;;  %v7981_v20 = vpop.f32.mrf.mxu1 }
 0x3ca   : > { %v8089_v38 = vadd.f32 %v8088_v56, %v8087_v34  ;;  %v5840_v47 = vadd.f32 %v7980_v62, %v11221_v55 }
 0x3cb   : > { %v8090_v30 = vpop.f32.mrf.mxu0  ;;  %v7982_v12 = vpop.f32.mrf.mxu1 }
 0x3cc   : > { %v11343_v43 = vadd.f32 %v8089_v38, %v5837_v4  ;;  %v7983_v44 = vadd.f32 %v7982_v12, %v7981_v20 }
 0x3cd   : > { %v8091_v52 = vpop.f32.mrf.mxu0  ;;  %v7984_v36 = vpop.f32.mrf.mxu1 }
 0x3ce   : > { %v8092_v29 = vadd.f32 %v8091_v52, %v8090_v30  ;;  %v5845_v49 = vadd.f32 %v7983_v44, %v11226_v5 }
 0x3cf   : > { %v8093_v40 = vpop.f32.mrf.mxu0  ;;  %v7985_v59 = vpop.f32.mrf.mxu1 }
 0x3d0   : > { %v11346_v3 = vadd.f32 %v8092_v29, %v5840_v47  ;;  %v7986_v22 = vadd.f32 %v7985_v59, %v7984_v36 }
 0x3d1   : > { %v8094_v11 = vpop.f32.mrf.mxu0  ;;  %v7987_v39 = vpop.f32.mrf.mxu1 }
 0x3d2   : > { %v8095_v10 = vadd.f32 %v8094_v11, %v8093_v40  ;;  %v5848_v55 = vadd.f32 %v7986_v22, %v11231_v15 }
 0x3d3   : > { %v8096_v50 = vpop.f32.mrf.mxu0  ;;  %v7988_v28 = vpop.f32.mrf.mxu1 }
 0x3d4   : > { %v11349_v19 = vadd.f32 %v8095_v10, %v5845_v49  ;;  %v7989_v45 = vadd.f32 %v7988_v28, %v7987_v39 }
 0x3d5   : > { %v8097_v13 = vpop.f32.mrf.mxu0  ;;  %v7990_v25 = vpop.f32.mrf.mxu1 }
 0x3d6   : > { %v8098_v35 = vadd.f32 %v8097_v13, %v8096_v50  ;;  %v5853_v5 = vadd.f32 %v7989_v45, %v11236_v32 }
 0x3d7   : > { %v8099_v18 = vpop.f32.mrf.mxu0  ;;  %v7991_v61 = vpop.f32.mrf.mxu1 }
 0x3d8   : > { %v11352_v24 = vadd.f32 %v8098_v35, %v5848_v55  ;;  %v7992_v4 = vadd.f32 %v7991_v61, %v7990_v25 }
 0x3d9   : > { %v8100_v34 = vpop.f32.mrf.mxu0  ;;  %v7993_v62 = vpop.f32.mrf.mxu1 }
 0x3da   : > { %v8101_v33 = vadd.f32 %v8100_v34, %v8099_v18  ;;  %v5856_v15 = vadd.f32 %v7992_v4, %v11241_v0 }
 0x3db   : > { %v8102_v56 = vpop.f32.mrf.mxu0  ;;  %v7994_v38 = vpop.f32.mrf.mxu1 }
 0x3dc   : > { %v11355_v20 = vadd.f32 %v8101_v33, %v5853_v5  ;;  %v7995_v47 = vadd.f32 %v7994_v38, %v7993_v62 }
 0x3dd   : > { %v8103_v30 = vpop.f32.mrf.mxu0  ;;  %v7996_v44 = vpop.f32.mrf.mxu1 }
 0x3de   : > { %v8104_v12 = vadd.f32 %v8103_v30, %v8102_v56  ;;  %v5861_v32 = vadd.f32 %v7995_v47, %v11246_v41 }
 0x3df   : > { %v8105_v52 = vpop.f32.mrf.mxu0  ;;  %v7997_v29 = vpop.f32.mrf.mxu1 }
 0x3e0   : > { %v11358_v36 = vadd.f32 %v8104_v12, %v5856_v15  ;;  %v7998_v49 = vadd.f32 %v7997_v29, %v7996_v44 }
 0x3e1   : > { %v8106_v40 = vpop.f32.mrf.mxu0  ;;  %v7999_v22 = vpop.f32.mrf.mxu1 }
 0x3e2   : > { %v8107_v59 = vadd.f32 %v8106_v40, %v8105_v52  ;;  %v5864_v0 = vadd.f32 %v7998_v49, %v11251_v16 }
 0x3e3   : > { %v8108_v11 = vpop.f32.mrf.mxu0  ;;  %v8000_v10 = vpop.f32.mrf.mxu1 }
 0x3e4   : > { %v11361_v39 = vadd.f32 %v8107_v59, %v5861_v32  ;;  %v8001_v55 = vadd.f32 %v8000_v10, %v7999_v22 }
 0x3e5   : > { %v8109_v50 = vpop.f32.mrf.mxu0  ;;  %v8002_v45 = vpop.f32.mrf.mxu1 }
 0x3e6   : > { %v8110_v28 = vadd.f32 %v8109_v50, %v8108_v11  ;;  %v5869_v41 = vadd.f32 %v8001_v55, %v11256_v21 }
 0x3e7   : > { %v8111_v13 = vpop.f32.mrf.mxu0  ;;  %v8003_v35 = vpop.f32.mrf.mxu1 }
 0x3e8   : > { %v11364_v25 = vadd.f32 %v8110_v28, %v5864_v0  ;;  %v8004_v5 = vadd.f32 %v8003_v35, %v8002_v45 }
 0x3e9   : > { %v8112_v18 = vpop.f32.mrf.mxu0  ;;  %v8005_v4 = vpop.f32.mrf.mxu1 }
 0x3ea   : > { %v8113_v61 = vadd.f32 %v8112_v18, %v8111_v13  ;;  %v5872_v16 = vadd.f32 %v8004_v5, %v11261_v26 }
 0x3eb   : > { %v8114_v34 = vpop.f32.mrf.mxu0  ;;  %v8006_v33 = vpop.f32.mrf.mxu1 }
 0x3ec   : > { %v11367_v62 = vadd.f32 %v8113_v61, %v5869_v41  ;;  %v8007_v15 = vadd.f32 %v8006_v33, %v8005_v4 }
 0x3ed   : > { %v8115_v56 = vpop.f32.mrf.mxu0  ;;  %v8008_v47 = vpop.f32.mrf.mxu1 }
 0x3ee   : > { %v8116_v38 = vadd.f32 %v8115_v56, %v8114_v34  ;;  %v5877_v21 = vadd.f32 %v8007_v15, %v11266_v42 }
 0x3ef   : > { %v8117_v30 = vpop.f32.mrf.mxu0  ;;  %v8009_v12 = vpop.f32.mrf.mxu1 }
 0x3f0   : > { %v11370_v44 = vadd.f32 %v8116_v38, %v5872_v16  ;;  %v8010_v32 = vadd.f32 %v8009_v12, %v8008_v47 }
 0x3f1   : > { %v8118_v52 = vpop.f32.mrf.mxu0  ;;  %v8011_v49 = vpop.f32.mrf.mxu1 }
 0x3f2   : > { %v8119_v29 = vadd.f32 %v8118_v52, %v8117_v30  ;;  %v5880_v26 = vadd.f32 %v8010_v32, %v11271_v48 }
 0x3f3   : > { %v8120_v40 = vpop.f32.mrf.mxu0  ;;  %v8012_v59 = vpop.f32.mrf.mxu1 }
 0x3f4   : > { %v11373_v22 = vadd.f32 %v8119_v29, %v5877_v21  ;;  %v8013_v0 = vadd.f32 %v8012_v59, %v8011_v49 }
 0x3f5   : > { %v8121_v11 = vpop.f32.mrf.mxu0  ;;  %v8014_v55 = vpop.f32.mrf.mxu1 }
 0x3f6   : > { %v8122_v10 = vadd.f32 %v8121_v11, %v8120_v40  ;;  %v5885_v42 = vadd.f32 %v8013_v0, %v11276_v1 }
 0x3f7   : > { %v8123_v50 = vpop.f32.mrf.mxu0  ;;  %v8015_v28 = vpop.f32.mrf.mxu1 }
 0x3f8   : > { %v11376_v45 = vadd.f32 %v8122_v10, %v5880_v26  ;;  %v8016_v41 = vadd.f32 %v8015_v28, %v8014_v55 }
 0x3f9   : > { %v8124_v13 = vpop.f32.mrf.mxu0  ;;  %v8017_v5 = vpop.f32.mrf.mxu1 }
 0x3fa   : > { %v8125_v35 = vadd.f32 %v8124_v13, %v8123_v50  ;;  %v5888_v48 = vadd.f32 %v8016_v41, %v11281_v57 }
 0x3fb   : > { %v8126_v18 = vpop.f32.mrf.mxu0  ;;  %v8018_v61 = vpop.f32.mrf.mxu1 }
 0x3fc   : > { %v11379_v4 = vadd.f32 %v8125_v35, %v5885_v42  ;;  %v8019_v16 = vadd.f32 %v8018_v61, %v8017_v5  ;;  %v11403_v5 = vld [vmem:[%s11505_s6] ss:$0 sm:$0xff] }
 0x3fd   : > { %v8127_v34 = vpop.f32.mrf.mxu0  ;;  %v8020_v15 = vpop.f32.mrf.mxu1 }
 0x3fe   : > { %v8128_v33 = vadd.f32 %v8127_v34, %v8126_v18  ;;  %v5893_v1 = vadd.f32 %v8019_v16, %v11286_v63 }
 0x3ff   : > { %v8129_v56 = vpop.f32.mrf.mxu0  ;;  %v8021_v38 = vpop.f32.mrf.mxu1 }
 0x400   : > { %v11382_v47 = vadd.f32 %v8128_v33, %v5888_v48  ;;  %v8022_v21 = vadd.f32 %v8021_v38, %v8020_v15 }
 0x401   : > { %v8130_v30 = vpop.f32.mrf.mxu0  ;;  %v8023_v32 = vpop.f32.mrf.mxu1 }
 0x402   : > { %v8131_v12 = vadd.f32 %v8130_v30, %v8129_v56  ;;  %v5896_v57 = vadd.f32 %v8022_v21, %v11291_v6 }
 0x403   : > { %v8132_v52 = vpop.f32.mrf.mxu0  ;;  %v8024_v29 = vpop.f32.mrf.mxu1 }
 0x404   : > { %v11385_v49 = vadd.f32 %v8131_v12, %v5893_v1  ;;  %v8025_v40 = vadd.f32 %v8024_v29, %v8023_v32 }
 0x405   : > { %v8133_v26 = vpop.f32.mrf.mxu0  ;;  %v11387_v0 = vpop.f32.mrf.mxu1 }
 0x406   : > { %v8134_v59 = vadd.f32 %v8133_v26, %v8132_v52  ;;  %v5901_v42 = vadd.f32 %v8025_v40, %v11294_v51 }
 0x407   : > { %v8135_v63 = vpop.f32.mrf.mxu0  ;;  %v11389_v11 = vpop.f32.mrf.mxu1 }
 0x408   : > { %v11391_v10 = vadd.f32 %v8134_v59, %v5896_v57 }
 0x409   : > { %v8136_v55 = vpop.f32.mrf.mxu0  ;;  %v8506_v28 = vpop.f32.mrf.mxu1 }
 0x40a   : > { %v8137_v50 = vadd.f32 %v8136_v55, %v8135_v63  ;;  %v6111_v34 = vadd.f32 %v8506_v28, %v11307_v7 }
 0x40b   : > { %v11394_v6 = vpop.f32.mrf.mxu0  ;;  %v6102_v41 = vpop.f32.mrf.mxu1 }
 0x40c   : > { %v11396_v13 = vadd.f32 %v8137_v50, %v5901_v42  ;;  %v6103_v56 = vadd.f32 %v6102_v41, %v11301_v46 }
 0x40d   : > { %v11398_v35 = vpop.f32.mrf.mxu0  ;;  %v8507_v48 = vpop.f32.mrf.mxu1 }
 0x40e   : > { %v6114_v38 = vadd.f32 %v8507_v48, %v11310_v58 }
 0x40f   : > { %v8540_v18 = vpop.f32.mrf.mxu0  ;;  %v6105_v16 = vpop.f32.mrf.mxu1 }
 0x410   : > { %v6283_v61 = vadd.f32 %v8540_v18, %v11403_v5  ;;  %v6106_v57 = vadd.f32 %v6105_v16, %v11304_v53 }
 0x411   : > { %v6274_v51 = vpop.f32.mrf.mxu0  ;;  %v8510_v15 = vpop.f32.mrf.mxu1 }
 0x412   : > { %v6275_v33 = vadd.f32 %v11403_v5, %v6274_v51  ;;  %v6403_v21 = vadd.f32 %v6283_v61, %v6111_v34  ;;  %v6127_v42 = vadd.f32 %v8510_v15, %v11319_v23 }
 0x413   : > { %v8541_v1 = vpop.f32.mrf.mxu0  ;;  %v6118_v12 = vpop.f32.mrf.mxu1 }
 0x414   : > { %v6286_v30 = vadd.f32 %v8541_v1, %v11403_v5  ;;  %v6401_v52 = vadd.f32 %v6275_v33, %v6103_v56  ;;  %v6435_v59 = vmax.f32 %v6403_v21, 0.0  ;;  %v6119_v61 = vadd.f32 %v6118_v12, %v11313_v27 }
 0x415   : > { %v6277_v32 = vpop.f32.mrf.mxu0  ;;  %v8511_v26 = vpop.f32.mrf.mxu1 }
 0x416   : > { %v6404_v29 = vadd.f32 %v6286_v30, %v6114_v38  ;;  %v6278_v7 = vadd.f32 %v11403_v5, %v6277_v32  ;;  %v6433_v50 = vmax.f32 %v6401_v52, 0.0  ;;  %v6130_v51 = vadd.f32 %v8511_v26, %v11322_v17 }
 0x417   : > { %v8544_v40 = vpop.f32.mrf.mxu0  ;;  %v6121_v58 = vpop.f32.mrf.mxu1 }
 0x418   : > { %v6436_v63 = vmax.f32 %v6404_v29, 0.0  ;;  %v6402_v55 = vadd.f32 %v6278_v7, %v6106_v57  ;;  %v6299_v46 = vadd.f32 %v8544_v40, %v11403_v5  ;;  %v6122_v56 = vadd.f32 %v6121_v58, %v11316_v9 }
 0x419   : > { %v6290_v53 = vpop.f32.mrf.mxu0  ;;  %v8514_v18 = vpop.f32.mrf.mxu1 }
 0x41a   : > { %v7438_v28 = vpack.c.bf16 %v6436_v63, %v6435_v59  ;;  %v6434_v41 = vmax.f32 %v6402_v55, 0.0  ;;  %v6291_v48 = vadd.f32 %v11403_v5, %v6290_v53  ;;  %v6407_v34 = vadd.f32 %v6299_v46, %v6127_v42 }
 0x41b   : > { %v8545_v16 = vpop.f32.mrf.mxu0  ;;  %v6134_v15 = vpop.f32.mrf.mxu1  ;;  %v6143_v7 = vadd.f32 %v8514_v18, %v11331_v8 }
 0x41c   : > { %7525 = vst [vmem:[%s11420_s29 + $0x8] sm:$0xff] %v7438_v28   ;;  %v7433_v23 = vpack.c.bf16 %v6434_v41, %v6433_v50  ;;  %v6302_v33 = vadd.f32 %v8545_v16, %v11403_v5  ;;  %v6405_v38 = vadd.f32 %v6291_v48, %v6119_v61  ;;  %v6439_v12 = vmax.f32 %v6407_v34, 0.0 }
 0x41d   : > { %v6293_v1 = vpop.f32.mrf.mxu0  ;;  %v8515_v32 = vpop.f32.mrf.mxu1  ;;  %v6135_v46 = vadd.f32 %v6134_v15, %v11325_v37 }
 0x41e   : > { %7434 = vst [vmem:[%s11420_s29] sm:$0xff] %v7433_v23   ;;  %v6408_v21 = vadd.f32 %v6302_v33, %v6130_v51  ;;  %v6294_v30 = vadd.f32 %v11403_v5, %v6293_v1  ;;  %v6437_v40 = vmax.f32 %v6405_v38, 0.0  ;;  %v6146_v53 = vadd.f32 %v8515_v32, %v11334_v2 }
 0x41f   : > { %v8548_v27 = vpop.f32.mrf.mxu0  ;;  %v6137_v29 = vpop.f32.mrf.mxu1 }
 0x420   : > { %v6440_v57 = vmax.f32 %v6408_v21, 0.0  ;;  %v6406_v52 = vadd.f32 %v6294_v30, %v6122_v56  ;;  %v6315_v17 = vadd.f32 %v8548_v27, %v11403_v5  ;;  %v6138_v48 = vadd.f32 %v6137_v29, %v11328_v31 }
 0x421   : > { %v6306_v26 = vpop.f32.mrf.mxu0  ;;  %v8518_v55 = vpop.f32.mrf.mxu1 }
 0x422   : > { %v7448_v59 = vpack.c.bf16 %v6440_v57, %v6439_v12  ;;  %v6438_v9 = vmax.f32 %v6406_v52, 0.0  ;;  %v6307_v63 = vadd.f32 %v11403_v5, %v6306_v26  ;;  %v6411_v50 = vadd.f32 %v6315_v17, %v6143_v7 }
 0x423   : > { %v8549_v58 = vpop.f32.mrf.mxu0  ;;  %v6150_v41 = vpop.f32.mrf.mxu1  ;;  %v6159_v1 = vadd.f32 %v8518_v55, %v11343_v43 }
 0x424   : > { %7527 = vst [vmem:[%s11420_s29 + $0x18] sm:$0xff] %v7448_v59   ;;  %v7443_v42 = vpack.c.bf16 %v6438_v9, %v6437_v40  ;;  %v6318_v28 = vadd.f32 %v8549_v58, %v11403_v5  ;;  %v6409_v18 = vadd.f32 %v6307_v63, %v6135_v46  ;;  %v6443_v51 = vmax.f32 %v6411_v50, 0.0 }
 0x425   : > { %v6309_v8 = vpop.f32.mrf.mxu0  ;;  %v8519_v23 = vpop.f32.mrf.mxu1  ;;  %v6151_v27 = vadd.f32 %v6150_v41, %v11337_v60 }
 0x426   : > { %7526 = vst [vmem:[%s11420_s29 + $0x10] sm:$0xff] %v7443_v42   ;;  %v6412_v61 = vadd.f32 %v6318_v28, %v6146_v53  ;;  %v6310_v16 = vadd.f32 %v11403_v5, %v6309_v8  ;;  %v6441_v38 = vmax.f32 %v6409_v18, 0.0  ;;  %v6162_v52 = vadd.f32 %v8519_v23, %v11346_v3 }
 0x427   : > { %v8552_v37 = vpop.f32.mrf.mxu0  ;;  %v6153_v15 = vpop.f32.mrf.mxu1 }
 0x428   : > { %v6444_v34 = vmax.f32 %v6412_v61, 0.0  ;;  %v6410_v33 = vadd.f32 %v6310_v16, %v6138_v48  ;;  %v6331_v2 = vadd.f32 %v8552_v37, %v11403_v5  ;;  %v6154_v26 = vadd.f32 %v6153_v15, %v11340_v14 }
 0x429   : > { %v6322_v56 = vpop.f32.mrf.mxu0  ;;  %v8522_v32 = vpop.f32.mrf.mxu1 }
 0x42a   : > { %v7458_v21 = vpack.c.bf16 %v6444_v34, %v6443_v51  ;;  %v6442_v31 = vmax.f32 %v6410_v33, 0.0  ;;  %v6323_v30 = vadd.f32 %v11403_v5, %v6322_v56  ;;  %v6415_v17 = vadd.f32 %v6331_v2, %v6159_v1 }
 0x42b   : > { %v8553_v12 = vpop.f32.mrf.mxu0  ;;  %v6166_v7 = vpop.f32.mrf.mxu1  ;;  %v6175_v53 = vadd.f32 %v8522_v32, %v11355_v20 }
 0x42c   : > { %7529 = vst [vmem:[%s11420_s29 + $0x28] sm:$0xff] %v7458_v21   ;;  %v7453_v57 = vpack.c.bf16 %v6442_v31, %v6441_v38  ;;  %v6334_v29 = vadd.f32 %v8553_v12, %v11403_v5  ;;  %v6413_v40 = vadd.f32 %v6323_v30, %v6151_v27  ;;  %v6447_v55 = vmax.f32 %v6415_v17, 0.0 }
 0x42d   : > { %v6325_v43 = vpop.f32.mrf.mxu0  ;;  %v8523_v63 = vpop.f32.mrf.mxu1  ;;  %v6167_v18 = vadd.f32 %v6166_v7, %v11349_v19 }
 0x42e   : > { %7528 = vst [vmem:[%s11420_s29 + $0x20] sm:$0xff] %v7453_v57   ;;  %v6416_v59 = vadd.f32 %v6334_v29, %v6162_v52  ;;  %v6326_v9 = vadd.f32 %v11403_v5, %v6325_v43  ;;  %v6445_v28 = vmax.f32 %v6413_v40, 0.0  ;;  %v6178_v23 = vadd.f32 %v8523_v63, %v11358_v36 }
 0x42f   : > { %v8556_v60 = vpop.f32.mrf.mxu0  ;;  %v6169_v42 = vpop.f32.mrf.mxu1 }
 0x430   : > { %v6448_v46 = vmax.f32 %v6416_v59, 0.0  ;;  %v6414_v58 = vadd.f32 %v6326_v9, %v6154_v26  ;;  %v6347_v3 = vadd.f32 %v8556_v60, %v11403_v5  ;;  %v6170_v33 = vadd.f32 %v6169_v42, %v11352_v24 }
 0x431   : > { %v6338_v50 = vpop.f32.mrf.mxu0  ;;  %v8526_v48 = vpop.f32.mrf.mxu1 }
 0x432   : > { %v7468_v41 = vpack.c.bf16 %v6448_v46, %v6447_v55  ;;  %v6446_v14 = vmax.f32 %v6414_v58, 0.0  ;;  %v6339_v8 = vadd.f32 %v11403_v5, %v6338_v50  ;;  %v6419_v37 = vadd.f32 %v6347_v3, %v6175_v53 }
 0x433   : > { %v8557_v61 = vpop.f32.mrf.mxu0  ;;  %v6182_v34 = vpop.f32.mrf.mxu1  ;;  %v6191_v32 = vadd.f32 %v8526_v48, %v11367_v62 }
 0x434   : > { %7531 = vst [vmem:[%s11420_s29 + $0x38] sm:$0xff] %v7468_v41   ;;  %v7463_v16 = vpack.c.bf16 %v6446_v14, %v6445_v28  ;;  %v6350_v51 = vadd.f32 %v8557_v61, %v11403_v5  ;;  %v6417_v2 = vadd.f32 %v6339_v8, %v6167_v18  ;;  %v6451_v38 = vmax.f32 %v6419_v37, 0.0 }
 0x435   : > { %v6341_v20 = vpop.f32.mrf.mxu0  ;;  %v8527_v56 = vpop.f32.mrf.mxu1  ;;  %v6183_v29 = vadd.f32 %v6182_v34, %v11361_v39  ;;  %v8028_v61 = vadd.f32 %v11389_v11, %v11387_v0 }
 0x436   : > { %7530 = vst [vmem:[%s11420_s29 + $0x30] sm:$0xff] %v7463_v16   ;;  %v6420_v15 = vadd.f32 %v6350_v51, %v6178_v23  ;;  %v6342_v1 = vadd.f32 %v11403_v5, %v6341_v20  ;;  %v6449_v12 = vmax.f32 %v6417_v2, 0.0  ;;  %v6194_v26 = vadd.f32 %v8527_v56, %v11370_v44 }
 0x437   : > { %v8560_v19 = vpop.f32.mrf.mxu0  ;;  %v6185_v30 = vpop.f32.mrf.mxu1  ;;  %v5904_v11 = vadd.f32 %v8028_v61, %v11298_v54 }
 0x438   : > { %v6452_v21 = vmax.f32 %v6420_v15, 0.0  ;;  %v6418_v31 = vadd.f32 %v6342_v1, %v6170_v33  ;;  %v6363_v36 = vadd.f32 %v8560_v19, %v11403_v5  ;;  %v6186_v63 = vadd.f32 %v6185_v30, %v11364_v25 }
 0x439   : > { %v6354_v27 = vpop.f32.mrf.mxu0  ;;  %v8530_v17 = vpop.f32.mrf.mxu1  ;;  %v8140_v33 = vadd.f32 %v11398_v35, %v11394_v6 }
 0x43a   : > { %v7478_v57 = vpack.c.bf16 %v6452_v21, %v6451_v38  ;;  %v6450_v24 = vmax.f32 %v6418_v31, 0.0  ;;  %v6355_v52 = vadd.f32 %v11403_v5, %v6354_v27  ;;  %v6423_v40 = vadd.f32 %v6363_v36, %v6191_v32 }
 0x43b   : > { %v8561_v7 = vpop.f32.mrf.mxu0  ;;  %v6198_v9 = vpop.f32.mrf.mxu1  ;;  %v6207_v28 = vadd.f32 %v8530_v17, %v11379_v4  ;;  %v6065_v35 = vadd.f32 %v8140_v33, %v5904_v11 }
 0x43c   : > { %7533 = vst [vmem:[%s11420_s29 + $0x48] sm:$0xff] %v7478_v57   ;;  %v7473_v43 = vpack.c.bf16 %v6450_v24, %v6449_v12  ;;  %v6366_v59 = vadd.f32 %v8561_v7, %v11403_v5  ;;  %v6421_v60 = vadd.f32 %v6355_v52, %v6183_v29  ;;  %v6455_v39 = vmax.f32 %v6423_v40, 0.0 }
 0x43d   : > { %v6357_v62 = vpop.f32.mrf.mxu0  ;;  %v8531_v58 = vpop.f32.mrf.mxu1  ;;  %v6199_v16 = vadd.f32 %v6198_v9, %v11373_v22 }
 0x43e   : > { %7532 = vst [vmem:[%s11420_s29 + $0x40] sm:$0xff] %v7473_v43   ;;  %v6424_v55 = vadd.f32 %v6366_v59, %v6194_v26  ;;  %v6358_v46 = vadd.f32 %v11403_v5, %v6357_v62  ;;  %v6453_v14 = vmax.f32 %v6421_v60, 0.0  ;;  %v6210_v51 = vadd.f32 %v8531_v58, %v11382_v47 }
 0x43f   : > { %v8564_v3 = vpop.f32.mrf.mxu0  ;;  %v6201_v50 = vpop.f32.mrf.mxu1 }
 0x440   : > { %v6456_v42 = vmax.f32 %v6424_v55, 0.0  ;;  %v6422_v53 = vadd.f32 %v6358_v46, %v6186_v63  ;;  %v6379_v44 = vadd.f32 %v8564_v3, %v11403_v5  ;;  %v6202_v15 = vadd.f32 %v6201_v50, %v11376_v45 }
 0x441   : > { %v6370_v41 = vpop.f32.mrf.mxu0  ;;  %v8534_v18 = vpop.f32.mrf.mxu1 }
 0x442   : > { %v7488_v8 = vpack.c.bf16 %v6456_v42, %v6455_v39  ;;  %v6454_v25 = vmax.f32 %v6422_v53, 0.0  ;;  %v6371_v48 = vadd.f32 %v11403_v5, %v6370_v41  ;;  %v6427_v34 = vadd.f32 %v6379_v44, %v6207_v28 }
 0x443   : > { %v8565_v23 = vpop.f32.mrf.mxu0  ;;  %v6214_v20 = vpop.f32.mrf.mxu1  ;;  %v6223_v6 = vadd.f32 %v8534_v18, %v11396_v13 }
 0x444   : > { %7535 = vst [vmem:[%s11420_s29 + $0x58] sm:$0xff] %v7488_v8   ;;  %v7483_v37 = vpack.c.bf16 %v6454_v25, %v6453_v14  ;;  %v6382_v4 = vadd.f32 %v8565_v23, %v11403_v5  ;;  %v6425_v1 = vadd.f32 %v6371_v48, %v6199_v16  ;;  %v6459_v19 = vmax.f32 %v6427_v34, 0.0 }
 0x445   : > { %v6373_v2 = vpop.f32.mrf.mxu0  ;;  %v8535_v56 = vpop.f32.mrf.mxu1  ;;  %v6215_v54 = vadd.f32 %v6214_v20, %v11385_v49 }
 0x446   : > { %7534 = vst [vmem:[%s11420_s29 + $0x50] sm:$0xff] %v7483_v37   ;;  %v6428_v0 = vadd.f32 %v6382_v4, %v6210_v51  ;;  %v6374_v22 = vadd.f32 %v11403_v5, %v6373_v2  ;;  %v6457_v45 = vmax.f32 %v6425_v1, 0.0  ;;  %v6226_v52 = vadd.f32 %v8535_v56, %v6065_v35 }
 0x447   : > { %v8568_v47 = vpop.f32.mrf.mxu0  ;;  %v6217_v12 = vpop.f32.mrf.mxu1 }
 0x448   : > { %v6460_v38 = vmax.f32 %v6428_v0, 0.0  ;;  %v6426_v21 = vadd.f32 %v6374_v22, %v6202_v15  ;;  %v6395_v31 = vadd.f32 %v8568_v47, %v11403_v5  ;;  %v6218_v7 = vadd.f32 %v6217_v12, %v11391_v10 }
 0x449   : > { %v6386_v36 = vpop.f32.mrf.mxu0 }
 0x44a   : > { %v7498_v30 = vpack.c.bf16 %v6460_v38, %v6459_v19  ;;  %v6458_v32 = vmax.f32 %v6426_v21, 0.0  ;;  %v6387_v27 = vadd.f32 %v11403_v5, %v6386_v36  ;;  %v6431_v17 = vadd.f32 %v6395_v31, %v6223_v6 }
 0x44b   : > { %v8569_v57 = vpop.f32.mrf.mxu0 }
 0x44c   : > { %7537 = vst [vmem:[%s11420_s29 + $0x68] sm:$0xff] %v7498_v30   ;;  %v7493_v24 = vpack.c.bf16 %v6458_v32, %v6457_v45  ;;  %v6398_v13 = vadd.f32 %v8569_v57, %v11403_v5  ;;  %v6429_v43 = vadd.f32 %v6387_v27, %v6215_v54  ;;  %v6463_v59 = vmax.f32 %v6431_v17, 0.0 }
 0x44d   : > { %v6389_v29 = vpop.f32.mrf.mxu0 }
 0x44e   : > { %7536 = vst [vmem:[%s11420_s29 + $0x60] sm:$0xff] %v7493_v24   ;;  %v6432_v26 = vadd.f32 %v6398_v13, %v6226_v52  ;;  %v6390_v40 = vadd.f32 %v11403_v5, %v6389_v29  ;;  %v6461_v62 = vmax.f32 %v6429_v43, 0.0 }
 0x450   : > { %v6464_v49 = vmax.f32 %v6432_v26, 0.0  ;;  %v6430_v9 = vadd.f32 %v6390_v40, %v6218_v7 }
 0x452   : > { %v7508_v63 = vpack.c.bf16 %v6464_v49, %v6463_v59  ;;  %v6462_v60 = vmax.f32 %v6430_v9, 0.0 }
 0x454   : > { %7539 = vst [vmem:[%s11420_s29 + $0x78] sm:$0xff] %v7508_v63   ;;  %v7503_v55 = vpack.c.bf16 %v6462_v60, %v6461_v62 }
 0x456   : > { %7538 = vst [vmem:[%s11420_s29 + $0x70] sm:$0xff] %v7503_v55  }
 0x457 PF: > { %s18_s24 = sadd.s32 1, %s8926_s24  }
 0x458   : > { %p15_p1 = scmp.ge.s32.totalorder %s18_s24, 4  }
 0x45a   :  { %17 = sbr.rel (!%p15_p1) target bundleno = 1 (0x1), region = 87 }
 0x45f   :  { %6646 = vsyncpa [#allocation6], 1 }
 0x460   :  { %6648 = vsyncpa [#allocation6 + $0x1], 1 }

</bundles_post_ra>
